<compile_context>
chip_gen: v7x
topology: tpu7x:2x2x1
jax: 0.10.0
libtpu: 0.0.40
codegen_flags: <defaults>
</compile_context>

<pallas_src>
import functools
import math

import jax
import jax.numpy as jnp
from jax import lax
from jax.experimental import pallas as pl
from jax.experimental.pallas import tpu as pltpu

# Whole-array-in-VMEM spec (no grid) for the small dense kernels.
VMEM_SPEC = pl.BlockSpec(memory_space=pltpu.MemorySpace.VMEM)

LN_EPS = 1e-5


# ----------------------------------------------------------------------------
# Pallas kernels
# ----------------------------------------------------------------------------
def _proj_kernel(x_ref, w_ref, b_ref, o_ref):
    """o = x @ w + b. x:(M,K) w:(K,N) b:(1,N)."""
    y = jnp.dot(x_ref[...], w_ref[...], preferred_element_type=jnp.float32)
    o_ref[...] = (y + b_ref[...]).astype(o_ref.dtype)


def _proj_pe_kernel(x_ref, w_ref, b_ref, pe_ref, o_ref):
    """o = x @ w + b + pe (input layer + positional encoding fused)."""
    y = jnp.dot(x_ref[...], w_ref[...], preferred_element_type=jnp.float32)
    o_ref[...] = (y + b_ref[...] + pe_ref[...]).astype(o_ref.dtype)


def _layernorm(y, g, b, eps):
    mu = jnp.mean(y, axis=-1, keepdims=True)
    var = jnp.mean(jnp.square(y - mu), axis=-1, keepdims=True)
    return (y - mu) * lax.rsqrt(var + eps) * g + b


def _mha_block_kernel(x_ref, m_ref, wq_ref, bq_ref, wkv_ref, bkv_ref,
                      wo_ref, bo_ref, g_ref, beta_ref, *rest,
                      n_heads, scale, use_mask, eps):
    """Fused multi-head-attention block for ONE batch element.

    x:(1,T,D) query stream (also the residual input)
    m:(1,S,D) key/value stream (== x for self-attention)
    wq:(D,D) bq:(1,D)  wkv:(D,2D) bkv:(1,2D)  wo:(D,D) bo:(1,D)
    g,beta:(1,D) LayerNorm params of the norm following this block
    optional additive mask:(T,S)
    out:(1,T,D) = LayerNorm(x + MHA(x, m, m))
    """
    if use_mask:
        mask_ref, o_ref = rest
    else:
        (o_ref,) = rest

    x = x_ref[0].astype(jnp.float32)          # (T, D)
    mem = m_ref[0].astype(jnp.float32)        # (S, D)
    T, D = x.shape
    dh = D // n_heads

    wq = wq_ref[...]
    wkv = wkv_ref[...]
    wo = wo_ref[...]

    # Packed projections: q:(T,D)  kv:(S,2D)  (all heads lane-packed).
    q = jnp.dot(x, wq, preferred_element_type=jnp.float32) + bq_ref[...]
    kv = jnp.dot(mem, wkv, preferred_element_type=jnp.float32) + bkv_ref[...]

    # Per-head attention, statically unrolled; output projection is
    # accumulated per head (no concat / no HBM transposes).
    o = jnp.zeros((T, D), jnp.float32)
    for h in range(n_heads):
        qh = q[:, h * dh:(h + 1) * dh]            # (T, dh)
        kh = kv[:, h * dh:(h + 1) * dh]           # (S, dh)
        vh = kv[:, D + h * dh:D + (h + 1) * dh]   # (S, dh)

        # scores: contract dh directly (no explicit transpose of k)
        s = lax.dot_general(qh, kh, (((1,), (1,)), ((), ())),
                            preferred_element_type=jnp.float32) * scale  # (T,S)
        if use_mask:
            s = s + mask_ref[...]
        s = s - jnp.max(s, axis=-1, keepdims=True)
        p = jnp.exp(s)
        p = p * pl.reciprocal(jnp.sum(p, axis=-1, keepdims=True), approx=True)

        out_h = jnp.dot(p, vh, preferred_element_type=jnp.float32)        # (T,dh)
        o = o + jnp.dot(out_h, wo[h * dh:(h + 1) * dh, :],
                        preferred_element_type=jnp.float32)               # (T,D)
    o = o + bo_ref[...]

    # residual + post-norm (PyTorch TransformerEncoder/DecoderLayer default)
    y = _layernorm(x + o, g_ref[...], beta_ref[...], eps)
    o_ref[0] = y.astype(o_ref.dtype)


def _ffn_block_kernel(x_ref, w1_ref, b1_ref, w2_ref, b2_ref, g_ref, beta_ref,
                      o_ref, *, eps):
    """Fused feed-forward block: LN(x + W2(relu(W1 x + b1)) + b2). x:(M,D)."""
    x = x_ref[...].astype(jnp.float32)
    h = jnp.dot(x, w1_ref[...], preferred_element_type=jnp.float32) + b1_ref[...]
    h = jnp.maximum(h, 0.0)
    o = jnp.dot(h, w2_ref[...], preferred_element_type=jnp.float32) + b2_ref[...]
    y = _layernorm(x + o, g_ref[...], beta_ref[...], eps)
    o_ref[...] = y.astype(o_ref.dtype)


# ----------------------------------------------------------------------------
# Wrappers (one pallas_call per fused block)
# ----------------------------------------------------------------------------
def dense(x, w, b):
    """x:(M,K) @ w:(K,N) + b:(1,N), single VMEM-resident kernel."""
    M = x.shape[0]
    N = w.shape[1]
    return pl.pallas_call(
        _proj_kernel,
        out_shape=jax.ShapeDtypeStruct((M, N), x.dtype),
        in_specs=[VMEM_SPEC] * 3,
        out_specs=VMEM_SPEC,
    )(x, w, b)


def dense_pe(x, w, b, pe):
    """Input layer + positional-encoding add, fused."""
    M = x.shape[0]
    N = w.shape[1]
    return pl.pallas_call(
        _proj_pe_kernel,
        out_shape=jax.ShapeDtypeStruct((M, N), x.dtype),
        in_specs=[VMEM_SPEC] * 4,
        out_specs=VMEM_SPEC,
    )(x, w, b, pe)


def mha_block(x, mem, p, n_heads, mask=None):
    """Fused MHA + residual + LayerNorm.  Grid over batch only."""
    B, T, D = x.shape
    S = mem.shape[1]
    dh = D // n_heads
    use_mask = mask is not None

    kernel = functools.partial(_mha_block_kernel, n_heads=n_heads,
                               scale=1.0 / math.sqrt(dh),
                               use_mask=use_mask, eps=LN_EPS)

    in_specs = [
        pl.BlockSpec((1, T, D), lambda b: (b, 0, 0)),       # x (query stream)
        pl.BlockSpec((1, S, D), lambda b: (b, 0, 0)),       # memory (kv stream)
        pl.BlockSpec((D, D), lambda b: (0, 0)),             # wq
        pl.BlockSpec((1, D), lambda b: (0, 0)),             # bq
        pl.BlockSpec((D, 2 * D), lambda b: (0, 0)),         # wkv (packed)
        pl.BlockSpec((1, 2 * D), lambda b: (0, 0)),         # bkv (packed)
        pl.BlockSpec((D, D), lambda b: (0, 0)),             # wo
        pl.BlockSpec((1, D), lambda b: (0, 0)),             # bo
        pl.BlockSpec((1, D), lambda b: (0, 0)),             # ln gamma
        pl.BlockSpec((1, D), lambda b: (0, 0)),             # ln beta
    ]
    args = [x, mem, p["wq"], p["bq"], p["wkv"], p["bkv"], p["wo"], p["bo"],
            p["ln_g"], p["ln_b"]]
    if use_mask:
        in_specs.append(pl.BlockSpec((T, S), lambda b: (0, 0)))
        args.append(mask)

    return pl.pallas_call(
        kernel,
        out_shape=jax.ShapeDtypeStruct((B, T, D), x.dtype),
        grid=(B,),
        in_specs=in_specs,
        out_specs=pl.BlockSpec((1, T, D), lambda b: (b, 0, 0)),
        compiler_params=pltpu.CompilerParams(dimension_semantics=("parallel",)),
    )(*args)


def ffn_block(x, p):
    """Fused FFN + residual + LayerNorm on flattened rows."""
    B, T, D = x.shape
    M = B * T
    out = pl.pallas_call(
        functools.partial(_ffn_block_kernel, eps=LN_EPS),
        out_shape=jax.ShapeDtypeStruct((M, D), x.dtype),
        in_specs=[VMEM_SPEC] * 7,
        out_specs=VMEM_SPEC,
    )(x.reshape(M, D), p["w1"], p["b1"], p["w2"], p["b2"], p["ln_g"], p["ln_b"])
    return out.reshape(B, T, D)


# ----------------------------------------------------------------------------
# Model forward (mirrors TimeSeriesTransformer.forward, eval mode)
# ----------------------------------------------------------------------------
def time_series_transformer_forward(params, src, tgt, pe, src_mask, tgt_mask,
                                    n_heads):
    B, S, _ = src.shape
    _, T, _ = tgt.shape
    D = params["encoder_input"]["w"].shape[1]

    # encoder input layer + positional encoding (fused)
    x = dense_pe(src.reshape(B * S, -1),
                 params["encoder_input"]["w"], params["encoder_input"]["b"],
                 pe).reshape(B, S, D)

    # encoder stack (no self-attn mask in the reference forward)
    for lp in params["encoder_layers"]:
        x = mha_block(x, x, lp["self_attn"], n_heads, mask=None)
        x = ffn_block(x, lp["ffn"])
    memory = x

    # decoder input layer (reference applies no positional encoding to tgt)
    y = dense(tgt.reshape(B * T, -1),
              params["decoder_input"]["w"],
              params["decoder_input"]["b"]).reshape(B, T, D)

    # decoder stack: causal self-attn (tgt_mask) + cross-attn (src_mask) + FFN
    for lp in params["decoder_layers"]:
        y = mha_block(y, y, lp["self_attn"], n_heads, mask=tgt_mask)
        y = mha_block(y, memory, lp["cross_attn"], n_heads, mask=src_mask)
        y = ffn_block(y, lp["ffn"])

    # flatten(start_dim=1) + final linear mapping
    out = dense(y.reshape(B, T * D),
                params["linear_mapping"]["w"], params["linear_mapping"]["b"])
    return out


# ----------------------------------------------------------------------------
# Host-side constants (precomputed once, outside jit)
# ----------------------------------------------------------------------------
def positional_encoding(seq_len, d_model):
    """Standard sinusoidal positional encoding (Vaswani et al. 2017)."""
    pos = jnp.arange(seq_len, dtype=jnp.float32)[:, None]
    div = jnp.exp(jnp.arange(0, d_model, 2, dtype=jnp.float32)
                  * (-math.log(10000.0) / d_model))
    pe = jnp.zeros((seq_len, d_model), jnp.float32)
    pe = pe.at[:, 0::2].set(jnp.sin(pos * div))
    pe = pe.at[:, 1::2].set(jnp.cos(pos * div))
    return pe


def subsequent_mask(dim1, dim2):
    """Additive mask: -1e9 where j > i (like generate_square_subsequent_mask)."""
    i = jnp.arange(dim1)[:, None]
    j = jnp.arange(dim2)[None, :]
    return jnp.where(j > i, -1e9, 0.0).astype(jnp.float32)


# ----------------------------------------------------------------------------
# Deterministic parameter init (synthetic weights, same shapes as the module)
# ----------------------------------------------------------------------------
def _dense_p(key, din, dout, scale=0.02):
    kw, kb = jax.random.split(key)
    return {"w": scale * jax.random.normal(kw, (din, dout), jnp.float32),
            "b": scale * jax.random.normal(kb, (1, dout), jnp.float32)}


def _attn_block_p(key, d, scale=0.02):
    ks = jax.random.split(key, 8)
    wk = scale * jax.random.normal(ks[2], (d, d), jnp.float32)
    wv = scale * jax.random.normal(ks[4], (d, d), jnp.float32)
    bk = scale * jax.random.normal(ks[3], (1, d), jnp.float32)
    bv = scale * jax.random.normal(ks[5], (1, d), jnp.float32)
    return {"wq": scale * jax.random.normal(ks[0], (d, d), jnp.float32),
            "bq": scale * jax.random.normal(ks[1], (1, d), jnp.float32),
            "wkv": jnp.concatenate([wk, wv], axis=1),     # (d, 2d) packed
            "bkv": jnp.concatenate([bk, bv], axis=1),     # (1, 2d) packed
            "wo": scale * jax.random.normal(ks[6], (d, d), jnp.float32),
            "bo": scale * jax.random.normal(ks[7], (1, d), jnp.float32),
            "ln_g": jnp.ones((1, d), jnp.float32),
            "ln_b": jnp.zeros((1, d), jnp.float32)}


def _ffn_block_p(key, d, dff):
    k1, k2 = jax.random.split(key)
    l1 = _dense_p(k1, d, dff)
    l2 = _dense_p(k2, dff, d)
    return {"w1": l1["w"], "b1": l1["b"], "w2": l2["w"], "b2": l2["b"],
            "ln_g": jnp.ones((1, d), jnp.float32),
            "ln_b": jnp.zeros((1, d), jnp.float32)}


def _enc_layer_p(key, d, dff):
    k1, k2 = jax.random.split(key)
    return {"self_attn": _attn_block_p(k1, d), "ffn": _ffn_block_p(k2, d, dff)}


def _dec_layer_p(key, d, dff):
    k1, k2, k3 = jax.random.split(key, 3)
    return {"self_attn": _attn_block_p(k1, d),
            "cross_attn": _attn_block_p(k2, d),
            "ffn": _ffn_block_p(k3, d, dff)}


def make_params(key, input_size, dim_val, out_seq_len, n_enc, n_dec,
                dff_enc, dff_dec):
    keys = jax.random.split(key, 3 + n_enc + n_dec)
    return {
        "encoder_input": _dense_p(keys[0], input_size, dim_val),
        "decoder_input": _dense_p(keys[1], input_size, dim_val),
        "linear_mapping": _dense_p(keys[2], dim_val * out_seq_len, out_seq_len),
        "encoder_layers": [_enc_layer_p(keys[3 + i], dim_val, dff_enc)
                           for i in range(n_enc)],
        "decoder_layers": [_dec_layer_p(keys[3 + n_enc + i], dim_val, dff_dec)
                           for i in range(n_dec)],
    }


# ----------------------------------------------------------------------------
if __name__ == "__main__":
    # Small, shape-consistent configuration
    batch = 2
    input_size = 4          # number of input variables
    enc_seq_len = 16        # S
    out_seq_len = 8         # T (decoder / target sequence length)
    dim_val = 32            # d_model
    n_heads = 4
    n_encoder_layers = 2
    n_decoder_layers = 2
    dim_ff = 64

    key = jax.random.PRNGKey(0)
    k_params, k_src, k_tgt = jax.random.split(key, 3)

    params = make_params(k_params, input_size, dim_val, out_seq_len,
                         n_encoder_layers, n_decoder_layers, dim_ff, dim_ff)

    src = jax.random.normal(k_src, (batch, enc_seq_len, input_size), jnp.float32)
    tgt = jax.random.normal(k_tgt, (batch, out_seq_len, input_size), jnp.float32)

    # Precomputed (hoisted out of the jitted forward):
    pe = positional_encoding(enc_seq_len, dim_val)            # (S, D)
    pe_rows = jnp.tile(pe, (batch, 1))                        # (B*S, D)
    src_mask = subsequent_mask(out_seq_len, enc_seq_len)      # memory mask (T, S)
    tgt_mask = subsequent_mask(out_seq_len, out_seq_len)      # causal mask (T, T)

    fwd = jax.jit(functools.partial(time_series_transformer_forward,
                                    n_heads=n_heads))
    out = fwd(params, src, tgt, pe_rows, src_mask, tgt_mask)
    out = jax.block_until_ready(out)

    assert out.shape == (batch, out_seq_len), out.shape
    assert bool(jnp.all(jnp.isfinite(out)))
    # TODO(synk): dropout layers are identity (eval mode); training-mode dropout not implemented.
    print("KERNEL_OK")
</pallas_src>

<mosaic_0001>
module attributes {stable_mosaic.version = 11 : i64} {
  func.func @_proj_pe_kernel(%arg0: memref<32x4xf32, #tpu.memory_space<vmem>>, %arg1: memref<4x32xf32, #tpu.memory_space<vmem>>, %arg2: memref<1x32xf32, #tpu.memory_space<vmem>>, %arg3: memref<32x32xf32, #tpu.memory_space<vmem>>, %arg4: memref<32x32xf32, #tpu.memory_space<vmem>>) attributes {dimension_semantics = [], scalar_prefetch = 0 : i64, scratch_operands = 0 : i64, tpu.core_type = #tpu.core_type<tc>} {
    %c0 = arith.constant 0 : index
    %c0_0 = arith.constant 0 : index
    %0 = vector.load %arg0[%c0, %c0_0] : memref<32x4xf32, #tpu.memory_space<vmem>>, vector<32x4xf32>
    %c0_1 = arith.constant 0 : index
    %c0_2 = arith.constant 0 : index
    %1 = vector.load %arg1[%c0_1, %c0_2] : memref<4x32xf32, #tpu.memory_space<vmem>>, vector<4x32xf32>
    %cst = arith.constant dense<0.000000e+00> : vector<32x32xf32>
    %2 = tpu.matmul %0, %1, %cst {dimension_numbers = #tpu.dot_dimension_numbers<[1], [0], [0], [1], [0, 0, 1, 1], [], []>} : vector<32x4xf32>, vector<4x32xf32>, vector<32x32xf32> -> vector<32x32xf32>
    %c0_3 = arith.constant 0 : index
    %c0_4 = arith.constant 0 : index
    %3 = vector.load %arg2[%c0_3, %c0_4] : memref<1x32xf32, #tpu.memory_space<vmem>>, vector<1x32xf32>
    %4 = vector.broadcast %3 : vector<1x32xf32> to vector<32x32xf32>
    %5 = arith.addf %2, %4 : vector<32x32xf32>
    %c0_5 = arith.constant 0 : index
    %c0_6 = arith.constant 0 : index
    %6 = vector.load %arg3[%c0_5, %c0_6] : memref<32x32xf32, #tpu.memory_space<vmem>>, vector<32x32xf32>
    %7 = arith.addf %5, %6 : vector<32x32xf32>
    %c0_7 = arith.constant 0 : index
    %c0_8 = arith.constant 0 : index
    %8 = vector.load %arg4[%c0_7, %c0_8] : memref<32x32xf32, #tpu.memory_space<vmem>>, vector<32x32xf32>
    tpu.vector_store %arg4[%c0_7, %c0_8], %7 {strides = array<i32>} : memref<32x32xf32, #tpu.memory_space<vmem>>, vector<32x32xf32>,
    return
  }
}

module attributes {stable_mosaic.version = 11 : i64} {
  func.func @_mha_block_kernel(%arg0: i32, %arg1: memref<1x16x32xf32, #tpu.memory_space<vmem>>, %arg2: memref<1x16x32xf32, #tpu.memory_space<vmem>>, %arg3: memref<32x32xf32, #tpu.memory_space<vmem>>, %arg4: memref<1x32xf32, #tpu.memory_space<vmem>>, %arg5: memref<32x64xf32, #tpu.memory_space<vmem>>, %arg6: memref<1x64xf32, #tpu.memory_space<vmem>>, %arg7: memref<32x32xf32, #tpu.memory_space<vmem>>, %arg8: memref<1x32xf32, #tpu.memory_space<vmem>>, %arg9: memref<1x32xf32, #tpu.memory_space<vmem>>, %arg10: memref<1x32xf32, #tpu.memory_space<vmem>>, %arg11: memref<1x16x32xf32, #tpu.memory_space<vmem>>) attributes {dimension_semantics = [#tpu.dimension_semantics<parallel>], iteration_bounds = array<i64: 2>, scalar_prefetch = 0 : i64, scratch_operands = 0 : i64, tpu.core_type = #tpu.core_type<tc>, window_params = [{transform_indices = @transform_0, window_bounds = array<i64: 1, 16, 32>}, {transform_indices = @transform_1, window_bounds = array<i64: 1, 16, 32>}, {pipeline_mode = #tpu.pipeline_mode<synchronous>, transform_indices = @transform_2, window_bounds = array<i64: 32, 32>}, {pipeline_mode = #tpu.pipeline_mode<synchronous>, transform_indices = @transform_3, window_bounds = array<i64: 1, 32>}, {pipeline_mode = #tpu.pipeline_mode<synchronous>, transform_indices = @transform_4, window_bounds = array<i64: 32, 64>}, {pipeline_mode = #tpu.pipeline_mode<synchronous>, transform_indices = @transform_5, window_bounds = array<i64: 1, 64>}, {pipeline_mode = #tpu.pipeline_mode<synchronous>, transform_indices = @transform_6, window_bounds = array<i64: 32, 32>}, {pipeline_mode = #tpu.pipeline_mode<synchronous>, transform_indices = @transform_7, window_bounds = array<i64: 1, 32>}, {pipeline_mode = #tpu.pipeline_mode<synchronous>, transform_indices = @transform_8, window_bounds = array<i64: 1, 32>}, {pipeline_mode = #tpu.pipeline_mode<synchronous>, transform_indices = @transform_9, window_bounds = array<i64: 1, 32>}, {transform_indices = @transform_10, window_bounds = array<i64: 1, 16, 32>}]} {
    %c0 = arith.constant 0 : index
    %c0_0 = arith.constant 0 : index
    %c0_1 = arith.constant 0 : index
    %0 = vector.load %arg1[%c0, %c0_0, %c0_1] : memref<1x16x32xf32, #tpu.memory_space<vmem>>, vector<1x16x32xf32>
    %1 = vector.shape_cast %0 : vector<1x16x32xf32> to vector<16x32xf32>
    %c0_2 = arith.constant 0 : index
    %c0_3 = arith.constant 0 : index
    %c0_4 = arith.constant 0 : index
    %2 = vector.load %arg2[%c0_2, %c0_3, %c0_4] : memref<1x16x32xf32, #tpu.memory_space<vmem>>, vector<1x16x32xf32>
    %3 = vector.shape_cast %2 : vector<1x16x32xf32> to vector<16x32xf32>
    %c0_5 = arith.constant 0 : index
    %c0_6 = arith.constant 0 : index
    %4 = vector.load %arg3[%c0_5, %c0_6] : memref<32x32xf32, #tpu.memory_space<vmem>>, vector<32x32xf32>
    %c0_7 = arith.constant 0 : index
    %c0_8 = arith.constant 0 : index
    %5 = vector.load %arg5[%c0_7, %c0_8] : memref<32x64xf32, #tpu.memory_space<vmem>>, vector<32x64xf32>
    %c0_9 = arith.constant 0 : index
    %c0_10 = arith.constant 0 : index
    %6 = vector.load %arg7[%c0_9, %c0_10] : memref<32x32xf32, #tpu.memory_space<vmem>>, vector<32x32xf32>
    %cst = arith.constant dense<0.000000e+00> : vector<16x32xf32>
    %7 = tpu.matmul %1, %4, %cst {dimension_numbers = #tpu.dot_dimension_numbers<[1], [0], [0], [1], [0, 0, 1, 1], [], []>} : vector<16x32xf32>, vector<32x32xf32>, vector<16x32xf32> -> vector<16x32xf32>
    %c0_11 = arith.constant 0 : index
    %c0_12 = arith.constant 0 : index
    %8 = vector.load %arg4[%c0_11, %c0_12] : memref<1x32xf32, #tpu.memory_space<vmem>>, vector<1x32xf32>
    %9 = vector.broadcast %8 : vector<1x32xf32> to vector<16x32xf32>
    %10 = arith.addf %7, %9 : vector<16x32xf32>
    %cst_13 = arith.constant dense<0.000000e+00> : vector<16x64xf32>
    %11 = tpu.matmul %3, %5, %cst_13 {dimension_numbers = #tpu.dot_dimension_numbers<[1], [0], [0], [1], [0, 0, 1, 1], [], []>} : vector<16x32xf32>, vector<32x64xf32>, vector<16x64xf32> -> vector<16x64xf32>
    %c0_14 = arith.constant 0 : index
    %c0_15 = arith.constant 0 : index
    %12 = vector.load %arg6[%c0_14, %c0_15] : memref<1x64xf32, #tpu.memory_space<vmem>>, vector<1x64xf32>
    %13 = vector.broadcast %12 : vector<1x64xf32> to vector<16x64xf32>
    %14 = arith.addf %11, %13 : vector<16x64xf32>
    %cst_16 = arith.constant 0.000000e+00 : f32
    %15 = vector.broadcast %cst_16 : f32 to vector<16x32xf32>
    %16 = vector.extract_strided_slice %10 {offsets = [0, 0], sizes = [16, 8], strides = [1, 1]} : vector<16x32xf32> to vector<16x8xf32>
    %17 = vector.extract_strided_slice %14 {offsets = [0, 0], sizes = [16, 8], strides = [1, 1]} : vector<16x64xf32> to vector<16x8xf32>
    %18 = vector.extract_strided_slice %14 {offsets = [0, 32], sizes = [16, 8], strides = [1, 1]} : vector<16x64xf32> to vector<16x8xf32>
    %cst_17 = arith.constant dense<0.000000e+00> : vector<16x16xf32>
    %19 = tpu.matmul %16, %17, %cst_17 {dimension_numbers = #tpu.dot_dimension_numbers<[1], [1], [0], [0], [0, 0, 1, 0], [], []>} : vector<16x8xf32>, vector<16x8xf32>, vector<16x16xf32> -> vector<16x16xf32>
    %cst_18 = arith.constant 0.353553385 : f32
    %20 = vector.broadcast %cst_18 : f32 to vector<16x16xf32>
    %21 = arith.mulf %19, %20 : vector<16x16xf32>
    %cst_19 = arith.constant dense<0xFF800000> : vector<16xf32>
    %22 = vector.multi_reduction <maximumf>, %21, %cst_19 [1] : vector<16x16xf32> to vector<16xf32>
    %23 = vector.shape_cast %22 : vector<16xf32> to vector<16x1xf32>
    %24 = vector.broadcast %23 : vector<16x1xf32> to vector<16x16xf32>
    %25 = arith.subf %21, %24 : vector<16x16xf32>
    %26 = math.exp %25 : vector<16x16xf32>
    %cst_20 = arith.constant dense<0.000000e+00> : vector<16xf32>
    %27 = vector.multi_reduction <add>, %26, %cst_20 [1] : vector<16x16xf32> to vector<16xf32>
    %28 = vector.shape_cast %27 : vector<16xf32> to vector<16x1xf32>
    %29 = tpu.reciprocal %28 {approx = true} : vector<16x1xf32> -> vector<16x1xf32>
    %30 = vector.broadcast %29 : vector<16x1xf32> to vector<16x16xf32>
    %31 = arith.mulf %26, %30 : vector<16x16xf32>
    %cst_21 = arith.constant dense<0.000000e+00> : vector<16x8xf32>
    %32 = tpu.matmul %31, %18, %cst_21 {dimension_numbers = #tpu.dot_dimension_numbers<[1], [0], [0], [1], [0, 0, 1, 1], [], []>} : vector<16x16xf32>, vector<16x8xf32>, vector<16x8xf32> -> vector<16x8xf32>
    %33 = vector.extract_strided_slice %6 {offsets = [0, 0], sizes = [8, 32], strides = [1, 1]} : vector<32x32xf32> to vector<8x32xf32>
    %cst_22 = arith.constant dense<0.000000e+00> : vector<16x32xf32>
    %34 = tpu.matmul %32, %33, %cst_22 {dimension_numbers = #tpu.dot_dimension_numbers<[1], [0], [0], [1], [0, 0, 1, 1], [], []>} : vector<16x8xf32>, vector<8x32xf32>, vector<16x32xf32> -> vector<16x32xf32>
    %35 = arith.addf %15, %34 : vector<16x32xf32>
    %36 = vector.extract_strided_slice %10 {offsets = [0, 8], sizes = [16, 8], strides = [1, 1]} : vector<16x32xf32> to vector<16x8xf32>
    %37 = vector.extract_strided_slice %14 {offsets = [0, 8], sizes = [16, 8], strides = [1, 1]} : vector<16x64xf32> to vector<16x8xf32>
    %38 = vector.extract_strided_slice %14 {offsets = [0, 40], sizes = [16, 8], strides = [1, 1]} : vector<16x64xf32> to vector<16x8xf32>
    %cst_23 = arith.constant dense<0.000000e+00> : vector<16x16xf32>
    %39 = tpu.matmul %36, %37, %cst_23 {dimension_numbers = #tpu.dot_dimension_numbers<[1], [1], [0], [0], [0, 0, 1, 0], [], []>} : vector<16x8xf32>, vector<16x8xf32>, vector<16x16xf32> -> vector<16x16xf32>
    %cst_24 = arith.constant 0.353553385 : f32
    %40 = vector.broadcast %cst_24 : f32 to vector<16x16xf32>
    %41 = arith.mulf %39, %40 : vector<16x16xf32>
    %cst_25 = arith.constant dense<0xFF800000> : vector<16xf32>
    %42 = vector.multi_reduction <maximumf>, %41, %cst_25 [1] : vector<16x16xf32> to vector<16xf32>
    %43 = vector.shape_cast %42 : vector<16xf32> to vector<16x1xf32>
    %44 = vector.broadcast %43 : vector<16x1xf32> to vector<16x16xf32>
    %45 = arith.subf %41, %44 : vector<16x16xf32>
    %46 = math.exp %45 : vector<16x16xf32>
    %cst_26 = arith.constant dense<0.000000e+00> : vector<16xf32>
    %47 = vector.multi_reduction <add>, %46, %cst_26 [1] : vector<16x16xf32> to vector<16xf32>
    %48 = vector.shape_cast %47 : vector<16xf32> to vector<16x1xf32>
    %49 = tpu.reciprocal %48 {approx = true} : vector<16x1xf32> -> vector<16x1xf32>
    %50 = vector.broadcast %49 : vector<16x1xf32> to vector<16x16xf32>
    %51 = arith.mulf %46, %50 : vector<16x16xf32>
    %cst_27 = arith.constant dense<0.000000e+00> : vector<16x8xf32>
    %52 = tpu.matmul %51, %38, %cst_27 {dimension_numbers = #tpu.dot_dimension_numbers<[1], [0], [0], [1], [0, 0, 1, 1], [], []>} : vector<16x16xf32>, vector<16x8xf32>, vector<16x8xf32> -> vector<16x8xf32>
    %53 = vector.extract_strided_slice %6 {offsets = [8, 0], sizes = [8, 32], strides = [1, 1]} : vector<32x32xf32> to vector<8x32xf32>
    %cst_28 = arith.constant dense<0.000000e+00> : vector<16x32xf32>
    %54 = tpu.matmul %52, %53, %cst_28 {dimension_numbers = #tpu.dot_dimension_numbers<[1], [0], [0], [1], [0, 0, 1, 1], [], []>} : vector<16x8xf32>, vector<8x32xf32>, vector<16x32xf32> -> vector<16x32xf32>
    %55 = arith.addf %35, %54 : vector<16x32xf32>
    %56 = vector.extract_strided_slice %10 {offsets = [0, 16], sizes = [16, 8], strides = [1, 1]} : vector<16x32xf32> to vector<16x8xf32>
    %57 = vector.extract_strided_slice %14 {offsets = [0, 16], sizes = [16, 8], strides = [1, 1]} : vector<16x64xf32> to vector<16x8xf32>
    %58 = vector.extract_strided_slice %14 {offsets = [0, 48], sizes = [16, 8], strides = [1, 1]} : vector<16x64xf32> to vector<16x8xf32>
    %cst_29 = arith.constant dense<0.000000e+00> : vector<16x16xf32>
    %59 = tpu.matmul %56, %57, %cst_29 {dimension_numbers = #tpu.dot_dimension_numbers<[1], [1], [0], [0], [0, 0, 1, 0], [], []>} : vector<16x8xf32>, vector<16x8xf32>, vector<16x16xf32> -> vector<16x16xf32>
    %cst_30 = arith.constant 0.353553385 : f32
    %60 = vector.broadcast %cst_30 : f32 to vector<16x16xf32>
    %61 = arith.mulf %59, %60 : vector<16x16xf32>
    %cst_31 = arith.constant dense<0xFF800000> : vector<16xf32>
    %62 = vector.multi_reduction <maximumf>, %61, %cst_31 [1] : vector<16x16xf32> to vector<16xf32>
    %63 = vector.shape_cast %62 : vector<16xf32> to vector<16x1xf32>
    %64 = vector.broadcast %63 : vector<16x1xf32> to vector<16x16xf32>
    %65 = arith.subf %61, %64 : vector<16x16xf32>
    %66 = math.exp %65 : vector<16x16xf32>
    %cst_32 = arith.constant dense<0.000000e+00> : vector<16xf32>
    %67 = vector.multi_reduction <add>, %66, %cst_32 [1] : vector<16x16xf32> to vector<16xf32>
    %68 = vector.shape_cast %67 : vector<16xf32> to vector<16x1xf32>
    %69 = tpu.reciprocal %68 {approx = true} : vector<16x1xf32> -> vector<16x1xf32>
    %70 = vector.broadcast %69 : vector<16x1xf32> to vector<16x16xf32>
    %71 = arith.mulf %66, %70 : vector<16x16xf32>
    %cst_33 = arith.constant dense<0.000000e+00> : vector<16x8xf32>
    %72 = tpu.matmul %71, %58, %cst_33 {dimension_numbers = #tpu.dot_dimension_numbers<[1], [0], [0], [1], [0, 0, 1, 1], [], []>} : vector<16x16xf32>, vector<16x8xf32>, vector<16x8xf32> -> vector<16x8xf32>
    %73 = vector.extract_strided_slice %6 {offsets = [16, 0], sizes = [8, 32], strides = [1, 1]} : vector<32x32xf32> to vector<8x32xf32>
    %cst_34 = arith.constant dense<0.000000e+00> : vector<16x32xf32>
    %74 = tpu.matmul %72, %73, %cst_34 {dimension_numbers = #tpu.dot_dimension_numbers<[1], [0], [0], [1], [0, 0, 1, 1], [], []>} : vector<16x8xf32>, vector<8x32xf32>, vector<16x32xf32> -> vector<16x32xf32>
    %75 = arith.addf %55, %74 : vector<16x32xf32>
    %76 = vector.extract_strided_slice %10 {offsets = [0, 24], sizes = [16, 8], strides = [1, 1]} : vector<16x32xf32> to vector<16x8xf32>
    %77 = vector.extract_strided_slice %14 {offsets = [0, 24], sizes = [16, 8], strides = [1, 1]} : vector<16x64xf32> to vector<16x8xf32>
    %78 = vector.extract_strided_slice %14 {offsets = [0, 56], sizes = [16, 8], strides = [1, 1]} : vector<16x64xf32> to vector<16x8xf32>
    %cst_35 = arith.constant dense<0.000000e+00> : vector<16x16xf32>
    %79 = tpu.matmul %76, %77, %cst_35 {dimension_numbers = #tpu.dot_dimension_numbers<[1], [1], [0], [0], [0, 0, 1, 0], [], []>} : vector<16x8xf32>, vector<16x8xf32>, vector<16x16xf32> -> vector<16x16xf32>
    %cst_36 = arith.constant 0.353553385 : f32
    %80 = vector.broadcast %cst_36 : f32 to vector<16x16xf32>
    %81 = arith.mulf %79, %80 : vector<16x16xf32>
    %cst_37 = arith.constant dense<0xFF800000> : vector<16xf32>
    %82 = vector.multi_reduction <maximumf>, %81, %cst_37 [1] : vector<16x16xf32> to vector<16xf32>
    %83 = vector.shape_cast %82 : vector<16xf32> to vector<16x1xf32>
    %84 = vector.broadcast %83 : vector<16x1xf32> to vector<16x16xf32>
    %85 = arith.subf %81, %84 : vector<16x16xf32>
    %86 = math.exp %85 : vector<16x16xf32>
    %cst_38 = arith.constant dense<0.000000e+00> : vector<16xf32>
    %87 = vector.multi_reduction <add>, %86, %cst_38 [1] : vector<16x16xf32> to vector<16xf32>
    %88 = vector.shape_cast %87 : vector<16xf32> to vector<16x1xf32>
    %89 = tpu.reciprocal %88 {approx = true} : vector<16x1xf32> -> vector<16x1xf32>
    %90 = vector.broadcast %89 : vector<16x1xf32> to vector<16x16xf32>
    %91 = arith.mulf %86, %90 : vector<16x16xf32>
    %cst_39 = arith.constant dense<0.000000e+00> : vector<16x8xf32>
    %92 = tpu.matmul %91, %78, %cst_39 {dimension_numbers = #tpu.dot_dimension_numbers<[1], [0], [0], [1], [0, 0, 1, 1], [], []>} : vector<16x16xf32>, vector<16x8xf32>, vector<16x8xf32> -> vector<16x8xf32>
    %93 = vector.extract_strided_slice %6 {offsets = [24, 0], sizes = [8, 32], strides = [1, 1]} : vector<32x32xf32> to vector<8x32xf32>
    %cst_40 = arith.constant dense<0.000000e+00> : vector<16x32xf32>
    %94 = tpu.matmul %92, %93, %cst_40 {dimension_numbers = #tpu.dot_dimension_numbers<[1], [0], [0], [1], [0, 0, 1, 1], [], []>} : vector<16x8xf32>, vector<8x32xf32>, vector<16x32xf32> -> vector<16x32xf32>
    %95 = arith.addf %75, %94 : vector<16x32xf32>
    %c0_41 = arith.constant 0 : index
    %c0_42 = arith.constant 0 : index
    %96 = vector.load %arg8[%c0_41, %c0_42] : memref<1x32xf32, #tpu.memory_space<vmem>>, vector<1x32xf32>
    %97 = vector.broadcast %96 : vector<1x32xf32> to vector<16x32xf32>
    %98 = arith.addf %95, %97 : vector<16x32xf32>
    %99 = arith.addf %1, %98 : vector<16x32xf32>
    %c0_43 = arith.constant 0 : index
    %c0_44 = arith.constant 0 : index
    %100 = vector.load %arg9[%c0_43, %c0_44] : memref<1x32xf32, #tpu.memory_space<vmem>>, vector<1x32xf32>
    %c0_45 = arith.constant 0 : index
    %c0_46 = arith.constant 0 : index
    %101 = vector.load %arg10[%c0_45, %c0_46] : memref<1x32xf32, #tpu.memory_space<vmem>>, vector<1x32xf32>
    %cst_47 = arith.constant dense<0.000000e+00> : vector<16xf32>
    %102 = vector.multi_reduction <add>, %99, %cst_47 [1] : vector<16x32xf32> to vector<16xf32>
    %103 = vector.shape_cast %102 : vector<16xf32> to vector<16x1xf32>
    %cst_48 = arith.constant 3.200000e+01 : f32
    %104 = vector.broadcast %cst_48 : f32 to vector<16x1xf32>
    %105 = arith.divf %103, %104 : vector<16x1xf32>
    %106 = vector.broadcast %105 : vector<16x1xf32> to vector<16x32xf32>
    %107 = arith.subf %99, %106 : vector<16x32xf32>
    %108 = arith.mulf %107, %107 : vector<16x32xf32>
    %cst_49 = arith.constant dense<0.000000e+00> : vector<16xf32>
    %109 = vector.multi_reduction <add>, %108, %cst_49 [1] : vector<16x32xf32> to vector<16xf32>
    %110 = vector.shape_cast %109 : vector<16xf32> to vector<16x1xf32>
    %cst_50 = arith.constant 3.200000e+01 : f32
    %111 = vector.broadcast %cst_50 : f32 to vector<16x1xf32>
    %112 = arith.divf %110, %111 : vector<16x1xf32>
    %113 = vector.broadcast %105 : vector<16x1xf32> to vector<16x32xf32>
    %114 = arith.subf %99, %113 : vector<16x32xf32>
    %cst_51 = arith.constant 9.99999974E-6 : f32
    %115 = vector.broadcast %cst_51 : f32 to vector<16x1xf32>
    %116 = arith.addf %112, %115 : vector<16x1xf32>
    %117 = math.rsqrt %116 : vector<16x1xf32>
    %118 = vector.broadcast %117 : vector<16x1xf32> to vector<16x32xf32>
    %119 = arith.mulf %114, %118 : vector<16x32xf32>
    %120 = vector.broadcast %100 : vector<1x32xf32> to vector<16x32xf32>
    %121 = arith.mulf %119, %120 : vector<16x32xf32>
    %122 = vector.broadcast %101 : vector<1x32xf32> to vector<16x32xf32>
    %123 = arith.addf %121, %122 : vector<16x32xf32>
    %c0_52 = arith.constant 0 : index
    %c0_53 = arith.constant 0 : index
    %c0_54 = arith.constant 0 : index
    %124 = vector.load %arg11[%c0_52, %c0_53, %c0_54] : memref<1x16x32xf32, #tpu.memory_space<vmem>>, vector<1x16x32xf32>
    %125 = vector.shape_cast %124 : vector<1x16x32xf32> to vector<16x32xf32>
    %126 = vector.shape_cast %123 : vector<16x32xf32> to vector<1x16x32xf32>
    tpu.vector_store %arg11[%c0_52, %c0_53, %c0_54], %126 {strides = array<i32>} : memref<1x16x32xf32, #tpu.memory_space<vmem>>, vector<1x16x32xf32>,
    return
  }
  func.func @transform_0(%arg0: i32) -> (i32, i32, i32) {
    %c0_i32 = arith.constant 0 : i32
    %c0_i32_0 = arith.constant 0 : i32
    %c0_i32_1 = arith.constant 0 : i32
    return %arg0, %c0_i32, %c0_i32_0 : i32, i32, i32
  }
  func.func @transform_1(%arg0: i32) -> (i32, i32, i32) {
    %c0_i32 = arith.constant 0 : i32
    %c0_i32_0 = arith.constant 0 : i32
    %c0_i32_1 = arith.constant 0 : i32
    return %arg0, %c0_i32, %c0_i32_0 : i32, i32, i32
  }
  func.func @transform_2(%arg0: i32) -> (i32, i32) {
    %c0_i32 = arith.constant 0 : i32
    %c0_i32_0 = arith.constant 0 : i32
    %c0_i32_1 = arith.constant 0 : i32
    return %c0_i32, %c0_i32_0 : i32, i32
  }
  func.func @transform_3(%arg0: i32) -> (i32, i32) {
    %c0_i32 = arith.constant 0 : i32
    %c0_i32_0 = arith.constant 0 : i32
    %c0_i32_1 = arith.constant 0 : i32
    return %c0_i32, %c0_i32_0 : i32, i32
  }
  func.func @transform_4(%arg0: i32) -> (i32, i32) {
    %c0_i32 = arith.constant 0 : i32
    %c0_i32_0 = arith.constant 0 : i32
    %c0_i32_1 = arith.constant 0 : i32
    return %c0_i32, %c0_i32_0 : i32, i32
  }
  func.func @transform_5(%arg0: i32) -> (i32, i32) {
    %c0_i32 = arith.constant 0 : i32
    %c0_i32_0 = arith.constant 0 : i32
    %c0_i32_1 = arith.constant 0 : i32
    return %c0_i32, %c0_i32_0 : i32, i32
  }
  func.func @transform_6(%arg0: i32) -> (i32, i32) {
    %c0_i32 = arith.constant 0 : i32
    %c0_i32_0 = arith.constant 0 : i32
    %c0_i32_1 = arith.constant 0 : i32
    return %c0_i32, %c0_i32_0 : i32, i32
  }
  func.func @transform_7(%arg0: i32) -> (i32, i32) {
    %c0_i32 = arith.constant 0 : i32
    %c0_i32_0 = arith.constant 0 : i32
    %c0_i32_1 = arith.constant 0 : i32
    return %c0_i32, %c0_i32_0 : i32, i32
  }
  func.func @transform_8(%arg0: i32) -> (i32, i32) {
    %c0_i32 = arith.constant 0 : i32
    %c0_i32_0 = arith.constant 0 : i32
    %c0_i32_1 = arith.constant 0 : i32
    return %c0_i32, %c0_i32_0 : i32, i32
  }
  func.func @transform_9(%arg0: i32) -> (i32, i32) {
    %c0_i32 = arith.constant 0 : i32
    %c0_i32_0 = arith.constant 0 : i32
    %c0_i32_1 = arith.constant 0 : i32
    return %c0_i32, %c0_i32_0 : i32, i32
  }
  func.func @transform_10(%arg0: i32) -> (i32, i32, i32) {
    %c0_i32 = arith.constant 0 : i32
    %c0_i32_0 = arith.constant 0 : i32
    %c0_i32_1 = arith.constant 0 : i32
    return %arg0, %c0_i32, %c0_i32_0 : i32, i32, i32
  }
}

module attributes {stable_mosaic.version = 11 : i64} {
  func.func @_ffn_block_kernel(%arg0: memref<32x32xf32, #tpu.memory_space<vmem>>, %arg1: memref<32x64xf32, #tpu.memory_space<vmem>>, %arg2: memref<1x64xf32, #tpu.memory_space<vmem>>, %arg3: memref<64x32xf32, #tpu.memory_space<vmem>>, %arg4: memref<1x32xf32, #tpu.memory_space<vmem>>, %arg5: memref<1x32xf32, #tpu.memory_space<vmem>>, %arg6: memref<1x32xf32, #tpu.memory_space<vmem>>, %arg7: memref<32x32xf32, #tpu.memory_space<vmem>>) attributes {dimension_semantics = [], scalar_prefetch = 0 : i64, scratch_operands = 0 : i64, tpu.core_type = #tpu.core_type<tc>} {
    %c0 = arith.constant 0 : index
    %c0_0 = arith.constant 0 : index
    %0 = vector.load %arg0[%c0, %c0_0] : memref<32x32xf32, #tpu.memory_space<vmem>>, vector<32x32xf32>
    %c0_1 = arith.constant 0 : index
    %c0_2 = arith.constant 0 : index
    %1 = vector.load %arg1[%c0_1, %c0_2] : memref<32x64xf32, #tpu.memory_space<vmem>>, vector<32x64xf32>
    %cst = arith.constant dense<0.000000e+00> : vector<32x64xf32>
    %2 = tpu.matmul %0, %1, %cst {dimension_numbers = #tpu.dot_dimension_numbers<[1], [0], [0], [1], [0, 0, 1, 1], [], []>} : vector<32x32xf32>, vector<32x64xf32>, vector<32x64xf32> -> vector<32x64xf32>
    %c0_3 = arith.constant 0 : index
    %c0_4 = arith.constant 0 : index
    %3 = vector.load %arg2[%c0_3, %c0_4] : memref<1x64xf32, #tpu.memory_space<vmem>>, vector<1x64xf32>
    %4 = vector.broadcast %3 : vector<1x64xf32> to vector<32x64xf32>
    %5 = arith.addf %2, %4 : vector<32x64xf32>
    %cst_5 = arith.constant 0.000000e+00 : f32
    %6 = vector.broadcast %cst_5 : f32 to vector<32x64xf32>
    %7 = arith.maximumf %5, %6 : vector<32x64xf32>
    %c0_6 = arith.constant 0 : index
    %c0_7 = arith.constant 0 : index
    %8 = vector.load %arg3[%c0_6, %c0_7] : memref<64x32xf32, #tpu.memory_space<vmem>>, vector<64x32xf32>
    %cst_8 = arith.constant dense<0.000000e+00> : vector<32x32xf32>
    %9 = tpu.matmul %7, %8, %cst_8 {dimension_numbers = #tpu.dot_dimension_numbers<[1], [0], [0], [1], [0, 0, 1, 1], [], []>} : vector<32x64xf32>, vector<64x32xf32>, vector<32x32xf32> -> vector<32x32xf32>
    %c0_9 = arith.constant 0 : index
    %c0_10 = arith.constant 0 : index
    %10 = vector.load %arg4[%c0_9, %c0_10] : memref<1x32xf32, #tpu.memory_space<vmem>>, vector<1x32xf32>
    %11 = vector.broadcast %10 : vector<1x32xf32> to vector<32x32xf32>
    %12 = arith.addf %9, %11 : vector<32x32xf32>
    %13 = arith.addf %0, %12 : vector<32x32xf32>
    %c0_11 = arith.constant 0 : index
    %c0_12 = arith.constant 0 : index
    %14 = vector.load %arg5[%c0_11, %c0_12] : memref<1x32xf32, #tpu.memory_space<vmem>>, vector<1x32xf32>
    %c0_13 = arith.constant 0 : index
    %c0_14 = arith.constant 0 : index
    %15 = vector.load %arg6[%c0_13, %c0_14] : memref<1x32xf32, #tpu.memory_space<vmem>>, vector<1x32xf32>
    %cst_15 = arith.constant dense<0.000000e+00> : vector<32xf32>
    %16 = vector.multi_reduction <add>, %13, %cst_15 [1] : vector<32x32xf32> to vector<32xf32>
    %17 = vector.shape_cast %16 : vector<32xf32> to vector<32x1xf32>
    %cst_16 = arith.constant 3.200000e+01 : f32
    %18 = vector.broadcast %cst_16 : f32 to vector<32x1xf32>
    %19 = arith.divf %17, %18 : vector<32x1xf32>
    %20 = vector.broadcast %19 : vector<32x1xf32> to vector<32x32xf32>
    %21 = arith.subf %13, %20 : vector<32x32xf32>
    %22 = arith.mulf %21, %21 : vector<32x32xf32>
    %cst_17 = arith.constant dense<0.000000e+00> : vector<32xf32>
    %23 = vector.multi_reduction <add>, %22, %cst_17 [1] : vector<32x32xf32> to vector<32xf32>
    %24 = vector.shape_cast %23 : vector<32xf32> to vector<32x1xf32>
    %cst_18 = arith.constant 3.200000e+01 : f32
    %25 = vector.broadcast %cst_18 : f32 to vector<32x1xf32>
    %26 = arith.divf %24, %25 : vector<32x1xf32>
    %27 = vector.broadcast %19 : vector<32x1xf32> to vector<32x32xf32>
    %28 = arith.subf %13, %27 : vector<32x32xf32>
    %cst_19 = arith.constant 9.99999974E-6 : f32
    %29 = vector.broadcast %cst_19 : f32 to vector<32x1xf32>
    %30 = arith.addf %26, %29 : vector<32x1xf32>
    %31 = math.rsqrt %30 : vector<32x1xf32>
    %32 = vector.broadcast %31 : vector<32x1xf32> to vector<32x32xf32>
    %33 = arith.mulf %28, %32 : vector<32x32xf32>
    %34 = vector.broadcast %14 : vector<1x32xf32> to vector<32x32xf32>
    %35 = arith.mulf %33, %34 : vector<32x32xf32>
    %36 = vector.broadcast %15 : vector<1x32xf32> to vector<32x32xf32>
    %37 = arith.addf %35, %36 : vector<32x32xf32>
    %c0_20 = arith.constant 0 : index
    %c0_21 = arith.constant 0 : index
    %38 = vector.load %arg7[%c0_20, %c0_21] : memref<32x32xf32, #tpu.memory_space<vmem>>, vector<32x32xf32>
    tpu.vector_store %arg7[%c0_20, %c0_21], %37 {strides = array<i32>} : memref<32x32xf32, #tpu.memory_space<vmem>>, vector<32x32xf32>,
    return
  }
}

module attributes {stable_mosaic.version = 11 : i64} {
  func.func @_proj_kernel(%arg0: memref<16x4xf32, #tpu.memory_space<vmem>>, %arg1: memref<4x32xf32, #tpu.memory_space<vmem>>, %arg2: memref<1x32xf32, #tpu.memory_space<vmem>>, %arg3: memref<16x32xf32, #tpu.memory_space<vmem>>) attributes {dimension_semantics = [], scalar_prefetch = 0 : i64, scratch_operands = 0 : i64, tpu.core_type = #tpu.core_type<tc>} {
    %c0 = arith.constant 0 : index
    %c0_0 = arith.constant 0 : index
    %0 = vector.load %arg0[%c0, %c0_0] : memref<16x4xf32, #tpu.memory_space<vmem>>, vector<16x4xf32>
    %c0_1 = arith.constant 0 : index
    %c0_2 = arith.constant 0 : index
    %1 = vector.load %arg1[%c0_1, %c0_2] : memref<4x32xf32, #tpu.memory_space<vmem>>, vector<4x32xf32>
    %cst = arith.constant dense<0.000000e+00> : vector<16x32xf32>
    %2 = tpu.matmul %0, %1, %cst {dimension_numbers = #tpu.dot_dimension_numbers<[1], [0], [0], [1], [0, 0, 1, 1], [], []>} : vector<16x4xf32>, vector<4x32xf32>, vector<16x32xf32> -> vector<16x32xf32>
    %c0_3 = arith.constant 0 : index
    %c0_4 = arith.constant 0 : index
    %3 = vector.load %arg2[%c0_3, %c0_4] : memref<1x32xf32, #tpu.memory_space<vmem>>, vector<1x32xf32>
    %4 = vector.broadcast %3 : vector<1x32xf32> to vector<16x32xf32>
    %5 = arith.addf %2, %4 : vector<16x32xf32>
    %c0_5 = arith.constant 0 : index
    %c0_6 = arith.constant 0 : index
    %6 = vector.load %arg3[%c0_5, %c0_6] : memref<16x32xf32, #tpu.memory_space<vmem>>, vector<16x32xf32>
    tpu.vector_store %arg3[%c0_5, %c0_6], %5 {strides = array<i32>} : memref<16x32xf32, #tpu.memory_space<vmem>>, vector<16x32xf32>,
    return
  }
}

module attributes {stable_mosaic.version = 11 : i64} {
  func.func @_mha_block_kernel(%arg0: i32, %arg1: memref<1x8x32xf32, #tpu.memory_space<vmem>>, %arg2: memref<1x8x32xf32, #tpu.memory_space<vmem>>, %arg3: memref<32x32xf32, #tpu.memory_space<vmem>>, %arg4: memref<1x32xf32, #tpu.memory_space<vmem>>, %arg5: memref<32x64xf32, #tpu.memory_space<vmem>>, %arg6: memref<1x64xf32, #tpu.memory_space<vmem>>, %arg7: memref<32x32xf32, #tpu.memory_space<vmem>>, %arg8: memref<1x32xf32, #tpu.memory_space<vmem>>, %arg9: memref<1x32xf32, #tpu.memory_space<vmem>>, %arg10: memref<1x32xf32, #tpu.memory_space<vmem>>, %arg11: memref<8x8xf32, #tpu.memory_space<vmem>>, %arg12: memref<1x8x32xf32, #tpu.memory_space<vmem>>) attributes {dimension_semantics = [#tpu.dimension_semantics<parallel>], iteration_bounds = array<i64: 2>, scalar_prefetch = 0 : i64, scratch_operands = 0 : i64, tpu.core_type = #tpu.core_type<tc>, window_params = [{transform_indices = @transform_0, window_bounds = array<i64: 1, 8, 32>}, {transform_indices = @transform_1, window_bounds = array<i64: 1, 8, 32>}, {pipeline_mode = #tpu.pipeline_mode<synchronous>, transform_indices = @transform_2, window_bounds = array<i64: 32, 32>}, {pipeline_mode = #tpu.pipeline_mode<synchronous>, transform_indices = @transform_3, window_bounds = array<i64: 1, 32>}, {pipeline_mode = #tpu.pipeline_mode<synchronous>, transform_indices = @transform_4, window_bounds = array<i64: 32, 64>}, {pipeline_mode = #tpu.pipeline_mode<synchronous>, transform_indices = @transform_5, window_bounds = array<i64: 1, 64>}, {pipeline_mode = #tpu.pipeline_mode<synchronous>, transform_indices = @transform_6, window_bounds = array<i64: 32, 32>}, {pipeline_mode = #tpu.pipeline_mode<synchronous>, transform_indices = @transform_7, window_bounds = array<i64: 1, 32>}, {pipeline_mode = #tpu.pipeline_mode<synchronous>, transform_indices = @transform_8, window_bounds = array<i64: 1, 32>}, {pipeline_mode = #tpu.pipeline_mode<synchronous>, transform_indices = @transform_9, window_bounds = array<i64: 1, 32>}, {pipeline_mode = #tpu.pipeline_mode<synchronous>, transform_indices = @transform_10, window_bounds = array<i64: 8, 8>}, {transform_indices = @transform_11, window_bounds = array<i64: 1, 8, 32>}]} {
    %c0 = arith.constant 0 : index
    %c0_0 = arith.constant 0 : index
    %c0_1 = arith.constant 0 : index
    %0 = vector.load %arg1[%c0, %c0_0, %c0_1] : memref<1x8x32xf32, #tpu.memory_space<vmem>>, vector<1x8x32xf32>
    %1 = vector.shape_cast %0 : vector<1x8x32xf32> to vector<8x32xf32>
    %c0_2 = arith.constant 0 : index
    %c0_3 = arith.constant 0 : index
    %c0_4 = arith.constant 0 : index
    %2 = vector.load %arg2[%c0_2, %c0_3, %c0_4] : memref<1x8x32xf32, #tpu.memory_space<vmem>>, vector<1x8x32xf32>
    %3 = vector.shape_cast %2 : vector<1x8x32xf32> to vector<8x32xf32>
    %c0_5 = arith.constant 0 : index
    %c0_6 = arith.constant 0 : index
    %4 = vector.load %arg3[%c0_5, %c0_6] : memref<32x32xf32, #tpu.memory_space<vmem>>, vector<32x32xf32>
    %c0_7 = arith.constant 0 : index
    %c0_8 = arith.constant 0 : index
    %5 = vector.load %arg5[%c0_7, %c0_8] : memref<32x64xf32, #tpu.memory_space<vmem>>, vector<32x64xf32>
    %c0_9 = arith.constant 0 : index
    %c0_10 = arith.constant 0 : index
    %6 = vector.load %arg7[%c0_9, %c0_10] : memref<32x32xf32, #tpu.memory_space<vmem>>, vector<32x32xf32>
    %cst = arith.constant dense<0.000000e+00> : vector<8x32xf32>
    %7 = tpu.matmul %1, %4, %cst {dimension_numbers = #tpu.dot_dimension_numbers<[1], [0], [0], [1], [0, 0, 1, 1], [], []>} : vector<8x32xf32>, vector<32x32xf32>, vector<8x32xf32> -> vector<8x32xf32>
    %c0_11 = arith.constant 0 : index
    %c0_12 = arith.constant 0 : index
    %8 = vector.load %arg4[%c0_11, %c0_12] : memref<1x32xf32, #tpu.memory_space<vmem>>, vector<1x32xf32>
    %9 = vector.broadcast %8 : vector<1x32xf32> to vector<8x32xf32>
    %10 = arith.addf %7, %9 : vector<8x32xf32>
    %cst_13 = arith.constant dense<0.000000e+00> : vector<8x64xf32>
    %11 = tpu.matmul %3, %5, %cst_13 {dimension_numbers = #tpu.dot_dimension_numbers<[1], [0], [0], [1], [0, 0, 1, 1], [], []>} : vector<8x32xf32>, vector<32x64xf32>, vector<8x64xf32> -> vector<8x64xf32>
    %c0_14 = arith.constant 0 : index
    %c0_15 = arith.constant 0 : index
    %12 = vector.load %arg6[%c0_14, %c0_15] : memref<1x64xf32, #tpu.memory_space<vmem>>, vector<1x64xf32>
    %13 = vector.broadcast %12 : vector<1x64xf32> to vector<8x64xf32>
    %14 = arith.addf %11, %13 : vector<8x64xf32>
    %cst_16 = arith.constant 0.000000e+00 : f32
    %15 = vector.broadcast %cst_16 : f32 to vector<8x32xf32>
    %16 = vector.extract_strided_slice %10 {offsets = [0, 0], sizes = [8, 8], strides = [1, 1]} : vector<8x32xf32> to vector<8x8xf32>
    %17 = vector.extract_strided_slice %14 {offsets = [0, 0], sizes = [8, 8], strides = [1, 1]} : vector<8x64xf32> to vector<8x8xf32>
    %18 = vector.extract_strided_slice %14 {offsets = [0, 32], sizes = [8, 8], strides = [1, 1]} : vector<8x64xf32> to vector<8x8xf32>
    %cst_17 = arith.constant dense<0.000000e+00> : vector<8x8xf32>
    %19 = tpu.matmul %16, %17, %cst_17 {dimension_numbers = #tpu.dot_dimension_numbers<[1], [1], [0], [0], [0, 0, 1, 0], [], []>} : vector<8x8xf32>, vector<8x8xf32>, vector<8x8xf32> -> vector<8x8xf32>
    %cst_18 = arith.constant 0.353553385 : f32
    %20 = vector.broadcast %cst_18 : f32 to vector<8x8xf32>
    %21 = arith.mulf %19, %20 : vector<8x8xf32>
    %c0_19 = arith.constant 0 : index
    %c0_20 = arith.constant 0 : index
    %22 = vector.load %arg11[%c0_19, %c0_20] : memref<8x8xf32, #tpu.memory_space<vmem>>, vector<8x8xf32>
    %23 = arith.addf %21, %22 : vector<8x8xf32>
    %cst_21 = arith.constant dense<0xFF800000> : vector<8xf32>
    %24 = vector.multi_reduction <maximumf>, %23, %cst_21 [1] : vector<8x8xf32> to vector<8xf32>
    %25 = vector.shape_cast %24 : vector<8xf32> to vector<8x1xf32>
    %26 = vector.broadcast %25 : vector<8x1xf32> to vector<8x8xf32>
    %27 = arith.subf %23, %26 : vector<8x8xf32>
    %28 = math.exp %27 : vector<8x8xf32>
    %cst_22 = arith.constant dense<0.000000e+00> : vector<8xf32>
    %29 = vector.multi_reduction <add>, %28, %cst_22 [1] : vector<8x8xf32> to vector<8xf32>
    %30 = vector.shape_cast %29 : vector<8xf32> to vector<8x1xf32>
    %31 = tpu.reciprocal %30 {approx = true} : vector<8x1xf32> -> vector<8x1xf32>
    %32 = vector.broadcast %31 : vector<8x1xf32> to vector<8x8xf32>
    %33 = arith.mulf %28, %32 : vector<8x8xf32>
    %cst_23 = arith.constant dense<0.000000e+00> : vector<8x8xf32>
    %34 = tpu.matmul %33, %18, %cst_23 {dimension_numbers = #tpu.dot_dimension_numbers<[1], [0], [0], [1], [0, 0, 1, 1], [], []>} : vector<8x8xf32>, vector<8x8xf32>, vector<8x8xf32> -> vector<8x8xf32>
    %35 = vector.extract_strided_slice %6 {offsets = [0, 0], sizes = [8, 32], strides = [1, 1]} : vector<32x32xf32> to vector<8x32xf32>
    %cst_24 = arith.constant dense<0.000000e+00> : vector<8x32xf32>
    %36 = tpu.matmul %34, %35, %cst_24 {dimension_numbers = #tpu.dot_dimension_numbers<[1], [0], [0], [1], [0, 0, 1, 1], [], []>} : vector<8x8xf32>, vector<8x32xf32>, vector<8x32xf32> -> vector<8x32xf32>
    %37 = arith.addf %15, %36 : vector<8x32xf32>
    %38 = vector.extract_strided_slice %10 {offsets = [0, 8], sizes = [8, 8], strides = [1, 1]} : vector<8x32xf32> to vector<8x8xf32>
    %39 = vector.extract_strided_slice %14 {offsets = [0, 8], sizes = [8, 8], strides = [1, 1]} : vector<8x64xf32> to vector<8x8xf32>
    %40 = vector.extract_strided_slice %14 {offsets = [0, 40], sizes = [8, 8], strides = [1, 1]} : vector<8x64xf32> to vector<8x8xf32>
    %cst_25 = arith.constant dense<0.000000e+00> : vector<8x8xf32>
    %41 = tpu.matmul %38, %39, %cst_25 {dimension_numbers = #tpu.dot_dimension_numbers<[1], [1], [0], [0], [0, 0, 1, 0], [], []>} : vector<8x8xf32>, vector<8x8xf32>, vector<8x8xf32> -> vector<8x8xf32>
    %cst_26 = arith.constant 0.353553385 : f32
    %42 = vector.broadcast %cst_26 : f32 to vector<8x8xf32>
    %43 = arith.mulf %41, %42 : vector<8x8xf32>
    %c0_27 = arith.constant 0 : index
    %c0_28 = arith.constant 0 : index
    %44 = vector.load %arg11[%c0_27, %c0_28] : memref<8x8xf32, #tpu.memory_space<vmem>>, vector<8x8xf32>
    %45 = arith.addf %43, %44 : vector<8x8xf32>
    %cst_29 = arith.constant dense<0xFF800000> : vector<8xf32>
    %46 = vector.multi_reduction <maximumf>, %45, %cst_29 [1] : vector<8x8xf32> to vector<8xf32>
    %47 = vector.shape_cast %46 : vector<8xf32> to vector<8x1xf32>
    %48 = vector.broadcast %47 : vector<8x1xf32> to vector<8x8xf32>
    %49 = arith.subf %45, %48 : vector<8x8xf32>
    %50 = math.exp %49 : vector<8x8xf32>
    %cst_30 = arith.constant dense<0.000000e+00> : vector<8xf32>
    %51 = vector.multi_reduction <add>, %50, %cst_30 [1] : vector<8x8xf32> to vector<8xf32>
    %52 = vector.shape_cast %51 : vector<8xf32> to vector<8x1xf32>
    %53 = tpu.reciprocal %52 {approx = true} : vector<8x1xf32> -> vector<8x1xf32>
    %54 = vector.broadcast %53 : vector<8x1xf32> to vector<8x8xf32>
    %55 = arith.mulf %50, %54 : vector<8x8xf32>
    %cst_31 = arith.constant dense<0.000000e+00> : vector<8x8xf32>
    %56 = tpu.matmul %55, %40, %cst_31 {dimension_numbers = #tpu.dot_dimension_numbers<[1], [0], [0], [1], [0, 0, 1, 1], [], []>} : vector<8x8xf32>, vector<8x8xf32>, vector<8x8xf32> -> vector<8x8xf32>
    %57 = vector.extract_strided_slice %6 {offsets = [8, 0], sizes = [8, 32], strides = [1, 1]} : vector<32x32xf32> to vector<8x32xf32>
    %cst_32 = arith.constant dense<0.000000e+00> : vector<8x32xf32>
    %58 = tpu.matmul %56, %57, %cst_32 {dimension_numbers = #tpu.dot_dimension_numbers<[1], [0], [0], [1], [0, 0, 1, 1], [], []>} : vector<8x8xf32>, vector<8x32xf32>, vector<8x32xf32> -> vector<8x32xf32>
    %59 = arith.addf %37, %58 : vector<8x32xf32>
    %60 = vector.extract_strided_slice %10 {offsets = [0, 16], sizes = [8, 8], strides = [1, 1]} : vector<8x32xf32> to vector<8x8xf32>
    %61 = vector.extract_strided_slice %14 {offsets = [0, 16], sizes = [8, 8], strides = [1, 1]} : vector<8x64xf32> to vector<8x8xf32>
    %62 = vector.extract_strided_slice %14 {offsets = [0, 48], sizes = [8, 8], strides = [1, 1]} : vector<8x64xf32> to vector<8x8xf32>
    %cst_33 = arith.constant dense<0.000000e+00> : vector<8x8xf32>
    %63 = tpu.matmul %60, %61, %cst_33 {dimension_numbers = #tpu.dot_dimension_numbers<[1], [1], [0], [0], [0, 0, 1, 0], [], []>} : vector<8x8xf32>, vector<8x8xf32>, vector<8x8xf32> -> vector<8x8xf32>
    %cst_34 = arith.constant 0.353553385 : f32
    %64 = vector.broadcast %cst_34 : f32 to vector<8x8xf32>
    %65 = arith.mulf %63, %64 : vector<8x8xf32>
    %c0_35 = arith.constant 0 : index
    %c0_36 = arith.constant 0 : index
    %66 = vector.load %arg11[%c0_35, %c0_36] : memref<8x8xf32, #tpu.memory_space<vmem>>, vector<8x8xf32>
    %67 = arith.addf %65, %66 : vector<8x8xf32>
    %cst_37 = arith.constant dense<0xFF800000> : vector<8xf32>
    %68 = vector.multi_reduction <maximumf>, %67, %cst_37 [1] : vector<8x8xf32> to vector<8xf32>
    %69 = vector.shape_cast %68 : vector<8xf32> to vector<8x1xf32>
    %70 = vector.broadcast %69 : vector<8x1xf32> to vector<8x8xf32>
    %71 = arith.subf %67, %70 : vector<8x8xf32>
    %72 = math.exp %71 : vector<8x8xf32>
    %cst_38 = arith.constant dense<0.000000e+00> : vector<8xf32>
    %73 = vector.multi_reduction <add>, %72, %cst_38 [1] : vector<8x8xf32> to vector<8xf32>
    %74 = vector.shape_cast %73 : vector<8xf32> to vector<8x1xf32>
    %75 = tpu.reciprocal %74 {approx = true} : vector<8x1xf32> -> vector<8x1xf32>
    %76 = vector.broadcast %75 : vector<8x1xf32> to vector<8x8xf32>
    %77 = arith.mulf %72, %76 : vector<8x8xf32>
    %cst_39 = arith.constant dense<0.000000e+00> : vector<8x8xf32>
    %78 = tpu.matmul %77, %62, %cst_39 {dimension_numbers = #tpu.dot_dimension_numbers<[1], [0], [0], [1], [0, 0, 1, 1], [], []>} : vector<8x8xf32>, vector<8x8xf32>, vector<8x8xf32> -> vector<8x8xf32>
    %79 = vector.extract_strided_slice %6 {offsets = [16, 0], sizes = [8, 32], strides = [1, 1]} : vector<32x32xf32> to vector<8x32xf32>
    %cst_40 = arith.constant dense<0.000000e+00> : vector<8x32xf32>
    %80 = tpu.matmul %78, %79, %cst_40 {dimension_numbers = #tpu.dot_dimension_numbers<[1], [0], [0], [1], [0, 0, 1, 1], [], []>} : vector<8x8xf32>, vector<8x32xf32>, vector<8x32xf32> -> vector<8x32xf32>
    %81 = arith.addf %59, %80 : vector<8x32xf32>
    %82 = vector.extract_strided_slice %10 {offsets = [0, 24], sizes = [8, 8], strides = [1, 1]} : vector<8x32xf32> to vector<8x8xf32>
    %83 = vector.extract_strided_slice %14 {offsets = [0, 24], sizes = [8, 8], strides = [1, 1]} : vector<8x64xf32> to vector<8x8xf32>
    %84 = vector.extract_strided_slice %14 {offsets = [0, 56], sizes = [8, 8], strides = [1, 1]} : vector<8x64xf32> to vector<8x8xf32>
    %cst_41 = arith.constant dense<0.000000e+00> : vector<8x8xf32>
    %85 = tpu.matmul %82, %83, %cst_41 {dimension_numbers = #tpu.dot_dimension_numbers<[1], [1], [0], [0], [0, 0, 1, 0], [], []>} : vector<8x8xf32>, vector<8x8xf32>, vector<8x8xf32> -> vector<8x8xf32>
    %cst_42 = arith.constant 0.353553385 : f32
    %86 = vector.broadcast %cst_42 : f32 to vector<8x8xf32>
    %87 = arith.mulf %85, %86 : vector<8x8xf32>
    %c0_43 = arith.constant 0 : index
    %c0_44 = arith.constant 0 : index
    %88 = vector.load %arg11[%c0_43, %c0_44] : memref<8x8xf32, #tpu.memory_space<vmem>>, vector<8x8xf32>
    %89 = arith.addf %87, %88 : vector<8x8xf32>
    %cst_45 = arith.constant dense<0xFF800000> : vector<8xf32>
    %90 = vector.multi_reduction <maximumf>, %89, %cst_45 [1] : vector<8x8xf32> to vector<8xf32>
    %91 = vector.shape_cast %90 : vector<8xf32> to vector<8x1xf32>
    %92 = vector.broadcast %91 : vector<8x1xf32> to vector<8x8xf32>
    %93 = arith.subf %89, %92 : vector<8x8xf32>
    %94 = math.exp %93 : vector<8x8xf32>
    %cst_46 = arith.constant dense<0.000000e+00> : vector<8xf32>
    %95 = vector.multi_reduction <add>, %94, %cst_46 [1] : vector<8x8xf32> to vector<8xf32>
    %96 = vector.shape_cast %95 : vector<8xf32> to vector<8x1xf32>
    %97 = tpu.reciprocal %96 {approx = true} : vector<8x1xf32> -> vector<8x1xf32>
    %98 = vector.broadcast %97 : vector<8x1xf32> to vector<8x8xf32>
    %99 = arith.mulf %94, %98 : vector<8x8xf32>
    %cst_47 = arith.constant dense<0.000000e+00> : vector<8x8xf32>
    %100 = tpu.matmul %99, %84, %cst_47 {dimension_numbers = #tpu.dot_dimension_numbers<[1], [0], [0], [1], [0, 0, 1, 1], [], []>} : vector<8x8xf32>, vector<8x8xf32>, vector<8x8xf32> -> vector<8x8xf32>
    %101 = vector.extract_strided_slice %6 {offsets = [24, 0], sizes = [8, 32], strides = [1, 1]} : vector<32x32xf32> to vector<8x32xf32>
    %cst_48 = arith.constant dense<0.000000e+00> : vector<8x32xf32>
    %102 = tpu.matmul %100, %101, %cst_48 {dimension_numbers = #tpu.dot_dimension_numbers<[1], [0], [0], [1], [0, 0, 1, 1], [], []>} : vector<8x8xf32>, vector<8x32xf32>, vector<8x32xf32> -> vector<8x32xf32>
    %103 = arith.addf %81, %102 : vector<8x32xf32>
    %c0_49 = arith.constant 0 : index
    %c0_50 = arith.constant 0 : index
    %104 = vector.load %arg8[%c0_49, %c0_50] : memref<1x32xf32, #tpu.memory_space<vmem>>, vector<1x32xf32>
    %105 = vector.broadcast %104 : vector<1x32xf32> to vector<8x32xf32>
    %106 = arith.addf %103, %105 : vector<8x32xf32>
    %107 = arith.addf %1, %106 : vector<8x32xf32>
    %c0_51 = arith.constant 0 : index
    %c0_52 = arith.constant 0 : index
    %108 = vector.load %arg9[%c0_51, %c0_52] : memref<1x32xf32, #tpu.memory_space<vmem>>, vector<1x32xf32>
    %c0_53 = arith.constant 0 : index
    %c0_54 = arith.constant 0 : index
    %109 = vector.load %arg10[%c0_53, %c0_54] : memref<1x32xf32, #tpu.memory_space<vmem>>, vector<1x32xf32>
    %cst_55 = arith.constant dense<0.000000e+00> : vector<8xf32>
    %110 = vector.multi_reduction <add>, %107, %cst_55 [1] : vector<8x32xf32> to vector<8xf32>
    %111 = vector.shape_cast %110 : vector<8xf32> to vector<8x1xf32>
    %cst_56 = arith.constant 3.200000e+01 : f32
    %112 = vector.broadcast %cst_56 : f32 to vector<8x1xf32>
    %113 = arith.divf %111, %112 : vector<8x1xf32>
    %114 = vector.broadcast %113 : vector<8x1xf32> to vector<8x32xf32>
    %115 = arith.subf %107, %114 : vector<8x32xf32>
    %116 = arith.mulf %115, %115 : vector<8x32xf32>
    %cst_57 = arith.constant dense<0.000000e+00> : vector<8xf32>
    %117 = vector.multi_reduction <add>, %116, %cst_57 [1] : vector<8x32xf32> to vector<8xf32>
    %118 = vector.shape_cast %117 : vector<8xf32> to vector<8x1xf32>
    %cst_58 = arith.constant 3.200000e+01 : f32
    %119 = vector.broadcast %cst_58 : f32 to vector<8x1xf32>
    %120 = arith.divf %118, %119 : vector<8x1xf32>
    %121 = vector.broadcast %113 : vector<8x1xf32> to vector<8x32xf32>
    %122 = arith.subf %107, %121 : vector<8x32xf32>
    %cst_59 = arith.constant 9.99999974E-6 : f32
    %123 = vector.broadcast %cst_59 : f32 to vector<8x1xf32>
    %124 = arith.addf %120, %123 : vector<8x1xf32>
    %125 = math.rsqrt %124 : vector<8x1xf32>
    %126 = vector.broadcast %125 : vector<8x1xf32> to vector<8x32xf32>
    %127 = arith.mulf %122, %126 : vector<8x32xf32>
    %128 = vector.broadcast %108 : vector<1x32xf32> to vector<8x32xf32>
    %129 = arith.mulf %127, %128 : vector<8x32xf32>
    %130 = vector.broadcast %109 : vector<1x32xf32> to vector<8x32xf32>
    %131 = arith.addf %129, %130 : vector<8x32xf32>
    %c0_60 = arith.constant 0 : index
    %c0_61 = arith.constant 0 : index
    %c0_62 = arith.constant 0 : index
    %132 = vector.load %arg12[%c0_60, %c0_61, %c0_62] : memref<1x8x32xf32, #tpu.memory_space<vmem>>, vector<1x8x32xf32>
    %133 = vector.shape_cast %132 : vector<1x8x32xf32> to vector<8x32xf32>
    %134 = vector.shape_cast %131 : vector<8x32xf32> to vector<1x8x32xf32>
    tpu.vector_store %arg12[%c0_60, %c0_61, %c0_62], %134 {strides = array<i32>} : memref<1x8x32xf32, #tpu.memory_space<vmem>>, vector<1x8x32xf32>,
    return
  }
  func.func @transform_0(%arg0: i32) -> (i32, i32, i32) {
    %c0_i32 = arith.constant 0 : i32
    %c0_i32_0 = arith.constant 0 : i32
    %c0_i32_1 = arith.constant 0 : i32
    return %arg0, %c0_i32, %c0_i32_0 : i32, i32, i32
  }
  func.func @transform_1(%arg0: i32) -> (i32, i32, i32) {
    %c0_i32 = arith.constant 0 : i32
    %c0_i32_0 = arith.constant 0 : i32
    %c0_i32_1 = arith.constant 0 : i32
    return %arg0, %c0_i32, %c0_i32_0 : i32, i32, i32
  }
  func.func @transform_2(%arg0: i32) -> (i32, i32) {
    %c0_i32 = arith.constant 0 : i32
    %c0_i32_0 = arith.constant 0 : i32
    %c0_i32_1 = arith.constant 0 : i32
    return %c0_i32, %c0_i32_0 : i32, i32
  }
  func.func @transform_3(%arg0: i32) -> (i32, i32) {
    %c0_i32 = arith.constant 0 : i32
    %c0_i32_0 = arith.constant 0 : i32
    %c0_i32_1 = arith.constant 0 : i32
    return %c0_i32, %c0_i32_0 : i32, i32
  }
  func.func @transform_4(%arg0: i32) -> (i32, i32) {
    %c0_i32 = arith.constant 0 : i32
    %c0_i32_0 = arith.constant 0 : i32
    %c0_i32_1 = arith.constant 0 : i32
    return %c0_i32, %c0_i32_0 : i32, i32
  }
  func.func @transform_5(%arg0: i32) -> (i32, i32) {
    %c0_i32 = arith.constant 0 : i32
    %c0_i32_0 = arith.constant 0 : i32
    %c0_i32_1 = arith.constant 0 : i32
    return %c0_i32, %c0_i32_0 : i32, i32
  }
  func.func @transform_6(%arg0: i32) -> (i32, i32) {
    %c0_i32 = arith.constant 0 : i32
    %c0_i32_0 = arith.constant 0 : i32
    %c0_i32_1 = arith.constant 0 : i32
    return %c0_i32, %c0_i32_0 : i32, i32
  }
  func.func @transform_7(%arg0: i32) -> (i32, i32) {
    %c0_i32 = arith.constant 0 : i32
    %c0_i32_0 = arith.constant 0 : i32
    %c0_i32_1 = arith.constant 0 : i32
    return %c0_i32, %c0_i32_0 : i32, i32
  }
  func.func @transform_8(%arg0: i32) -> (i32, i32) {
    %c0_i32 = arith.constant 0 : i32
    %c0_i32_0 = arith.constant 0 : i32
    %c0_i32_1 = arith.constant 0 : i32
    return %c0_i32, %c0_i32_0 : i32, i32
  }
  func.func @transform_9(%arg0: i32) -> (i32, i32) {
    %c0_i32 = arith.constant 0 : i32
    %c0_i32_0 = arith.constant 0 : i32
    %c0_i32_1 = arith.constant 0 : i32
    return %c0_i32, %c0_i32_0 : i32, i32
  }
  func.func @transform_10(%arg0: i32) -> (i32, i32) {
    %c0_i32 = arith.constant 0 : i32
    %c0_i32_0 = arith.constant 0 : i32
    %c0_i32_1 = arith.constant 0 : i32
    return %c0_i32, %c0_i32_0 : i32, i32
  }
  func.func @transform_11(%arg0: i32) -> (i32, i32, i32) {
    %c0_i32 = arith.constant 0 : i32
    %c0_i32_0 = arith.constant 0 : i32
    %c0_i32_1 = arith.constant 0 : i32
    return %arg0, %c0_i32, %c0_i32_0 : i32, i32, i32
  }
}

module attributes {stable_mosaic.version = 11 : i64} {
  func.func @_mha_block_kernel(%arg0: i32, %arg1: memref<1x8x32xf32, #tpu.memory_space<vmem>>, %arg2: memref<1x16x32xf32, #tpu.memory_space<vmem>>, %arg3: memref<32x32xf32, #tpu.memory_space<vmem>>, %arg4: memref<1x32xf32, #tpu.memory_space<vmem>>, %arg5: memref<32x64xf32, #tpu.memory_space<vmem>>, %arg6: memref<1x64xf32, #tpu.memory_space<vmem>>, %arg7: memref<32x32xf32, #tpu.memory_space<vmem>>, %arg8: memref<1x32xf32, #tpu.memory_space<vmem>>, %arg9: memref<1x32xf32, #tpu.memory_space<vmem>>, %arg10: memref<1x32xf32, #tpu.memory_space<vmem>>, %arg11: memref<8x16xf32, #tpu.memory_space<vmem>>, %arg12: memref<1x8x32xf32, #tpu.memory_space<vmem>>) attributes {dimension_semantics = [#tpu.dimension_semantics<parallel>], iteration_bounds = array<i64: 2>, scalar_prefetch = 0 : i64, scratch_operands = 0 : i64, tpu.core_type = #tpu.core_type<tc>, window_params = [{transform_indices = @transform_0, window_bounds = array<i64: 1, 8, 32>}, {transform_indices = @transform_1, window_bounds = array<i64: 1, 16, 32>}, {pipeline_mode = #tpu.pipeline_mode<synchronous>, transform_indices = @transform_2, window_bounds = array<i64: 32, 32>}, {pipeline_mode = #tpu.pipeline_mode<synchronous>, transform_indices = @transform_3, window_bounds = array<i64: 1, 32>}, {pipeline_mode = #tpu.pipeline_mode<synchronous>, transform_indices = @transform_4, window_bounds = array<i64: 32, 64>}, {pipeline_mode = #tpu.pipeline_mode<synchronous>, transform_indices = @transform_5, window_bounds = array<i64: 1, 64>}, {pipeline_mode = #tpu.pipeline_mode<synchronous>, transform_indices = @transform_6, window_bounds = array<i64: 32, 32>}, {pipeline_mode = #tpu.pipeline_mode<synchronous>, transform_indices = @transform_7, window_bounds = array<i64: 1, 32>}, {pipeline_mode = #tpu.pipeline_mode<synchronous>, transform_indices = @transform_8, window_bounds = array<i64: 1, 32>}, {pipeline_mode = #tpu.pipeline_mode<synchronous>, transform_indices = @transform_9, window_bounds = array<i64: 1, 32>}, {pipeline_mode = #tpu.pipeline_mode<synchronous>, transform_indices = @transform_10, window_bounds = array<i64: 8, 16>}, {transform_indices = @transform_11, window_bounds = array<i64: 1, 8, 32>}]} {
    %c0 = arith.constant 0 : index
    %c0_0 = arith.constant 0 : index
    %c0_1 = arith.constant 0 : index
    %0 = vector.load %arg1[%c0, %c0_0, %c0_1] : memref<1x8x32xf32, #tpu.memory_space<vmem>>, vector<1x8x32xf32>
    %1 = vector.shape_cast %0 : vector<1x8x32xf32> to vector<8x32xf32>
    %c0_2 = arith.constant 0 : index
    %c0_3 = arith.constant 0 : index
    %c0_4 = arith.constant 0 : index
    %2 = vector.load %arg2[%c0_2, %c0_3, %c0_4] : memref<1x16x32xf32, #tpu.memory_space<vmem>>, vector<1x16x32xf32>
    %3 = vector.shape_cast %2 : vector<1x16x32xf32> to vector<16x32xf32>
    %c0_5 = arith.constant 0 : index
    %c0_6 = arith.constant 0 : index
    %4 = vector.load %arg3[%c0_5, %c0_6] : memref<32x32xf32, #tpu.memory_space<vmem>>, vector<32x32xf32>
    %c0_7 = arith.constant 0 : index
    %c0_8 = arith.constant 0 : index
    %5 = vector.load %arg5[%c0_7, %c0_8] : memref<32x64xf32, #tpu.memory_space<vmem>>, vector<32x64xf32>
    %c0_9 = arith.constant 0 : index
    %c0_10 = arith.constant 0 : index
    %6 = vector.load %arg7[%c0_9, %c0_10] : memref<32x32xf32, #tpu.memory_space<vmem>>, vector<32x32xf32>
    %cst = arith.constant dense<0.000000e+00> : vector<8x32xf32>
    %7 = tpu.matmul %1, %4, %cst {dimension_numbers = #tpu.dot_dimension_numbers<[1], [0], [0], [1], [0, 0, 1, 1], [], []>} : vector<8x32xf32>, vector<32x32xf32>, vector<8x32xf32> -> vector<8x32xf32>
    %c0_11 = arith.constant 0 : index
    %c0_12 = arith.constant 0 : index
    %8 = vector.load %arg4[%c0_11, %c0_12] : memref<1x32xf32, #tpu.memory_space<vmem>>, vector<1x32xf32>
    %9 = vector.broadcast %8 : vector<1x32xf32> to vector<8x32xf32>
    %10 = arith.addf %7, %9 : vector<8x32xf32>
    %cst_13 = arith.constant dense<0.000000e+00> : vector<16x64xf32>
    %11 = tpu.matmul %3, %5, %cst_13 {dimension_numbers = #tpu.dot_dimension_numbers<[1], [0], [0], [1], [0, 0, 1, 1], [], []>} : vector<16x32xf32>, vector<32x64xf32>, vector<16x64xf32> -> vector<16x64xf32>
    %c0_14 = arith.constant 0 : index
    %c0_15 = arith.constant 0 : index
    %12 = vector.load %arg6[%c0_14, %c0_15] : memref<1x64xf32, #tpu.memory_space<vmem>>, vector<1x64xf32>
    %13 = vector.broadcast %12 : vector<1x64xf32> to vector<16x64xf32>
    %14 = arith.addf %11, %13 : vector<16x64xf32>
    %cst_16 = arith.constant 0.000000e+00 : f32
    %15 = vector.broadcast %cst_16 : f32 to vector<8x32xf32>
    %16 = vector.extract_strided_slice %10 {offsets = [0, 0], sizes = [8, 8], strides = [1, 1]} : vector<8x32xf32> to vector<8x8xf32>
    %17 = vector.extract_strided_slice %14 {offsets = [0, 0], sizes = [16, 8], strides = [1, 1]} : vector<16x64xf32> to vector<16x8xf32>
    %18 = vector.extract_strided_slice %14 {offsets = [0, 32], sizes = [16, 8], strides = [1, 1]} : vector<16x64xf32> to vector<16x8xf32>
    %cst_17 = arith.constant dense<0.000000e+00> : vector<8x16xf32>
    %19 = tpu.matmul %16, %17, %cst_17 {dimension_numbers = #tpu.dot_dimension_numbers<[1], [1], [0], [0], [0, 0, 1, 0], [], []>} : vector<8x8xf32>, vector<16x8xf32>, vector<8x16xf32> -> vector<8x16xf32>
    %cst_18 = arith.constant 0.353553385 : f32
    %20 = vector.broadcast %cst_18 : f32 to vector<8x16xf32>
    %21 = arith.mulf %19, %20 : vector<8x16xf32>
    %c0_19 = arith.constant 0 : index
    %c0_20 = arith.constant 0 : index
    %22 = vector.load %arg11[%c0_19, %c0_20] : memref<8x16xf32, #tpu.memory_space<vmem>>, vector<8x16xf32>
    %23 = arith.addf %21, %22 : vector<8x16xf32>
    %cst_21 = arith.constant dense<0xFF800000> : vector<8xf32>
    %24 = vector.multi_reduction <maximumf>, %23, %cst_21 [1] : vector<8x16xf32> to vector<8xf32>
    %25 = vector.shape_cast %24 : vector<8xf32> to vector<8x1xf32>
    %26 = vector.broadcast %25 : vector<8x1xf32> to vector<8x16xf32>
    %27 = arith.subf %23, %26 : vector<8x16xf32>
    %28 = math.exp %27 : vector<8x16xf32>
    %cst_22 = arith.constant dense<0.000000e+00> : vector<8xf32>
    %29 = vector.multi_reduction <add>, %28, %cst_22 [1] : vector<8x16xf32> to vector<8xf32>
    %30 = vector.shape_cast %29 : vector<8xf32> to vector<8x1xf32>
    %31 = tpu.reciprocal %30 {approx = true} : vector<8x1xf32> -> vector<8x1xf32>
    %32 = vector.broadcast %31 : vector<8x1xf32> to vector<8x16xf32>
    %33 = arith.mulf %28, %32 : vector<8x16xf32>
    %cst_23 = arith.constant dense<0.000000e+00> : vector<8x8xf32>
    %34 = tpu.matmul %33, %18, %cst_23 {dimension_numbers = #tpu.dot_dimension_numbers<[1], [0], [0], [1], [0, 0, 1, 1], [], []>} : vector<8x16xf32>, vector<16x8xf32>, vector<8x8xf32> -> vector<8x8xf32>
    %35 = vector.extract_strided_slice %6 {offsets = [0, 0], sizes = [8, 32], strides = [1, 1]} : vector<32x32xf32> to vector<8x32xf32>
    %cst_24 = arith.constant dense<0.000000e+00> : vector<8x32xf32>
    %36 = tpu.matmul %34, %35, %cst_24 {dimension_numbers = #tpu.dot_dimension_numbers<[1], [0], [0], [1], [0, 0, 1, 1], [], []>} : vector<8x8xf32>, vector<8x32xf32>, vector<8x32xf32> -> vector<8x32xf32>
    %37 = arith.addf %15, %36 : vector<8x32xf32>
    %38 = vector.extract_strided_slice %10 {offsets = [0, 8], sizes = [8, 8], strides = [1, 1]} : vector<8x32xf32> to vector<8x8xf32>
    %39 = vector.extract_strided_slice %14 {offsets = [0, 8], sizes = [16, 8], strides = [1, 1]} : vector<16x64xf32> to vector<16x8xf32>
    %40 = vector.extract_strided_slice %14 {offsets = [0, 40], sizes = [16, 8], strides = [1, 1]} : vector<16x64xf32> to vector<16x8xf32>
    %cst_25 = arith.constant dense<0.000000e+00> : vector<8x16xf32>
    %41 = tpu.matmul %38, %39, %cst_25 {dimension_numbers = #tpu.dot_dimension_numbers<[1], [1], [0], [0], [0, 0, 1, 0], [], []>} : vector<8x8xf32>, vector<16x8xf32>, vector<8x16xf32> -> vector<8x16xf32>
    %cst_26 = arith.constant 0.353553385 : f32
    %42 = vector.broadcast %cst_26 : f32 to vector<8x16xf32>
    %43 = arith.mulf %41, %42 : vector<8x16xf32>
    %c0_27 = arith.constant 0 : index
    %c0_28 = arith.constant 0 : index
    %44 = vector.load %arg11[%c0_27, %c0_28] : memref<8x16xf32, #tpu.memory_space<vmem>>, vector<8x16xf32>
    %45 = arith.addf %43, %44 : vector<8x16xf32>
    %cst_29 = arith.constant dense<0xFF800000> : vector<8xf32>
    %46 = vector.multi_reduction <maximumf>, %45, %cst_29 [1] : vector<8x16xf32> to vector<8xf32>
    %47 = vector.shape_cast %46 : vector<8xf32> to vector<8x1xf32>
    %48 = vector.broadcast %47 : vector<8x1xf32> to vector<8x16xf32>
    %49 = arith.subf %45, %48 : vector<8x16xf32>
    %50 = math.exp %49 : vector<8x16xf32>
    %cst_30 = arith.constant dense<0.000000e+00> : vector<8xf32>
    %51 = vector.multi_reduction <add>, %50, %cst_30 [1] : vector<8x16xf32> to vector<8xf32>
    %52 = vector.shape_cast %51 : vector<8xf32> to vector<8x1xf32>
    %53 = tpu.reciprocal %52 {approx = true} : vector<8x1xf32> -> vector<8x1xf32>
    %54 = vector.broadcast %53 : vector<8x1xf32> to vector<8x16xf32>
    %55 = arith.mulf %50, %54 : vector<8x16xf32>
    %cst_31 = arith.constant dense<0.000000e+00> : vector<8x8xf32>
    %56 = tpu.matmul %55, %40, %cst_31 {dimension_numbers = #tpu.dot_dimension_numbers<[1], [0], [0], [1], [0, 0, 1, 1], [], []>} : vector<8x16xf32>, vector<16x8xf32>, vector<8x8xf32> -> vector<8x8xf32>
    %57 = vector.extract_strided_slice %6 {offsets = [8, 0], sizes = [8, 32], strides = [1, 1]} : vector<32x32xf32> to vector<8x32xf32>
    %cst_32 = arith.constant dense<0.000000e+00> : vector<8x32xf32>
    %58 = tpu.matmul %56, %57, %cst_32 {dimension_numbers = #tpu.dot_dimension_numbers<[1], [0], [0], [1], [0, 0, 1, 1], [], []>} : vector<8x8xf32>, vector<8x32xf32>, vector<8x32xf32> -> vector<8x32xf32>
    %59 = arith.addf %37, %58 : vector<8x32xf32>
    %60 = vector.extract_strided_slice %10 {offsets = [0, 16], sizes = [8, 8], strides = [1, 1]} : vector<8x32xf32> to vector<8x8xf32>
    %61 = vector.extract_strided_slice %14 {offsets = [0, 16], sizes = [16, 8], strides = [1, 1]} : vector<16x64xf32> to vector<16x8xf32>
    %62 = vector.extract_strided_slice %14 {offsets = [0, 48], sizes = [16, 8], strides = [1, 1]} : vector<16x64xf32> to vector<16x8xf32>
    %cst_33 = arith.constant dense<0.000000e+00> : vector<8x16xf32>
    %63 = tpu.matmul %60, %61, %cst_33 {dimension_numbers = #tpu.dot_dimension_numbers<[1], [1], [0], [0], [0, 0, 1, 0], [], []>} : vector<8x8xf32>, vector<16x8xf32>, vector<8x16xf32> -> vector<8x16xf32>
    %cst_34 = arith.constant 0.353553385 : f32
    %64 = vector.broadcast %cst_34 : f32 to vector<8x16xf32>
    %65 = arith.mulf %63, %64 : vector<8x16xf32>
    %c0_35 = arith.constant 0 : index
    %c0_36 = arith.constant 0 : index
    %66 = vector.load %arg11[%c0_35, %c0_36] : memref<8x16xf32, #tpu.memory_space<vmem>>, vector<8x16xf32>
    %67 = arith.addf %65, %66 : vector<8x16xf32>
    %cst_37 = arith.constant dense<0xFF800000> : vector<8xf32>
    %68 = vector.multi_reduction <maximumf>, %67, %cst_37 [1] : vector<8x16xf32> to vector<8xf32>
    %69 = vector.shape_cast %68 : vector<8xf32> to vector<8x1xf32>
    %70 = vector.broadcast %69 : vector<8x1xf32> to vector<8x16xf32>
    %71 = arith.subf %67, %70 : vector<8x16xf32>
    %72 = math.exp %71 : vector<8x16xf32>
    %cst_38 = arith.constant dense<0.000000e+00> : vector<8xf32>
    %73 = vector.multi_reduction <add>, %72, %cst_38 [1] : vector<8x16xf32> to vector<8xf32>
    %74 = vector.shape_cast %73 : vector<8xf32> to vector<8x1xf32>
    %75 = tpu.reciprocal %74 {approx = true} : vector<8x1xf32> -> vector<8x1xf32>
    %76 = vector.broadcast %75 : vector<8x1xf32> to vector<8x16xf32>
    %77 = arith.mulf %72, %76 : vector<8x16xf32>
    %cst_39 = arith.constant dense<0.000000e+00> : vector<8x8xf32>
    %78 = tpu.matmul %77, %62, %cst_39 {dimension_numbers = #tpu.dot_dimension_numbers<[1], [0], [0], [1], [0, 0, 1, 1], [], []>} : vector<8x16xf32>, vector<16x8xf32>, vector<8x8xf32> -> vector<8x8xf32>
    %79 = vector.extract_strided_slice %6 {offsets = [16, 0], sizes = [8, 32], strides = [1, 1]} : vector<32x32xf32> to vector<8x32xf32>
    %cst_40 = arith.constant dense<0.000000e+00> : vector<8x32xf32>
    %80 = tpu.matmul %78, %79, %cst_40 {dimension_numbers = #tpu.dot_dimension_numbers<[1], [0], [0], [1], [0, 0, 1, 1], [], []>} : vector<8x8xf32>, vector<8x32xf32>, vector<8x32xf32> -> vector<8x32xf32>
    %81 = arith.addf %59, %80 : vector<8x32xf32>
    %82 = vector.extract_strided_slice %10 {offsets = [0, 24], sizes = [8, 8], strides = [1, 1]} : vector<8x32xf32> to vector<8x8xf32>
    %83 = vector.extract_strided_slice %14 {offsets = [0, 24], sizes = [16, 8], strides = [1, 1]} : vector<16x64xf32> to vector<16x8xf32>
    %84 = vector.extract_strided_slice %14 {offsets = [0, 56], sizes = [16, 8], strides = [1, 1]} : vector<16x64xf32> to vector<16x8xf32>
    %cst_41 = arith.constant dense<0.000000e+00> : vector<8x16xf32>
    %85 = tpu.matmul %82, %83, %cst_41 {dimension_numbers = #tpu.dot_dimension_numbers<[1], [1], [0], [0], [0, 0, 1, 0], [], []>} : vector<8x8xf32>, vector<16x8xf32>, vector<8x16xf32> -> vector<8x16xf32>
    %cst_42 = arith.constant 0.353553385 : f32
    %86 = vector.broadcast %cst_42 : f32 to vector<8x16xf32>
    %87 = arith.mulf %85, %86 : vector<8x16xf32>
    %c0_43 = arith.constant 0 : index
    %c0_44 = arith.constant 0 : index
    %88 = vector.load %arg11[%c0_43, %c0_44] : memref<8x16xf32, #tpu.memory_space<vmem>>, vector<8x16xf32>
    %89 = arith.addf %87, %88 : vector<8x16xf32>
    %cst_45 = arith.constant dense<0xFF800000> : vector<8xf32>
    %90 = vector.multi_reduction <maximumf>, %89, %cst_45 [1] : vector<8x16xf32> to vector<8xf32>
    %91 = vector.shape_cast %90 : vector<8xf32> to vector<8x1xf32>
    %92 = vector.broadcast %91 : vector<8x1xf32> to vector<8x16xf32>
    %93 = arith.subf %89, %92 : vector<8x16xf32>
    %94 = math.exp %93 : vector<8x16xf32>
    %cst_46 = arith.constant dense<0.000000e+00> : vector<8xf32>
    %95 = vector.multi_reduction <add>, %94, %cst_46 [1] : vector<8x16xf32> to vector<8xf32>
    %96 = vector.shape_cast %95 : vector<8xf32> to vector<8x1xf32>
    %97 = tpu.reciprocal %96 {approx = true} : vector<8x1xf32> -> vector<8x1xf32>
    %98 = vector.broadcast %97 : vector<8x1xf32> to vector<8x16xf32>
    %99 = arith.mulf %94, %98 : vector<8x16xf32>
    %cst_47 = arith.constant dense<0.000000e+00> : vector<8x8xf32>
    %100 = tpu.matmul %99, %84, %cst_47 {dimension_numbers = #tpu.dot_dimension_numbers<[1], [0], [0], [1], [0, 0, 1, 1], [], []>} : vector<8x16xf32>, vector<16x8xf32>, vector<8x8xf32> -> vector<8x8xf32>
    %101 = vector.extract_strided_slice %6 {offsets = [24, 0], sizes = [8, 32], strides = [1, 1]} : vector<32x32xf32> to vector<8x32xf32>
    %cst_48 = arith.constant dense<0.000000e+00> : vector<8x32xf32>
    %102 = tpu.matmul %100, %101, %cst_48 {dimension_numbers = #tpu.dot_dimension_numbers<[1], [0], [0], [1], [0, 0, 1, 1], [], []>} : vector<8x8xf32>, vector<8x32xf32>, vector<8x32xf32> -> vector<8x32xf32>
    %103 = arith.addf %81, %102 : vector<8x32xf32>
    %c0_49 = arith.constant 0 : index
    %c0_50 = arith.constant 0 : index
    %104 = vector.load %arg8[%c0_49, %c0_50] : memref<1x32xf32, #tpu.memory_space<vmem>>, vector<1x32xf32>
    %105 = vector.broadcast %104 : vector<1x32xf32> to vector<8x32xf32>
    %106 = arith.addf %103, %105 : vector<8x32xf32>
    %107 = arith.addf %1, %106 : vector<8x32xf32>
    %c0_51 = arith.constant 0 : index
    %c0_52 = arith.constant 0 : index
    %108 = vector.load %arg9[%c0_51, %c0_52] : memref<1x32xf32, #tpu.memory_space<vmem>>, vector<1x32xf32>
    %c0_53 = arith.constant 0 : index
    %c0_54 = arith.constant 0 : index
    %109 = vector.load %arg10[%c0_53, %c0_54] : memref<1x32xf32, #tpu.memory_space<vmem>>, vector<1x32xf32>
    %cst_55 = arith.constant dense<0.000000e+00> : vector<8xf32>
    %110 = vector.multi_reduction <add>, %107, %cst_55 [1] : vector<8x32xf32> to vector<8xf32>
    %111 = vector.shape_cast %110 : vector<8xf32> to vector<8x1xf32>
    %cst_56 = arith.constant 3.200000e+01 : f32
    %112 = vector.broadcast %cst_56 : f32 to vector<8x1xf32>
    %113 = arith.divf %111, %112 : vector<8x1xf32>
    %114 = vector.broadcast %113 : vector<8x1xf32> to vector<8x32xf32>
    %115 = arith.subf %107, %114 : vector<8x32xf32>
    %116 = arith.mulf %115, %115 : vector<8x32xf32>
    %cst_57 = arith.constant dense<0.000000e+00> : vector<8xf32>
    %117 = vector.multi_reduction <add>, %116, %cst_57 [1] : vector<8x32xf32> to vector<8xf32>
    %118 = vector.shape_cast %117 : vector<8xf32> to vector<8x1xf32>
    %cst_58 = arith.constant 3.200000e+01 : f32
    %119 = vector.broadcast %cst_58 : f32 to vector<8x1xf32>
    %120 = arith.divf %118, %119 : vector<8x1xf32>
    %121 = vector.broadcast %113 : vector<8x1xf32> to vector<8x32xf32>
    %122 = arith.subf %107, %121 : vector<8x32xf32>
    %cst_59 = arith.constant 9.99999974E-6 : f32
    %123 = vector.broadcast %cst_59 : f32 to vector<8x1xf32>
    %124 = arith.addf %120, %123 : vector<8x1xf32>
    %125 = math.rsqrt %124 : vector<8x1xf32>
    %126 = vector.broadcast %125 : vector<8x1xf32> to vector<8x32xf32>
    %127 = arith.mulf %122, %126 : vector<8x32xf32>
    %128 = vector.broadcast %108 : vector<1x32xf32> to vector<8x32xf32>
    %129 = arith.mulf %127, %128 : vector<8x32xf32>
    %130 = vector.broadcast %109 : vector<1x32xf32> to vector<8x32xf32>
    %131 = arith.addf %129, %130 : vector<8x32xf32>
    %c0_60 = arith.constant 0 : index
    %c0_61 = arith.constant 0 : index
    %c0_62 = arith.constant 0 : index
    %132 = vector.load %arg12[%c0_60, %c0_61, %c0_62] : memref<1x8x32xf32, #tpu.memory_space<vmem>>, vector<1x8x32xf32>
    %133 = vector.shape_cast %132 : vector<1x8x32xf32> to vector<8x32xf32>
    %134 = vector.shape_cast %131 : vector<8x32xf32> to vector<1x8x32xf32>
    tpu.vector_store %arg12[%c0_60, %c0_61, %c0_62], %134 {strides = array<i32>} : memref<1x8x32xf32, #tpu.memory_space<vmem>>, vector<1x8x32xf32>,
    return
  }
  func.func @transform_0(%arg0: i32) -> (i32, i32, i32) {
    %c0_i32 = arith.constant 0 : i32
    %c0_i32_0 = arith.constant 0 : i32
    %c0_i32_1 = arith.constant 0 : i32
    return %arg0, %c0_i32, %c0_i32_0 : i32, i32, i32
  }
  func.func @transform_1(%arg0: i32) -> (i32, i32, i32) {
    %c0_i32 = arith.constant 0 : i32
    %c0_i32_0 = arith.constant 0 : i32
    %c0_i32_1 = arith.constant 0 : i32
    return %arg0, %c0_i32, %c0_i32_0 : i32, i32, i32
  }
  func.func @transform_2(%arg0: i32) -> (i32, i32) {
    %c0_i32 = arith.constant 0 : i32
    %c0_i32_0 = arith.constant 0 : i32
    %c0_i32_1 = arith.constant 0 : i32
    return %c0_i32, %c0_i32_0 : i32, i32
  }
  func.func @transform_3(%arg0: i32) -> (i32, i32) {
    %c0_i32 = arith.constant 0 : i32
    %c0_i32_0 = arith.constant 0 : i32
    %c0_i32_1 = arith.constant 0 : i32
    return %c0_i32, %c0_i32_0 : i32, i32
  }
  func.func @transform_4(%arg0: i32) -> (i32, i32) {
    %c0_i32 = arith.constant 0 : i32
    %c0_i32_0 = arith.constant 0 : i32
    %c0_i32_1 = arith.constant 0 : i32
    return %c0_i32, %c0_i32_0 : i32, i32
  }
  func.func @transform_5(%arg0: i32) -> (i32, i32) {
    %c0_i32 = arith.constant 0 : i32
    %c0_i32_0 = arith.constant 0 : i32
    %c0_i32_1 = arith.constant 0 : i32
    return %c0_i32, %c0_i32_0 : i32, i32
  }
  func.func @transform_6(%arg0: i32) -> (i32, i32) {
    %c0_i32 = arith.constant 0 : i32
    %c0_i32_0 = arith.constant 0 : i32
    %c0_i32_1 = arith.constant 0 : i32
    return %c0_i32, %c0_i32_0 : i32, i32
  }
  func.func @transform_7(%arg0: i32) -> (i32, i32) {
    %c0_i32 = arith.constant 0 : i32
    %c0_i32_0 = arith.constant 0 : i32
    %c0_i32_1 = arith.constant 0 : i32
    return %c0_i32, %c0_i32_0 : i32, i32
  }
  func.func @transform_8(%arg0: i32) -> (i32, i32) {
    %c0_i32 = arith.constant 0 : i32
    %c0_i32_0 = arith.constant 0 : i32
    %c0_i32_1 = arith.constant 0 : i32
    return %c0_i32, %c0_i32_0 : i32, i32
  }
  func.func @transform_9(%arg0: i32) -> (i32, i32) {
    %c0_i32 = arith.constant 0 : i32
    %c0_i32_0 = arith.constant 0 : i32
    %c0_i32_1 = arith.constant 0 : i32
    return %c0_i32, %c0_i32_0 : i32, i32
  }
  func.func @transform_10(%arg0: i32) -> (i32, i32) {
    %c0_i32 = arith.constant 0 : i32
    %c0_i32_0 = arith.constant 0 : i32
    %c0_i32_1 = arith.constant 0 : i32
    return %c0_i32, %c0_i32_0 : i32, i32
  }
  func.func @transform_11(%arg0: i32) -> (i32, i32, i32) {
    %c0_i32 = arith.constant 0 : i32
    %c0_i32_0 = arith.constant 0 : i32
    %c0_i32_1 = arith.constant 0 : i32
    return %arg0, %c0_i32, %c0_i32_0 : i32, i32, i32
  }
}

module attributes {stable_mosaic.version = 11 : i64} {
  func.func @_ffn_block_kernel(%arg0: memref<16x32xf32, #tpu.memory_space<vmem>>, %arg1: memref<32x64xf32, #tpu.memory_space<vmem>>, %arg2: memref<1x64xf32, #tpu.memory_space<vmem>>, %arg3: memref<64x32xf32, #tpu.memory_space<vmem>>, %arg4: memref<1x32xf32, #tpu.memory_space<vmem>>, %arg5: memref<1x32xf32, #tpu.memory_space<vmem>>, %arg6: memref<1x32xf32, #tpu.memory_space<vmem>>, %arg7: memref<16x32xf32, #tpu.memory_space<vmem>>) attributes {dimension_semantics = [], scalar_prefetch = 0 : i64, scratch_operands = 0 : i64, tpu.core_type = #tpu.core_type<tc>} {
    %c0 = arith.constant 0 : index
    %c0_0 = arith.constant 0 : index
    %0 = vector.load %arg0[%c0, %c0_0] : memref<16x32xf32, #tpu.memory_space<vmem>>, vector<16x32xf32>
    %c0_1 = arith.constant 0 : index
    %c0_2 = arith.constant 0 : index
    %1 = vector.load %arg1[%c0_1, %c0_2] : memref<32x64xf32, #tpu.memory_space<vmem>>, vector<32x64xf32>
    %cst = arith.constant dense<0.000000e+00> : vector<16x64xf32>
    %2 = tpu.matmul %0, %1, %cst {dimension_numbers = #tpu.dot_dimension_numbers<[1], [0], [0], [1], [0, 0, 1, 1], [], []>} : vector<16x32xf32>, vector<32x64xf32>, vector<16x64xf32> -> vector<16x64xf32>
    %c0_3 = arith.constant 0 : index
    %c0_4 = arith.constant 0 : index
    %3 = vector.load %arg2[%c0_3, %c0_4] : memref<1x64xf32, #tpu.memory_space<vmem>>, vector<1x64xf32>
    %4 = vector.broadcast %3 : vector<1x64xf32> to vector<16x64xf32>
    %5 = arith.addf %2, %4 : vector<16x64xf32>
    %cst_5 = arith.constant 0.000000e+00 : f32
    %6 = vector.broadcast %cst_5 : f32 to vector<16x64xf32>
    %7 = arith.maximumf %5, %6 : vector<16x64xf32>
    %c0_6 = arith.constant 0 : index
    %c0_7 = arith.constant 0 : index
    %8 = vector.load %arg3[%c0_6, %c0_7] : memref<64x32xf32, #tpu.memory_space<vmem>>, vector<64x32xf32>
    %cst_8 = arith.constant dense<0.000000e+00> : vector<16x32xf32>
    %9 = tpu.matmul %7, %8, %cst_8 {dimension_numbers = #tpu.dot_dimension_numbers<[1], [0], [0], [1], [0, 0, 1, 1], [], []>} : vector<16x64xf32>, vector<64x32xf32>, vector<16x32xf32> -> vector<16x32xf32>
    %c0_9 = arith.constant 0 : index
    %c0_10 = arith.constant 0 : index
    %10 = vector.load %arg4[%c0_9, %c0_10] : memref<1x32xf32, #tpu.memory_space<vmem>>, vector<1x32xf32>
    %11 = vector.broadcast %10 : vector<1x32xf32> to vector<16x32xf32>
    %12 = arith.addf %9, %11 : vector<16x32xf32>
    %13 = arith.addf %0, %12 : vector<16x32xf32>
    %c0_11 = arith.constant 0 : index
    %c0_12 = arith.constant 0 : index
    %14 = vector.load %arg5[%c0_11, %c0_12] : memref<1x32xf32, #tpu.memory_space<vmem>>, vector<1x32xf32>
    %c0_13 = arith.constant 0 : index
    %c0_14 = arith.constant 0 : index
    %15 = vector.load %arg6[%c0_13, %c0_14] : memref<1x32xf32, #tpu.memory_space<vmem>>, vector<1x32xf32>
    %cst_15 = arith.constant dense<0.000000e+00> : vector<16xf32>
    %16 = vector.multi_reduction <add>, %13, %cst_15 [1] : vector<16x32xf32> to vector<16xf32>
    %17 = vector.shape_cast %16 : vector<16xf32> to vector<16x1xf32>
    %cst_16 = arith.constant 3.200000e+01 : f32
    %18 = vector.broadcast %cst_16 : f32 to vector<16x1xf32>
    %19 = arith.divf %17, %18 : vector<16x1xf32>
    %20 = vector.broadcast %19 : vector<16x1xf32> to vector<16x32xf32>
    %21 = arith.subf %13, %20 : vector<16x32xf32>
    %22 = arith.mulf %21, %21 : vector<16x32xf32>
    %cst_17 = arith.constant dense<0.000000e+00> : vector<16xf32>
    %23 = vector.multi_reduction <add>, %22, %cst_17 [1] : vector<16x32xf32> to vector<16xf32>
    %24 = vector.shape_cast %23 : vector<16xf32> to vector<16x1xf32>
    %cst_18 = arith.constant 3.200000e+01 : f32
    %25 = vector.broadcast %cst_18 : f32 to vector<16x1xf32>
    %26 = arith.divf %24, %25 : vector<16x1xf32>
    %27 = vector.broadcast %19 : vector<16x1xf32> to vector<16x32xf32>
    %28 = arith.subf %13, %27 : vector<16x32xf32>
    %cst_19 = arith.constant 9.99999974E-6 : f32
    %29 = vector.broadcast %cst_19 : f32 to vector<16x1xf32>
    %30 = arith.addf %26, %29 : vector<16x1xf32>
    %31 = math.rsqrt %30 : vector<16x1xf32>
    %32 = vector.broadcast %31 : vector<16x1xf32> to vector<16x32xf32>
    %33 = arith.mulf %28, %32 : vector<16x32xf32>
    %34 = vector.broadcast %14 : vector<1x32xf32> to vector<16x32xf32>
    %35 = arith.mulf %33, %34 : vector<16x32xf32>
    %36 = vector.broadcast %15 : vector<1x32xf32> to vector<16x32xf32>
    %37 = arith.addf %35, %36 : vector<16x32xf32>
    %c0_20 = arith.constant 0 : index
    %c0_21 = arith.constant 0 : index
    %38 = vector.load %arg7[%c0_20, %c0_21] : memref<16x32xf32, #tpu.memory_space<vmem>>, vector<16x32xf32>
    tpu.vector_store %arg7[%c0_20, %c0_21], %37 {strides = array<i32>} : memref<16x32xf32, #tpu.memory_space<vmem>>, vector<16x32xf32>,
    return
  }
}

module attributes {stable_mosaic.version = 11 : i64} {
  func.func @_proj_kernel(%arg0: memref<2x256xf32, #tpu.memory_space<vmem>>, %arg1: memref<256x8xf32, #tpu.memory_space<vmem>>, %arg2: memref<1x8xf32, #tpu.memory_space<vmem>>, %arg3: memref<2x8xf32, #tpu.memory_space<vmem>>) attributes {dimension_semantics = [], scalar_prefetch = 0 : i64, scratch_operands = 0 : i64, tpu.core_type = #tpu.core_type<tc>} {
    %c0 = arith.constant 0 : index
    %c0_0 = arith.constant 0 : index
    %0 = vector.load %arg0[%c0, %c0_0] : memref<2x256xf32, #tpu.memory_space<vmem>>, vector<2x256xf32>
    %c0_1 = arith.constant 0 : index
    %c0_2 = arith.constant 0 : index
    %1 = vector.load %arg1[%c0_1, %c0_2] : memref<256x8xf32, #tpu.memory_space<vmem>>, vector<256x8xf32>
    %cst = arith.constant dense<0.000000e+00> : vector<2x8xf32>
    %2 = tpu.matmul %0, %1, %cst {dimension_numbers = #tpu.dot_dimension_numbers<[1], [0], [0], [1], [0, 0, 1, 1], [], []>} : vector<2x256xf32>, vector<256x8xf32>, vector<2x8xf32> -> vector<2x8xf32>
    %c0_3 = arith.constant 0 : index
    %c0_4 = arith.constant 0 : index
    %3 = vector.load %arg2[%c0_3, %c0_4] : memref<1x8xf32, #tpu.memory_space<vmem>>, vector<1x8xf32>
    %4 = vector.broadcast %3 : vector<1x8xf32> to vector<2x8xf32>
    %5 = arith.addf %2, %4 : vector<2x8xf32>
    %c0_5 = arith.constant 0 : index
    %c0_6 = arith.constant 0 : index
    %6 = vector.load %arg3[%c0_5, %c0_6] : memref<2x8xf32, #tpu.memory_space<vmem>>, vector<2x8xf32>
    tpu.vector_store %arg3[%c0_5, %c0_6], %5 {strides = array<i32>} : memref<2x8xf32, #tpu.memory_space<vmem>>, vector<2x8xf32>,
    return
  }
}

</mosaic_0001>

<bundles_post_ra>
// kernel: time_series_transformer_forward.13
= control target key start
LH: loop header
LB: loop body
LE: loop exit
PB: predicated region body
PF: predicated region fallthrough
CT: control target
= control target key end

     0   :  { %vm42_vm0 = vcmask 1043456   ;;  %vm29_vm1 = vcmask 31744   ;;  %vm139_vm2 = vcmask 261120   ;;  %s236_s1 = inlined_call_operand.vmem [shape: f32[4,32], index: 1, kind: input, shape index: {}]   ;;  %s237_s0 = inlined_call_operand.vmem [shape: f32[32,4], index: 0, kind: input, shape index: {}]   ;;  %s238_s2 = inlined_call_operand.vmem [shape: f32[1,32], index: 2, kind: input, shape index: {}]   ;;  %s239_s3 = inlined_call_operand.vmem [shape: f32[32,32], index: 3, kind: input, shape index: {}]   ;;  %s240_s4 = inlined_call_operand.vmem [shape: f32[32,32], index: 4, kind: output, shape index: {}]  }
   0x1   :  { %v21_v0 = vld [vmem:[%s236_s1] sm:$0xf]  ;;  %v19_v2 = vld [vmem:[%s237_s0 + $0x10] sm:$0xff]  ;;  %v18_v3 = vld [vmem:[%s237_s0 + $0x8] sm:$0xff] }
   0x2   :  { %v17_v1 = vld [vmem:[%s237_s0] sm:$0xff]  ;;  %159 = vmatprep.subr.msk.mxu0 %vm42_vm0, %v21_v0  ;;  %167 = vmatprep.subr.msk.mxu1 %vm42_vm0, %v21_v0  ;;  %v20_v4 = vld [vmem:[%s237_s0 + $0x18] sm:$0xff]  ;;  %v132_v7 = vld [vmem:[%s239_s3 + $0x8] sm:$0xff] }
   0x3   :  { %160 = vmatpush3.msk.msra.mxu0 %vm42_vm0, %v21_v0  ;;  %168 = vmatpush3.msk.msra.mxu1 %vm42_vm0, %v21_v0  ;;  %v148_v5 = vld [vmem:[%s238_s2] ss:$0 sm:$0xff]  ;;  %v134_v9 = vld [vmem:[%s239_s3 + $0x18] sm:$0xff]  ;;  %v133_v15 = vld [vmem:[%s239_s3 + $0x10] sm:$0xff] }
   0x4   :  { %161 = vmatprep.mubr.msk.f32.mxu0 %vm29_vm1, %v17_v1  ;;  %164 = vmatprep.mubr.msk.f32.mxu1 %vm29_vm1, %v19_v2  ;;  %v131_v13 = vld [vmem:[%s239_s3] sm:$0xff] }
   0x5   :  { %162 = vmatmul.mubr.msk.f32.vlgmr.msra.gmra.mrb[0].mxu0 %vm29_vm1, %v18_v3  ;;  %165 = vmatmul.mubr.msk.f32.vlgmr.msra.gmra.mrb[0].mxu1 %vm29_vm1, %v20_v4 }
  0xd8   :  { %v163_v6 = vpop.f32.mrb[0].mxu0  ;;  %v166_v8 = vpop.f32.mrb[0].mxu1 }
  0xd9   :  { %v118_v10 = vadd.f32 %v163_v6, %v148_v5  ;;  %v128_v11 = vadd.f32 %v166_v8, %v148_v5  ;;  %v112_v12 = vpop.f32.mrb[1].mxu0  ;;  %v122_v14 = vpop.f32.mrb[1].mxu1 }
  0xda   :  { %v113_v16 = vadd.f32 %v148_v5, %v112_v12  ;;  %v123_v17 = vadd.f32 %v148_v5, %v122_v14 }
  0xdb   :  { %v136_v18 = vadd.f32 %v132_v7, %v118_v10  ;;  %v138_v19 = vadd.f32 %v134_v9, %v128_v11 }
  0xdc   :  { %v135_v20 = vadd.f32 %v131_v13, %v113_v16  ;;  %v137_v21 = vadd.f32 %v133_v15, %v123_v17 }
  0xdd   :  { %141 = vst.msk [vmem:[%s240_s4 + $0x8] sm:$0xff] %vm139_vm2, %v136_v18  ;;  %143 = vst.msk [vmem:[%s240_s4 + $0x18] sm:$0xff] %vm139_vm2, %v138_v19 }
  0xde   :  { %140 = vst.msk [vmem:[%s240_s4] sm:$0xff] %vm139_vm2, %v135_v20  ;;  %142 = vst.msk [vmem:[%s240_s4 + $0x10] sm:$0xff] %vm139_vm2, %v137_v21 }

// kernel: time_series_transformer_forward.18
= control target key start
LH: loop header
LB: loop body
LE: loop exit
PB: predicated region body
PF: predicated region fallthrough
CT: control target
= control target key end

     0   :  { %vm31_vm0 = vcmask 1043456   ;;  %vm24_vm1 = vcmask 31744   ;;  %vm110_vm2 = vcmask 261120   ;;  %s167_s1 = inlined_call_operand.vmem [shape: f32[4,32], index: 1, kind: input, shape index: {}]   ;;  %s168_s0 = inlined_call_operand.vmem [shape: f32[16,4], index: 0, kind: input, shape index: {}]   ;;  %s169_s2 = inlined_call_operand.vmem [shape: f32[1,32], index: 2, kind: input, shape index: {}]   ;;  %s170_s3 = inlined_call_operand.vmem [shape: f32[16,32], index: 3, kind: output, shape index: {}]  }
   0x1   :  { %v16_v0 = vld [vmem:[%s167_s1] sm:$0xf]  ;;  %v15_v2 = vld [vmem:[%s168_s0 + $0x8] sm:$0xff] }
   0x2   :  { %v14_v1 = vld [vmem:[%s168_s0] sm:$0xff]  ;;  %124 = vmatprep.subr.msk.mxu0 %vm31_vm0, %v16_v0 }
   0x3   :  { %126 = vmatprep.mubr.msk.f32.mxu0 %vm24_vm1, %v14_v1  ;;  %125 = vmatpush3.msk.msra.mxu0 %vm31_vm0, %v16_v0  ;;  %v117_v3 = vld [vmem:[%s169_s2] ss:$0 sm:$0xff] }
   0x4   :  { %127 = vmatmul.mubr.msk.f32.vlgmr.msra.gmra.mrb[0].mxu0 %vm24_vm1, %v15_v2 }
  0xd7   :  { %v128_v4 = vpop.f32.mrb[0].mxu0 }
  0xd8   :  { %v107_v5 = vadd.f32 %v128_v4, %v117_v3  ;;  %v101_v6 = vpop.f32.mrb[1].mxu0 }
  0xd9   :  { %v102_v7 = vadd.f32 %v117_v3, %v101_v6 }
  0xda   :  { %112 = vst.msk [vmem:[%s170_s3 + $0x8] sm:$0xff] %vm110_vm2, %v107_v5 }
  0xdb   :  { %111 = vst.msk [vmem:[%s170_s3] sm:$0xff] %vm110_vm2, %v102_v7 }

// kernel: time_series_transformer_forward.15
= control target key start
LH: loop header
LB: loop body
LE: loop exit
PB: predicated region body
PF: predicated region fallthrough
CT: control target
= control target key end

     0   :  { %vm41_vm0 = vcmask 261120   ;;  %vm158_vm1 = vcmask 523264   ;;  %s571_s1 = inlined_call_operand.vmem [shape: f32[32,64], index: 1, kind: input, shape index: {}]   ;;  %s572_s0 = inlined_call_operand.vmem [shape: f32[32,32], index: 0, kind: input, shape index: {}]   ;;  %s573_s3 = inlined_call_operand.vmem [shape: f32[64,32], index: 3, kind: input, shape index: {}]   ;;  %s574_s2 = inlined_call_operand.vmem [shape: f32[1,64], index: 2, kind: input, shape index: {}]   ;;  %s575_s4 = inlined_call_operand.vmem [shape: f32[1,32], index: 4, kind: input, shape index: {}]   ;;  %s576_s5 = inlined_call_operand.vmem [shape: f32[1,32], index: 5, kind: input, shape index: {}]   ;;  %s577_s6 = inlined_call_operand.vmem [shape: f32[1,32], index: 6, kind: input, shape index: {}]   ;;  %s578_s7 = inlined_call_operand.vmem [shape: f32[32,32], index: 7, kind: output, shape index: {}]  }
   0x1   :  { %v30_v0 = vld [vmem:[%s571_s1] sm:$0xff]  ;;  %v31_v1 = vld [vmem:[%s571_s1 + $0x8] sm:$0xff]  ;;  %v32_v2 = vld [vmem:[%s571_s1 + $0x10] sm:$0xff] }
   0x2   :  { %v411_v3 = vpack.c.bf16 %v31_v1, %v30_v0  ;;  %v33_v4 = vld [vmem:[%s571_s1 + $0x18] sm:$0xff]  ;;  %v26_v5 = vld [vmem:[%s572_s0] sm:$0xff]  ;;  %v144_v8 = vld [vmem:[%s573_s3 + $0x8] sm:$0xff] }
   0x3   :  { %v415_v6 = vpack.c.bf16 %v33_v4, %v32_v2  ;;  %383 = vmatprep.mubr.msk.f32.mxu0 %vm41_vm0, %v26_v5  ;;  %v143_v7 = vld [vmem:[%s573_s3] sm:$0xff]  ;;  %v145_v9 = vld [vmem:[%s573_s3 + $0x10] sm:$0xff]  ;;  %v146_v10 = vld [vmem:[%s573_s3 + $0x18] sm:$0xff] }
   0x4   :  { %412 = vmatprep.subr.bf16.mxu0 %v411_v3  ;;  %v419_v11 = vpack.c.bf16 %v144_v8, %v143_v7  ;;  %v423_v12 = vpack.c.bf16 %v146_v10, %v145_v9  ;;  %v147_v13 = vld [vmem:[%s573_s3 + $0x20] sm:$0xff]  ;;  %v148_v14 = vld [vmem:[%s573_s3 + $0x28] sm:$0xff]  ;;  %v28_v17 = vld [vmem:[%s572_s0 + $0x10] sm:$0xff] }
   0x5   :  { %414 = vmatpush3.bf16.msra.mxu0 %v411_v3  ;;  %v27_v15 = vld [vmem:[%s572_s0 + $0x8] sm:$0xff]  ;;  %v427_v16 = vpack.c.bf16 %v148_v14, %v147_v13  ;;  %v29_v18 = vld [vmem:[%s572_s0 + $0x18] sm:$0xff]  ;;  %v149_v19 = vld [vmem:[%s573_s3 + $0x30] sm:$0xff] }
   0x6   :  { %416 = vmatprep.subr.bf16.mxu0 %v415_v6  ;;  %420 = vmatprep.subr.bf16.mxu1 %v419_v11  ;;  %v150_v20 = vld [vmem:[%s573_s3 + $0x38] sm:$0xff]  ;;  %v343_v22 = vld [vmem:[%s574_s2] ss:$0 sm:$0xff] }
   0x7   :  { %422 = vmatpush3.bf16.msra.mxu1 %v419_v11  ;;  %v431_v21 = vpack.c.bf16 %v150_v20, %v149_v19  ;;  %v348_v35 = vld [vmem:[%s575_s4] ss:$0 sm:$0xff] }
   0x8   :  { %424 = vmatprep.subr.bf16.mxu1 %v423_v12 }
   0x9   :  { %418 = vmatpush3.bf16.msra.mxu0 %v415_v6 }
   0xb   :  { %426 = vmatpush3.bf16.msra.mxu1 %v423_v12 }
   0xc   :  { %384 = vmatmul.mubr.msk.f32.vlgmr.msra.gmra.mrb[0].mxu0 %vm41_vm0, %v27_v15  ;;  %428 = vmatprep.subr.bf16.mxu1 %v427_v16 }
   0xd   :  { %386 = vmatprep.mubr.msk.f32.mxu0 %vm41_vm0, %v28_v17 }
   0xf   :  { %430 = vmatpush3.bf16.msra.mxu1 %v427_v16 }
  0x10   :  { %387 = vmatmul.mubr.msk.f32.gmra.mrb[2].mxu0 %vm41_vm0, %v29_v18  ;;  %432 = vmatprep.subr.bf16.mxu1 %v431_v21 }
  0x13   :  { %434 = vmatpush3.bf16.msra.mxu1 %v431_v21  ;;  %v353_v21 = vld [vmem:[%s576_s5] ss:$0 sm:$0xff] }
  0xdf   :  { %v385_v23 = vpop.f32.mrb[0].mxu0 }
  0xe0   :  { %v126_v24 = vadd.f32 %v385_v23, %v343_v22  ;;  %v120_v25 = vpop.f32.mrb[1].mxu0  ;;  %v354_v23 = vld [vmem:[%s577_s6] ss:$0 sm:$0xff] }
  0xe1   :  { %v121_v26 = vadd.f32 %v343_v22, %v120_v25 }
  0xe2   :  { %v140_v29 = vmax.f32 %v126_v24, 0.0 }
  0xe3   :  { %v139_v27 = vmax.f32 %v121_v26, 0.0  ;;  %v388_v28 = vpop.f32.mrb[2].mxu0 }
  0xe4   :  { %v136_v30 = vadd.f32 %v388_v28, %v343_v22  ;;  %v130_v31 = vpop.f32.mrb[3].mxu0 }
  0xe5   :  { %v131_v32 = vadd.f32 %v343_v22, %v130_v31  ;;  %405 = vmatprep.mubr.msk.f32.mxu1 %vm158_vm1, %v139_v27 }
  0xe6   :  { %406 = vmatmul.mubr.msk.f32.vlgmr.msra.gmra.mrb[0].mxu1 %vm158_vm1, %v140_v29  ;;  %v142_v34 = vmax.f32 %v136_v30, 0.0 }
  0xe7   :  { %v141_v33 = vmax.f32 %v131_v32, 0.0 }
  0xe9   :  { %408 = vmatprep.mubr.msk.f32.mxu1 %vm158_vm1, %v141_v33 }
  0xea   :  { %409 = vmatmul.mubr.msk.f32.gmra.mrb[2].mxu1 %vm158_vm1, %v142_v34 }
 0x1b9   :  { %v407_v36 = vpop.f32.mrb[0].mxu1 }
 0x1ba   :  { %v237_v37 = vpop.f32.mrb[1].mxu1  ;;  %v243_v38 = vadd.f32 %v407_v36, %v348_v35 }
 0x1bb   :  { %v238_v39 = vadd.f32 %v348_v35, %v237_v37 }
 0x1bc   :  { %v257_v46 = vadd.f32 %v243_v38, %v27_v15 }
 0x1bd   :  { %v410_v40 = vpop.f32.mrb[2].mxu1  ;;  %v256_v41 = vadd.f32 %v238_v39, %v26_v5 }
 0x1be   :  { %v247_v42 = vpop.f32.mrb[3].mxu1  ;;  %v253_v43 = vadd.f32 %v410_v40, %v348_v35  ;;  %v265_v49 = vsel %vm41_vm0, %v257_v46, 0.0 }
 0x1bf   :  { %v248_v44 = vadd.f32 %v348_v35, %v247_v42  ;;  %v262_v45 = vsel %vm41_vm0, %v256_v41, 0.0 }
 0x1c0   :  { %263 = vadd.xlane.f32.xlu0 %v262_v45  ;;  %v259_v50 = vadd.f32 %v253_v43, %v29_v18 }
 0x1c1   :  { %v258_v47 = vadd.f32 %v248_v44, %v28_v17 }
 0x1c2   :  { %v271_v51 = vsel %vm41_vm0, %v259_v50, 0.0 }
 0x1c3   :  { %v268_v48 = vsel %vm41_vm0, %v258_v47, 0.0 }
 0x1c4   :  { %269 = vadd.xlane.f32.xlu1 %v268_v48  ;;  %266 = vadd.xlane.f32.xlu0 %v265_v49 }
 0x1c8   :  { %272 = vadd.xlane.f32.xlu1 %v271_v51 }
 0x24d   :  { %v264_v52 = vpop.xlane.xlu0 %263 }
 0x24e   :  { %v275_v53 = vmul.f32 0.03125, %v264_v52 }
 0x250   :  { %v279_v54 = vsub.f32 %v256_v41, %v275_v53 }
 0x251   :  { %v270_v55 = vpop.xlane.xlu1 %269  ;;  %v267_v56 = vpop.xlane.xlu0 %266 }
 0x252   :  { %v277_v57 = vmul.f32 0.03125, %v270_v55  ;;  %v276_v58 = vmul.f32 0.03125, %v267_v56  ;;  %v283_v59 = vmul.f32 %v279_v54, %v279_v54 }
 0x254   :  { %v281_v60 = vsub.f32 %v258_v47, %v277_v57  ;;  %v280_v61 = vsub.f32 %v257_v46, %v276_v58  ;;  %v287_v62 = vsel %vm41_vm0, %v283_v59, 0.0 }
 0x255   :  { %v273_v63 = vpop.xlane.xlu1 %272  ;;  %288 = vadd.xlane.f32.xlu0 %v287_v62 }
 0x256   :  { %v278_v0 = vmul.f32 0.03125, %v273_v63  ;;  %v285_v1 = vmul.f32 %v281_v60, %v281_v60  ;;  %v284_v2 = vmul.f32 %v280_v61, %v280_v61 }
 0x258   :  { %v282_v3 = vsub.f32 %v259_v50, %v278_v0  ;;  %v293_v4 = vsel %vm41_vm0, %v285_v1, 0.0  ;;  %v290_v5 = vsel %vm41_vm0, %v284_v2, 0.0 }
 0x259   :  { %294 = vadd.xlane.f32.xlu0 %v293_v4  ;;  %291 = vadd.xlane.f32.xlu1 %v290_v5 }
 0x25a   :  { %v286_v6 = vmul.f32 %v282_v3, %v282_v3 }
 0x25c   :  { %v296_v7 = vsel %vm41_vm0, %v286_v6, 0.0 }
 0x25d   :  { %297 = vadd.xlane.f32.xlu1 %v296_v7 }
 0x2e2   :  { %v289_v8 = vpop.xlane.xlu0 %288 }
 0x2e3   :  { %v299_v9 = vmul.f32 0.03125, %v289_v8 }
 0x2e5   :  { %v303_v10 = vadd.f32 1e-05, %v299_v9 }
 0x2e6   :  { %v292_v11 = vpop.xlane.xlu1 %291  ;;  %v295_v12 = vpop.xlane.xlu0 %294 }
 0x2e7   :  { %435 = vrsqrt.f32 %v303_v10  ;;  %v300_v13 = vmul.f32 0.03125, %v292_v11  ;;  %v301_v14 = vmul.f32 0.03125, %v295_v12 }
 0x2e9   :  { %v304_v15 = vadd.f32 1e-05, %v300_v13  ;;  %v305_v16 = vadd.f32 1e-05, %v301_v14 }
 0x2ea   :  { %v298_v17 = vpop.xlane.xlu1 %297 }
 0x2eb   :  { %437 = vrsqrt.f32 %v304_v15  ;;  %v302_v18 = vmul.f32 0.03125, %v298_v17 }
 0x2ec   :  { %439 = vrsqrt.f32 %v305_v16 }
 0x2ed   :  { %v306_v19 = vadd.f32 1e-05, %v302_v18 }
 0x2ef   :  { %441 = vrsqrt.f32 %v306_v19 }
 0x2f1   :  { %v436_v20 = vpop.eup %435 }
 0x2f2   :  { %v311_v22 = vmul.f32 %v436_v20, %v279_v54 }
 0x2f4   :  { %v321_v24 = vmul.f32 %v353_v21, %v311_v22 }
 0x2f5   :  { %v438_v25 = vpop.eup %437 }
 0x2f6   :  { %v440_v26 = vpop.eup %439  ;;  %v331_v27 = vadd.f32 %v354_v23, %v321_v24  ;;  %v312_v28 = vmul.f32 %v438_v25, %v280_v61 }
 0x2f7   :  { %v313_v29 = vmul.f32 %v440_v26, %v281_v60 }
 0x2f8   :  { %335 = vst.msk [vmem:[%s578_s7] sm:$0xff] %vm41_vm0, %v331_v27  ;;  %v322_v30 = vmul.f32 %v353_v21, %v312_v28 }
 0x2f9   :  { %v442_v31 = vpop.eup %441  ;;  %v323_v32 = vmul.f32 %v353_v21, %v313_v29 }
 0x2fa   :  { %v332_v33 = vadd.f32 %v354_v23, %v322_v30  ;;  %v314_v34 = vmul.f32 %v442_v31, %v282_v3 }
 0x2fb   :  { %v333_v35 = vadd.f32 %v354_v23, %v323_v32 }
 0x2fc   :  { %336 = vst.msk [vmem:[%s578_s7 + $0x8] sm:$0xff] %vm41_vm0, %v332_v33  ;;  %v324_v36 = vmul.f32 %v353_v21, %v314_v34 }
 0x2fd   :  { %337 = vst.msk [vmem:[%s578_s7 + $0x10] sm:$0xff] %vm41_vm0, %v333_v35 }
 0x2fe   :  { %v334_v37 = vadd.f32 %v354_v23, %v324_v36 }
 0x300   :  { %338 = vst.msk [vmem:[%s578_s7 + $0x18] sm:$0xff] %vm41_vm0, %v334_v37 }

// kernel: time_series_transformer_forward.14
= control target key start
LH: loop header
LB: loop body
LE: loop exit
PB: predicated region body
PF: predicated region fallthrough
CT: control target
= control target key end

     0   :  { %s2261_s13 = smov 0   ;;  %s2447_s0 = inlined_call_operand.vmem [shape: f32[2,16,32], index: 0, kind: input, shape index: {}, may-alias: {0,1}]   ;;  %s2448_s1 = inlined_call_operand.vmem [shape: f32[2,16,32], index: 1, kind: input, shape index: {}, may-alias: {0,1}]   ;;  %s2449_s2 = inlined_call_operand.vmem [shape: f32[32,32], index: 2, kind: input, shape index: {}]   ;;  %s2450_s3 = inlined_call_operand.vmem [shape: f32[1,32], index: 3, kind: input, shape index: {}]   ;;  %s2451_s4 = inlined_call_operand.vmem [shape: f32[32,64], index: 4, kind: input, shape index: {}]   ;;  %s2452_s5 = inlined_call_operand.vmem [shape: f32[1,64], index: 5, kind: input, shape index: {}]   ;;  %s2453_s6 = inlined_call_operand.vmem [shape: f32[32,32], index: 6, kind: input, shape index: {}]   ;;  %s2454_s7 = inlined_call_operand.vmem [shape: f32[1,32], index: 7, kind: input, shape index: {}]   ;;  %s2455_s8 = inlined_call_operand.vmem [shape: f32[1,32], index: 8, kind: input, shape index: {}]   ;;  %s2456_s9 = inlined_call_operand.vmem [shape: f32[1,32], index: 9, kind: input, shape index: {}]   ;;  %s2457_s10 = inlined_call_operand.vmem [shape: f32[2,16,32], index: 10, kind: output, shape index: {}]  }
   0x1 LB: > { %s1832_s14 = sadd.s32 4294967295, %s2197_s13   ;;  %p1836_p0 = scmp.ge.s32.totalorder %s2197_s13, 1  ;;  %s2197_s13 = sphi %s2261_s13, %s20_s13  }
   0x2   : > { %p322_p1 = scmp.lt.s32.totalorder %s2197_s13, 3 }
   0x4   : > { %p323_p2 = pnand %p1836_p0, %p322_p1 }
   0x5   : > { %v388_v0 = vld [vmem:[%s2451_s4] sm:$0xff] (!%p323_p2)  ;;  %v389_v1 = vld [vmem:[%s2451_s4 + $0x8] sm:$0xff] (!%p323_p2)  ;;  %v390_v2 = vld [vmem:[%s2451_s4 + $0x10] sm:$0xff] (!%p323_p2)  ;;  %p365_p3 = scmp.lt.s32.totalorder (!%p323_p2), %s1832_s14, 1  ;;  %vm403_vm0 = vcmask (!%p323_p2), 261120   ;;  %vm573_vm1 = vcmask (!%p323_p2), 64512  }
   0x6   : > { %326 = sbr.rel (%p323_p2) target bundleno = 2833 (0xb11), region = 60  ;;  %v2051_v3 = vpack.c.bf16 (!%p323_p2), %v389_v1, %v388_v0  ;;  %v391_v4 = vld [vmem:[%s2451_s4 + $0x18] sm:$0xff] (!%p323_p2)  ;;  %v384_v5 = vld [vmem:[%s2449_s2] sm:$0xff] (!%p323_p2)  ;;  %v385_v6 = vld [vmem:[%s2449_s2 + $0x8] sm:$0xff] (!%p323_p2)  ;;  %s2199_s23 = smov (!%p323_p2), 120   ;;  %vm663_vm3 = vcmask (!%p323_p2), 130048  }
   0x7   : > { %v2055_v7 = vpack.c.bf16 (!%p323_p2), %v391_v4, %v390_v2  ;;  %v2043_v8 = vpack.c.bf16 (!%p323_p2), %v385_v6, %v384_v5  ;;  %v386_v9 = vld [vmem:[%s2449_s2 + $0x10] sm:$0xff] (!%p323_p2)  ;;  %v387_v10 = vld [vmem:[%s2449_s2 + $0x18] sm:$0xff] (!%p323_p2)  ;;  %v1846_v16 = vld [vmem:[%s2452_s5] ss:$0 sm:$0xff] (!%p323_p2)  ;;  %s2200_s24 = smov (!%p323_p2), 96   ;;  %s2201_s25 = smov (!%p323_p2), 112  }
   0x8   : > { %2052 = vmatprep.subr.bf16.mxu1 (!%p323_p2), %v2051_v3  ;;  %v2047_v11 = vpack.c.bf16 (!%p323_p2), %v387_v10, %v386_v9  ;;  %v1843_v18 = vld [vmem:[%s2450_s3] ss:$0 sm:$0xff] (!%p323_p2)  ;;  %vm2321_vm2 = vmpackc.low (!%p323_p2), %vm573_vm1, %vm573_vm1  ;;  %s2202_s26 = smov (!%p323_p2), 104   ;;  %s2203_s27 = smov (!%p323_p2), 88  }
   0x9   : > { %2054 = vmatpush3.bf16.msra.mxu1 (!%p323_p2), %v2051_v3  ;;  %2044 = vmatprep.subr.bf16.mxu0 (!%p323_p2), %v2043_v8  ;;  %s2204_s15 = smov (!%p323_p2), 80  }
   0xa   : > { %2056 = vmatprep.subr.bf16.mxu1 (!%p323_p2), %v2055_v7  ;;  %2046 = vmatpush3.bf16.msra.mxu0 (!%p323_p2), %v2043_v8 }
   0xb   : > { %2048 = vmatprep.subr.bf16.mxu0 (!%p323_p2), %v2047_v11 }
   0xd   : > { %s2461_s14 = smov (!%p365_p3, %s1832_s14), 1  ;;  %2058 = vmatpush3.bf16.msra.mxu1 %v2055_v7 }
   0xe   : > { %s2293_s11 = sshll.u32 %s2461_s14, 4  ;;  %2050 = vmatpush3.bf16.msra.mxu0 %v2047_v11 }
   0xf   : > { %s374_s16 = scalar_lea.vmem %s2448_s1, %s2293_s11  ;;  %s369_s19 = scalar_lea.vmem %s2447_s0, %s2293_s11 }
  0x10   : > { %v382_v12 = vld [vmem:[%s374_s16] sm:$0xff]  ;;  %v383_v14 = vld [vmem:[%s374_s16 + $0x8] sm:$0xff]  ;;  %s2205_s16 = smov 72   ;;  %s379_s28 = scalar_lea.vmem %s2457_s10, %s2293_s11 }
  0x11   : > { %1964 = vmatprep.mubr.msk.f32.mxu1 %vm403_vm0, %v382_v12  ;;  %v2304_v13 = vld [vmem:[%s369_s19] sm:$0xff]  ;;  %v2308_v15 = vld [vmem:[%s369_s19 + $0x8] sm:$0xff] }
  0x12   : > { %1953 = vmatprep.mubr.msk.f32.mxu0 %vm403_vm0, %v2304_v13  ;;  %1965 = vmatmul.mubr.msk.f32.vlgmr.msra.gmra.mrb[0].mxu1 %vm403_vm0, %v383_v14 }
  0x13   : > { %1954 = vmatmul.mubr.msk.f32.vlgmr.msra.gmra.mrb[0].mxu0 %vm403_vm0, %v2308_v15 }
  0xe5   : > { %v1966_v17 = vpop.f32.mrb[0].mxu1 }
  0xe6   : > { %v570_v19 = vadd.f32 %v1966_v17, %v1846_v16  ;;  %v564_v20 = vpop.f32.mrb[1].mxu1  ;;  %v1955_v21 = vpop.f32.mrb[0].mxu0 }
  0xe7   : > { %v565_v22 = vadd.f32 %v1846_v16, %v564_v20  ;;  %v476_v23 = vpop.f32.mrb[1].mxu0  ;;  %v2339_v28 = vadd.f32 %v1955_v21, %v1843_v18 }
  0xe8   : > { %v2325_v25 = vadd.f32 %v1843_v18, %v476_v23 }
  0xe9   : > { %v2327_v26 = vpack.i.bf16 %v570_v19, %v565_v22  ;;  %v2059_v27 = vpack.c.bf16 %v570_v19, %v565_v22 }
  0xea   : > { %1971 = vmatprep.mubr.msk.f32.mxu0 %vm573_vm1, %v2325_v25 }
  0xeb   : > { %2126 = vrot.lane.b32.xlu1 %v2327_v26, %s2199_s23  ;;  %2061 = vmatprep.subr.msk.bf16.mxu0 %vm2321_vm2, %v2059_v27 }
  0xec   : > { %2064 = vmatpush3.bf16.xpose.msk.msra.mxu0 %vm2321_vm2, %v2059_v27 }
  0xef   : > { %773 = vrot.lane.b32.xlu1 %v2325_v25, %s2199_s23 }
  0xf3   : > { %1972 = vmatmul.mubr.msk.f32.vlgmr.msra.gmra.mrb[2].mxu0 %vm573_vm1, %v2339_v28 }
 0x15d   : > { %v2127_v38 = vpop.permute.xlu1 %2126 }
 0x15e   : > { %v2129_v42 = vunpack.i.h.bf16 %v2127_v38  ;;  %v2128_v44 = vunpack.i.l.bf16 %v2127_v38 }
 0x160   : > { %v2069_v48 = vpack.c.bf16 %v2129_v42, %v2128_v44  ;;  %v392_v42 = vld [vmem:[%s2453_s6] sm:$0xff] }
 0x161   : > { %v774_v53 = vpop.permute.xlu1 %773 }
 0x1c6   : > { %v1973_v29 = vpop.f32.mrb[2].mxu0 }
 0x1c7   : > { %v652_v30 = vpop.f32.mrb[3].mxu0  ;;  %v662_v32 = vmul.f32 0.35355338, %v1973_v29 }
 0x1c8   : > { %v661_v31 = vmul.f32 0.35355338, %v652_v30 }
 0x1c9   : > { %v667_v34 = vsel %vm663_vm3, %v662_v32, -inf }
 0x1ca   : > { %v664_v33 = vsel %vm663_vm3, %v661_v31, -inf }
 0x1cb   : > { %665 = vmax.xlane.f32.xlu0 %v664_v33 }
 0x1cf   : > { %668 = vmax.xlane.f32.xlu0 %v667_v34 }
 0x1e5   : > { %2121 = vrot.lane.b32.xlu0 %v2327_v26, %s2200_s24 }
 0x258   : > { %v666_v35 = vpop.xlane.xlu0 %665 }
 0x259   : > { %v670_v36 = vsub.f32 %v661_v31, %v666_v35 }
 0x25b   : > { %v672_v40 = vmul.f32 1.442695, %v670_v36 }
 0x25c   : > { %v669_v37 = vpop.xlane.xlu0 %668 }
 0x25d   : > { %v671_v39 = vsub.f32 %v662_v32, %v669_v37 }
 0x25f   : > { %v674_v41 = vmul.f32 1.442695, %v671_v39 }
 0x260   : > { %v2122_v43 = vpop.permute.xlu0 %2121 }
 0x261   : > { %2155 = vpow2.f32 %v674_v41  ;;  %v2124_v45 = vunpack.i.h.bf16 %v2122_v43  ;;  %v2123_v46 = vunpack.i.l.bf16 %v2122_v43  ;;  %v393_v41 = vld [vmem:[%s2453_s6 + $0x8] sm:$0xff] }
 0x262   : > { %2157 = vpow2.f32 %v672_v40  ;;  %1995 = vmatprep.subr.mxu0 %v393_v41 }
 0x263   : > { %v2065_v47 = vpack.c.bf16 %v2124_v45, %v2123_v46  ;;  %1996 = vmatpush3.msra.mxu0 %v393_v41  ;;  %v1881_v41 = vld [vmem:[%s2454_s7] ss:$0 sm:$0xff] }
 0x264   : > { %2000 = vmatprep.subr.mxu0 %v392_v42 }
 0x265   : > { %2066 = vmatprep.subr.bf16.mxu1 %v2065_v47 }
 0x266   : > { %2068 = vmatpush3.bf16.msra.mxu1 %v2065_v47 }
 0x267   : > { %2071 = vmatprep.subr.msk.bf16.mxu1 %vm2321_vm2, %v2069_v48 }
 0x26b   : > { %v2156_v49 = vpop.eup %2155 }
 0x26c   : > { %v679_v50 = vsel %vm663_vm3, %v2156_v49, 0.0  ;;  %v2158_v51 = vpop.eup %2157 }
 0x26d   : > { %680 = vadd.xlane.f32.xlu1 %v679_v50  ;;  %v676_v52 = vsel %vm663_vm3, %v2158_v51, 0.0 }
 0x271   : > { %677 = vadd.xlane.f32.xlu1 %v676_v52 }
 0x282   : > { %775 = vrot.lane.b32.xlu1 %v2339_v28, %s2199_s23 }
 0x2fa   : > { %v681_v54 = vpop.xlane.xlu1 %680 }
 0x2fb   : > { %2159 = vrcp.f32 %v681_v54 }
 0x2fe   : > { %v678_v55 = vpop.xlane.xlu1 %677 }
 0x2ff   : > { %2161 = vrcp.f32 %v678_v55 }
 0x302   : > { %v776_v60 = vpop.permute.xlu1 %775 }
 0x305   : > { %v2160_v56 = vpop.eup %2159 }
 0x306   : > { %v685_v59 = vmul.f32 %v2160_v56, %v2156_v49 }
 0x309   : > { %v2162_v57 = vpop.eup %2161 }
 0x30a   : > { %v684_v58 = vmul.f32 %v2162_v57, %v2158_v51 }
 0x30c   : > { %1978 = vmatprep.mubr.msk.f32.mxu1 %vm663_vm3, %v684_v58 }
 0x30d   : > { %1979 = vmatmul.mubr.msk.f32.vlgmr.msra.gmra.mrb[2].mxu1 %vm663_vm3, %v685_v59 }
 0x30e   : > { %2074 = vmatpush3.bf16.xpose.msk.msra.mxu1 %vm2321_vm2, %v2069_v48  ;;  %1985 = vmatprep.mubr.msk.f32.mxu1 %vm573_vm1, %v774_v53 }
 0x315   : > { %1986 = vmatmul.mubr.msk.f32.vlgmr.msra.gmra.mrb[4].mxu1 %vm573_vm1, %v776_v60 }
 0x3e0   : > { %v2358_v61 = vpop.f32.mrb[2].mxu1 }
 0x3e1   : > { %v2360_v62 = vpop.f32.mrb[3].mxu1 }
 0x3e8   : > { %v1987_v63 = vpop.f32.mrb[4].mxu1 }
 0x3e9   : > { %v865_v0 = vmul.f32 0.35355338, %v1987_v63  ;;  %v855_v1 = vpop.f32.mrb[5].mxu1 }
 0x3ea   : > { %v864_v2 = vmul.f32 0.35355338, %v855_v1 }
 0x3eb   : > { %v869_v3 = vsel %vm663_vm3, %v865_v0, -inf }
 0x3ec   : > { %870 = vmax.xlane.f32.xlu1 %v869_v3  ;;  %v866_v4 = vsel %vm663_vm3, %v864_v2, -inf }
 0x3ed   : > { %867 = vmax.xlane.f32.xlu0 %v866_v4 }
 0x3fd   : > { %2136 = vrot.lane.b32.xlu1 %v2327_v26, %s2201_s25 }
 0x401   : > { %1137 = vrot.lane.b32.xlu1 %v2325_v25, %s2201_s25 }
 0x405   : > { %1139 = vrot.lane.b32.xlu1 %v2339_v28, %s2201_s25 }
 0x409   : > { %1422 = vrot.lane.b32.xlu1 %v2325_v25, %s2202_s26 }
 0x479   : > { %v871_v5 = vpop.xlane.xlu1 %870 }
 0x47a   : > { %v873_v6 = vsub.f32 %v865_v0, %v871_v5  ;;  %v868_v7 = vpop.xlane.xlu0 %867  ;;  %v394_v5 = vld [vmem:[%s2453_s6 + $0x10] sm:$0xff] }
 0x47b   : > { %v872_v8 = vsub.f32 %v864_v2, %v868_v7 }
 0x47c   : > { %v876_v9 = vmul.f32 1.442695, %v873_v6 }
 0x47d   : > { %v874_v10 = vmul.f32 1.442695, %v872_v8  ;;  %v2137_v19 = vpop.permute.xlu1 %2136 }
 0x47e   : > { %2163 = vpow2.f32 %v876_v9  ;;  %v2139_v21 = vunpack.i.h.bf16 %v2137_v19  ;;  %v2138_v22 = vunpack.i.l.bf16 %v2137_v19 }
 0x47f   : > { %2165 = vpow2.f32 %v874_v10 }
 0x480   : > { %v2079_v29 = vpack.c.bf16 %v2139_v21, %v2138_v22 }
 0x481   : > { %v1138_v34 = vpop.permute.xlu1 %1137 }
 0x485   : > { %v1140_v38 = vpop.permute.xlu1 %1139 }
 0x488   : > { %v2164_v11 = vpop.eup %2163 }
 0x489   : > { %v881_v12 = vsel %vm663_vm3, %v2164_v11, 0.0  ;;  %v2166_v14 = vpop.eup %2165  ;;  %v1423_v39 = vpop.permute.xlu1 %1422 }
 0x48a   : > { %882 = vadd.xlane.f32.xlu0 %v881_v12  ;;  %v878_v16 = vsel %vm663_vm3, %v2166_v14, 0.0 }
 0x48e   : > { %879 = vadd.xlane.f32.xlu0 %v878_v16 }
 0x4a4   : > { %2131 = vrot.lane.b32.xlu0 %v2327_v26, %s2203_s27 }
 0x4a8   : > { %2141 = vrot.lane.b32.xlu0 %v2327_v26, %s2202_s26 }
 0x4ac   : > { %1424 = vrot.lane.b32.xlu0 %v2339_v28, %s2202_s26 }
 0x517   : > { %v883_v17 = vpop.xlane.xlu0 %882 }
 0x518   : > { %2167 = vrcp.f32 %v883_v17 }
 0x51b   : > { %v880_v18 = vpop.xlane.xlu0 %879 }
 0x51c   : > { %2169 = vrcp.f32 %v880_v18 }
 0x51f   : > { %v2132_v20 = vpop.permute.xlu0 %2131 }
 0x520   : > { %v2134_v23 = vunpack.i.h.bf16 %v2132_v20  ;;  %v2133_v25 = vunpack.i.l.bf16 %v2132_v20 }
 0x522   : > { %v2075_v27 = vpack.c.bf16 %v2134_v23, %v2133_v25  ;;  %v2168_v30 = vpop.eup %2167 }
 0x523   : > { %v2142_v32 = vpop.permute.xlu0 %2141  ;;  %v887_v33 = vmul.f32 %v2168_v30, %v2164_v11 }
 0x524   : > { %2076 = vmatprep.subr.bf16.mxu1 %v2075_v27  ;;  %v2144_v35 = vunpack.i.h.bf16 %v2142_v32  ;;  %v2143_v36 = vunpack.i.l.bf16 %v2142_v32 }
 0x525   : > { %2078 = vmatpush3.bf16.msra.mxu1 %v2075_v27 }
 0x526   : > { %v2170_v31 = vpop.eup %2169  ;;  %2081 = vmatprep.subr.msk.bf16.mxu1 %vm2321_vm2, %v2079_v29  ;;  %v2089_v37 = vpack.c.bf16 %v2144_v35, %v2143_v36 }
 0x527   : > { %v886_v28 = vmul.f32 %v2170_v31, %v2166_v14  ;;  %v1425_v40 = vpop.permute.xlu0 %1424 }
 0x529   : > { %1992 = vmatprep.mubr.msk.f32.mxu1 %vm663_vm3, %v886_v28 }
 0x52a   : > { %1993 = vmatmul.mubr.msk.f32.vlgmr.msra.gmra.mrb[6].mxu1 %vm663_vm3, %v887_v33 }
 0x52b   : > { %2009 = vmatprep.mubr.msk.f32.mxu1 %vm573_vm1, %v1138_v34 }
 0x52e   : > { %2084 = vmatpush3.bf16.xpose.msk.msra.mxu1 %vm2321_vm2, %v2079_v29 }
 0x52f   : > { %2091 = vmatprep.subr.msk.bf16.mxu1 %vm2321_vm2, %v2089_v37 }
 0x535   : > { %2010 = vmatmul.mubr.msk.f32.vlgmr.msra.gmra.mrb[8].mxu1 %vm573_vm1, %v1140_v38 }
 0x536   : > { %2094 = vmatpush3.bf16.xpose.msk.msra.mxu1 %vm2321_vm2, %v2089_v37  ;;  %2028 = vmatprep.mubr.msk.f32.mxu1 %vm573_vm1, %v1423_v39  ;;  %v395_v37 = vld [vmem:[%s2453_s6 + $0x18] sm:$0xff] }
 0x53d   : > { %2029 = vmatmul.mubr.msk.f32.vlgmr.msra.gmra.mrb[10].mxu1 %vm573_vm1, %v1425_v40 }
 0x5fd   : > { %v1994_v43 = vpop.f32.mrb[6].mxu1 }
 0x5fe   : > { %v966_v44 = vpop.f32.mrb[7].mxu1 }
 0x5ff   : > { %1997 = vmatprep.mubr.msk.f32.mxu0 %vm573_vm1, %v966_v44 }
 0x600   : > { %1998 = vmatmul.mubr.msk.f32.vlgmr.msra.gmra.mrb[4].mxu0 %vm573_vm1, %v1994_v43 }
 0x601   : > { %2002 = vmatprep.mubr.msk.f32.mxu0 %vm573_vm1, %v2360_v62  ;;  %2001 = vmatpush3.msra.mxu0 %v392_v42 }
 0x608   : > { %2003 = vmatmul.mubr.msk.f32.vlgmr.msra.gmra.mrb[4].mxu0 %vm573_vm1, %v2358_v61  ;;  %v2011_v24 = vpop.f32.mrb[8].mxu1 }
 0x609   : > { %v1229_v45 = vmul.f32 0.35355338, %v2011_v24  ;;  %v1219_v46 = vpop.f32.mrb[9].mxu1 }
 0x60a   : > { %v1228_v47 = vmul.f32 0.35355338, %v1219_v46 }
 0x60b   : > { %v1233_v48 = vsel %vm663_vm3, %v1229_v45, -inf }
 0x60c   : > { %1234 = vmax.xlane.f32.xlu0 %v1233_v48  ;;  %v1230_v49 = vsel %vm663_vm3, %v1228_v47, -inf }
 0x60d   : > { %1231 = vmax.xlane.f32.xlu1 %v1230_v49 }
 0x610   : > { %v2030_v50 = vpop.f32.mrb[10].mxu1 }
 0x611   : > { %v1504_v51 = vpop.f32.mrb[11].mxu1  ;;  %v1514_v2 = vmul.f32 0.35355338, %v2030_v50 }
 0x613   : > { %v1518_v4 = vsel %vm663_vm3, %v1514_v2, -inf }
 0x61e   : > { %2146 = vrot.lane.b32.xlu1 %v2327_v26, %s2204_s15 }
 0x622   : > { %2151 = vrot.lane.b32.xlu1 %v2327_v26, %s2205_s16  ;;  %v1513_v26 = vmul.f32 0.35355338, %v1504_v51 }
 0x624   : > { %v1515_v3 = vsel %vm663_vm3, %v1513_v26, -inf }
 0x699   : > { %v1235_v52 = vpop.xlane.xlu0 %1234 }
 0x69a   : > { %v1237_v53 = vsub.f32 %v1229_v45, %v1235_v52  ;;  %v1232_v54 = vpop.xlane.xlu1 %1231 }
 0x69b   : > { %v1236_v55 = vsub.f32 %v1228_v47, %v1232_v54 }
 0x69c   : > { %v1240_v56 = vmul.f32 1.442695, %v1237_v53 }
 0x69d   : > { %v1238_v57 = vmul.f32 1.442695, %v1236_v55 }
 0x69e   : > { %v2147_v58 = vpop.permute.xlu1 %2146 }
 0x69f   : > { %2171 = vpow2.f32 %v1238_v57  ;;  %v2149_v59 = vunpack.i.h.bf16 %v2147_v58  ;;  %v2148_v60 = vunpack.i.l.bf16 %v2147_v58 }
 0x6a0   : > { %2173 = vpow2.f32 %v1240_v56 }
 0x6a1   : > { %v2085_v61 = vpack.c.bf16 %v2149_v59, %v2148_v60 }
 0x6a2   : > { %v2152_v11 = vpop.permute.xlu1 %2151 }
 0x6a3   : > { %2086 = vmatprep.subr.bf16.mxu0 %v2085_v61  ;;  %v2154_v18 = vunpack.i.h.bf16 %v2152_v11  ;;  %v2153_v19 = vunpack.i.l.bf16 %v2152_v11 }
 0x6a4   : > { %2088 = vmatpush3.bf16.msra.mxu0 %v2085_v61 }
 0x6a5   : > { %2019 = vmatprep.subr.mxu0 %v394_v5  ;;  %v2095_v23 = vpack.c.bf16 %v2154_v18, %v2153_v19 }
 0x6a9   : > { %v2172_v62 = vpop.eup %2171 }
 0x6aa   : > { %v1242_v63 = vsel %vm663_vm3, %v2172_v62, 0.0  ;;  %v2174_v0 = vpop.eup %2173 }
 0x6ab   : > { %1243 = vadd.xlane.f32.xlu0 %v1242_v63  ;;  %v1245_v1 = vsel %vm663_vm3, %v2174_v0, 0.0 }
 0x6af   : > { %1246 = vadd.xlane.f32.xlu0 %v1245_v1  ;;  %v1883_v1 = vld [vmem:[%s2456_s9] ss:$0 sm:$0xff] }
 0x6b3   : > { %1516 = vmax.xlane.f32.xlu0 %v1515_v3 }
 0x6b7   : > { %1519 = vmax.xlane.f32.xlu0 %v1518_v4 }
 0x738   : > { %v1244_v6 = vpop.xlane.xlu0 %1243 }
 0x739   : > { %2175 = vrcp.f32 %v1244_v6 }
 0x73c   : > { %v1247_v7 = vpop.xlane.xlu0 %1246 }
 0x73d   : > { %2177 = vrcp.f32 %v1247_v7 }
 0x740   : > { %v1517_v8 = vpop.xlane.xlu0 %1516 }
 0x741   : > { %v1521_v9 = vsub.f32 %v1513_v26, %v1517_v8 }
 0x743   : > { %v2176_v10 = vpop.eup %2175  ;;  %v1523_v12 = vmul.f32 1.442695, %v1521_v9 }
 0x744   : > { %v1520_v14 = vpop.xlane.xlu0 %1519  ;;  %v1250_v16 = vmul.f32 %v2176_v10, %v2172_v62 }
 0x745   : > { %2179 = vpow2.f32 %v1523_v12  ;;  %v1522_v17 = vsub.f32 %v1514_v2, %v1520_v14 }
 0x746   : > { %2016 = vmatprep.mubr.msk.f32.mxu0 %vm663_vm3, %v1250_v16 }
 0x747   : > { %v2178_v20 = vpop.eup %2177  ;;  %v1525_v21 = vmul.f32 1.442695, %v1522_v17 }
 0x748   : > { %v1251_v22 = vmul.f32 %v2178_v20, %v2174_v0  ;;  %v1882_v0 = vld [vmem:[%s2455_s8] ss:$0 sm:$0xff] }
 0x749   : > { %2181 = vpow2.f32 %v1525_v21 }
 0x74a   : > { %2017 = vmatmul.mubr.msk.f32.vlgmr.msra.gmra.mrb[6].mxu0 %vm663_vm3, %v1251_v22 }
 0x74b   : > { %2020 = vmatpush3.msra.mxu0 %v394_v5 }
 0x74c   : > { %2096 = vmatprep.subr.bf16.mxu0 %v2095_v23 }
 0x74f   : > { %v2180_v25 = vpop.eup %2179 }
 0x750   : > { %v1527_v27 = vsel %vm663_vm3, %v2180_v25, 0.0 }
 0x751   : > { %1528 = vadd.xlane.f32.xlu0 %v1527_v27 }
 0x753   : > { %v2182_v29 = vpop.eup %2181 }
 0x754   : > { %v1530_v30 = vsel %vm663_vm3, %v2182_v29, 0.0 }
 0x755   : > { %1531 = vadd.xlane.f32.xlu0 %v1530_v30 }
 0x7de   : > { %v1529_v31 = vpop.xlane.xlu0 %1528 }
 0x7df   : > { %2183 = vrcp.f32 %v1529_v31 }
 0x7e2   : > { %v1532_v32 = vpop.xlane.xlu0 %1531 }
 0x7e3   : > { %2185 = vrcp.f32 %v1532_v32 }
 0x7e9   : > { %v2184_v28 = vpop.eup %2183 }
 0x7ea   : > { %v1535_v36 = vmul.f32 %v2184_v28, %v2180_v25 }
 0x7ed   : > { %v2186_v35 = vpop.eup %2185 }
 0x7ee   : > { %v1536_v38 = vmul.f32 %v2186_v35, %v2182_v29 }
 0x81d   : > { %v2018_v33 = vpop.f32.mrb[6].mxu0 }
 0x81e   : > { %v1330_v34 = vpop.f32.mrb[7].mxu0 }
 0x81f   : > { %2021 = vmatprep.mubr.msk.f32.mxu0 %vm573_vm1, %v1330_v34 }
 0x820   : > { %2022 = vmatmul.mubr.msk.f32.vlgmr.msra.gmra.mrb[4].mxu0 %vm573_vm1, %v2018_v33 }
 0x821   : > { %2098 = vmatpush3.bf16.msra.mxu0 %v2095_v23  ;;  %2035 = vmatprep.mubr.msk.f32.mxu0 %vm663_vm3, %v1535_v36 }
 0x822   : > { %2038 = vmatprep.subr.mxu0 %v395_v37 }
 0x824   : > { %2036 = vmatmul.mubr.msk.f32.vlgmr.msra.gmra.mrb[8].mxu0 %vm663_vm3, %v1536_v38 }
 0x825   : > { %2039 = vmatpush3.msra.mxu0 %v395_v37 }
 0x8f7   : > { %v2037_v39 = vpop.f32.mrb[8].mxu0 }
 0x8f8   : > { %v1615_v40 = vpop.f32.mrb[9].mxu0 }
 0x8f9   : > { %2040 = vmatprep.mubr.msk.f32.mxu0 %vm573_vm1, %v1615_v40 }
 0x8fa   : > { %2041 = vmatmul.mubr.msk.f32.vlgmr.msra.gmra.mrb[4].mxu0 %vm573_vm1, %v2037_v39 }
 0x9cd   : > { %v2042_v42 = vpop.f32.mrb[4].mxu0 }
 0x9ce   : > { %v1715_v43 = vadd.f32 %v2042_v42, %v1881_v41  ;;  %v1696_v44 = vpop.f32.mrb[5].mxu0 }
 0x9cf   : > { %v1714_v24 = vadd.f32 %v1881_v41, %v1696_v44 }
 0x9d0   : > { %v1717_v45 = vadd.f32 %v1715_v43, %v2308_v15 }
 0x9d1   : > { %v1716_v46 = vadd.f32 %v1714_v24, %v2304_v13 }
 0x9d2   : > { %v1723_v47 = vsel %vm403_vm0, %v1717_v45, 0.0 }
 0x9d3   : > { %1724 = vadd.xlane.f32.xlu1 %v1723_v47  ;;  %v1720_v48 = vsel %vm403_vm0, %v1716_v46, 0.0 }
 0x9d4   : > { %1721 = vadd.xlane.f32.xlu0 %v1720_v48 }
 0xa60   : > { %v1725_v49 = vpop.xlane.xlu1 %1724 }
 0xa61   : > { %v1728_v50 = vmul.f32 0.03125, %v1725_v49  ;;  %v1722_v51 = vpop.xlane.xlu0 %1721 }
 0xa62   : > { %v1727_v52 = vmul.f32 0.03125, %v1722_v51 }
 0xa63   : > { %v1730_v53 = vsub.f32 %v1717_v45, %v1728_v50 }
 0xa64   : > { %v1729_v54 = vsub.f32 %v1716_v46, %v1727_v52 }
 0xa65   : > { %v1732_v57 = vmul.f32 %v1730_v53, %v1730_v53 }
 0xa66   : > { %v1731_v55 = vmul.f32 %v1729_v54, %v1729_v54 }
 0xa67   : > { %v1736_v15 = vsel %vm403_vm0, %v1732_v57, 0.0 }
 0xa68   : > { %v1733_v56 = vsel %vm403_vm0, %v1731_v55, 0.0 }
 0xa69   : > { %1734 = vadd.xlane.f32.xlu0 %v1733_v56 }
 0xa6d   : > { %1737 = vadd.xlane.f32.xlu0 %v1736_v15 }
 0xaf6   : > { %v1735_v13 = vpop.xlane.xlu0 %1734 }
 0xaf7   : > { %v1739_v58 = vmul.f32 0.03125, %v1735_v13 }
 0xaf9   : > { %v1741_v59 = vadd.f32 1e-05, %v1739_v58 }
 0xafa   : > { %v1738_v60 = vpop.xlane.xlu0 %1737 }
 0xafb   : > { %2187 = vrsqrt.f32 %v1741_v59  ;;  %v1740_v61 = vmul.f32 0.03125, %v1738_v60 }
 0xafd   : > { %v1742_v62 = vadd.f32 1e-05, %v1740_v61 }
 0xaff   : > { %2189 = vrsqrt.f32 %v1742_v62 }
 0xb05   : > { %v2188_v63 = vpop.eup %2187 }
 0xb06   : > { %v1745_v26 = vmul.f32 %v2188_v63, %v1729_v54 }
 0xb08   : > { %v1753_v2 = vmul.f32 %v1882_v0, %v1745_v26 }
 0xb09   : > { %v2190_v3 = vpop.eup %2189 }
 0xb0a   : > { %v1761_v4 = vadd.f32 %v1883_v1, %v1753_v2  ;;  %v1746_v5 = vmul.f32 %v2190_v3, %v1730_v53 }
 0xb0c   : > { %1763 = vst.msk [vmem:[%s379_s28] sm:$0xff] %vm403_vm0, %v1761_v4  ;;  %v1754_v6 = vmul.f32 %v1882_v0, %v1746_v5 }
 0xb0e   : > { %v1762_v7 = vadd.f32 %v1883_v1, %v1754_v6 }
 0xb10   : > { %1764 = vst.msk [vmem:[%s379_s28 + $0x8] sm:$0xff] %vm403_vm0, %v1762_v7 }
 0xb11 PF: > { %s20_s13 = sadd.s32 1, %s2197_s13  }
 0xb12   : > { %p17_p4 = scmp.ge.s32.totalorder %s20_s13, 4  }
 0xb14   :  { %19 = sbr.rel (!%p17_p4) target bundleno = 1 (0x1), region = 93 }

// kernel: time_series_transformer_forward.21
= control target key start
LH: loop header
LB: loop body
LE: loop exit
PB: predicated region body
PF: predicated region fallthrough
CT: control target
= control target key end

     0   :  { %vm39_vm0 = vcmask 261120   ;;  %vm138_vm1 = vcmask 523264   ;;  %s463_s1 = inlined_call_operand.vmem [shape: f32[32,64], index: 1, kind: input, shape index: {}]   ;;  %s464_s0 = inlined_call_operand.vmem [shape: f32[16,32], index: 0, kind: input, shape index: {}]   ;;  %s465_s3 = inlined_call_operand.vmem [shape: f32[64,32], index: 3, kind: input, shape index: {}]   ;;  %s466_s2 = inlined_call_operand.vmem [shape: f32[1,64], index: 2, kind: input, shape index: {}]   ;;  %s467_s4 = inlined_call_operand.vmem [shape: f32[1,32], index: 4, kind: input, shape index: {}]   ;;  %s468_s5 = inlined_call_operand.vmem [shape: f32[1,32], index: 5, kind: input, shape index: {}]   ;;  %s469_s6 = inlined_call_operand.vmem [shape: f32[1,32], index: 6, kind: input, shape index: {}]   ;;  %s470_s7 = inlined_call_operand.vmem [shape: f32[16,32], index: 7, kind: output, shape index: {}]  }
   0x1   :  { %v28_v0 = vld [vmem:[%s463_s1] sm:$0xff]  ;;  %v29_v1 = vld [vmem:[%s463_s1 + $0x8] sm:$0xff]  ;;  %v30_v2 = vld [vmem:[%s463_s1 + $0x10] sm:$0xff] }
   0x2   :  { %v327_v3 = vpack.c.bf16 %v29_v1, %v28_v0  ;;  %v31_v4 = vld [vmem:[%s463_s1 + $0x18] sm:$0xff]  ;;  %v26_v5 = vld [vmem:[%s464_s0] sm:$0xff]  ;;  %v124_v8 = vld [vmem:[%s465_s3 + $0x8] sm:$0xff] }
   0x3   :  { %v331_v6 = vpack.c.bf16 %v31_v4, %v30_v2  ;;  %305 = vmatprep.mubr.msk.f32.mxu0 %vm39_vm0, %v26_v5  ;;  %v123_v7 = vld [vmem:[%s465_s3] sm:$0xff]  ;;  %v125_v9 = vld [vmem:[%s465_s3 + $0x10] sm:$0xff]  ;;  %v126_v11 = vld [vmem:[%s465_s3 + $0x18] sm:$0xff] }
   0x4   :  { %328 = vmatprep.subr.bf16.mxu0 %v327_v3  ;;  %v335_v10 = vpack.c.bf16 %v124_v8, %v123_v7  ;;  %v339_v12 = vpack.c.bf16 %v126_v11, %v125_v9  ;;  %v127_v13 = vld [vmem:[%s465_s3 + $0x20] sm:$0xff]  ;;  %v128_v14 = vld [vmem:[%s465_s3 + $0x28] sm:$0xff]  ;;  %v129_v17 = vld [vmem:[%s465_s3 + $0x30] sm:$0xff] }
   0x5   :  { %330 = vmatpush3.bf16.msra.mxu0 %v327_v3  ;;  %v343_v15 = vpack.c.bf16 %v128_v14, %v127_v13  ;;  %v27_v16 = vld [vmem:[%s464_s0 + $0x8] sm:$0xff]  ;;  %v130_v18 = vld [vmem:[%s465_s3 + $0x38] sm:$0xff]  ;;  %v273_v20 = vld [vmem:[%s466_s2] ss:$0 sm:$0xff] }
   0x6   :  { %332 = vmatprep.subr.bf16.mxu0 %v331_v6  ;;  %336 = vmatprep.subr.bf16.mxu1 %v335_v10  ;;  %v347_v19 = vpack.c.bf16 %v130_v18, %v129_v17  ;;  %v276_v27 = vld [vmem:[%s467_s4] ss:$0 sm:$0xff] }
   0x7   :  { %338 = vmatpush3.bf16.msra.mxu1 %v335_v10  ;;  %v279_v53 = vld [vmem:[%s468_s5] ss:$0 sm:$0xff] }
   0x8   :  { %340 = vmatprep.subr.bf16.mxu1 %v339_v12  ;;  %v280_v55 = vld [vmem:[%s469_s6] ss:$0 sm:$0xff] }
   0x9   :  { %334 = vmatpush3.bf16.msra.mxu0 %v331_v6 }
   0xb   :  { %342 = vmatpush3.bf16.msra.mxu1 %v339_v12 }
   0xc   :  { %306 = vmatmul.mubr.msk.f32.vlgmr.msra.gmra.mrb[0].mxu0 %vm39_vm0, %v27_v16  ;;  %344 = vmatprep.subr.bf16.mxu1 %v343_v15 }
   0xf   :  { %346 = vmatpush3.bf16.msra.mxu1 %v343_v15 }
  0x10   :  { %348 = vmatprep.subr.bf16.mxu1 %v347_v19 }
  0x13   :  { %350 = vmatpush3.bf16.msra.mxu1 %v347_v19 }
  0xdf   :  { %v307_v21 = vpop.f32.mrb[0].mxu0 }
  0xe0   :  { %v118_v22 = vadd.f32 %v307_v21, %v273_v20  ;;  %v112_v23 = vpop.f32.mrb[1].mxu0 }
  0xe1   :  { %v113_v24 = vadd.f32 %v273_v20, %v112_v23 }
  0xe2   :  { %v122_v26 = vmax.f32 %v118_v22, 0.0 }
  0xe3   :  { %v121_v25 = vmax.f32 %v113_v24, 0.0 }
  0xe5   :  { %324 = vmatprep.mubr.msk.f32.mxu1 %vm138_vm1, %v121_v25 }
  0xe6   :  { %325 = vmatmul.mubr.msk.f32.vlgmr.msra.gmra.mrb[0].mxu1 %vm138_vm1, %v122_v26 }
 0x1b9   :  { %v326_v28 = vpop.f32.mrb[0].mxu1 }
 0x1ba   :  { %v211_v29 = vpop.f32.mrb[1].mxu1  ;;  %v217_v30 = vadd.f32 %v326_v28, %v276_v27 }
 0x1bb   :  { %v212_v31 = vadd.f32 %v276_v27, %v211_v29 }
 0x1bc   :  { %v221_v34 = vadd.f32 %v217_v30, %v27_v16 }
 0x1bd   :  { %v220_v32 = vadd.f32 %v212_v31, %v26_v5 }
 0x1be   :  { %v227_v35 = vsel %vm39_vm0, %v221_v34, 0.0 }
 0x1bf   :  { %v224_v33 = vsel %vm39_vm0, %v220_v32, 0.0 }
 0x1c0   :  { %225 = vadd.xlane.f32.xlu0 %v224_v33 }
 0x1c4   :  { %228 = vadd.xlane.f32.xlu0 %v227_v35 }
 0x24d   :  { %v226_v36 = vpop.xlane.xlu0 %225 }
 0x24e   :  { %v231_v37 = vmul.f32 0.03125, %v226_v36 }
 0x250   :  { %v233_v38 = vsub.f32 %v220_v32, %v231_v37 }
 0x251   :  { %v229_v39 = vpop.xlane.xlu0 %228 }
 0x252   :  { %v232_v40 = vmul.f32 0.03125, %v229_v39  ;;  %v235_v41 = vmul.f32 %v233_v38, %v233_v38 }
 0x254   :  { %v234_v42 = vsub.f32 %v221_v34, %v232_v40  ;;  %v237_v43 = vsel %vm39_vm0, %v235_v41, 0.0 }
 0x255   :  { %238 = vadd.xlane.f32.xlu1 %v237_v43 }
 0x256   :  { %v236_v44 = vmul.f32 %v234_v42, %v234_v42 }
 0x258   :  { %v240_v45 = vsel %vm39_vm0, %v236_v44, 0.0 }
 0x259   :  { %241 = vadd.xlane.f32.xlu1 %v240_v45 }
 0x2e2   :  { %v239_v46 = vpop.xlane.xlu1 %238 }
 0x2e3   :  { %v243_v47 = vmul.f32 0.03125, %v239_v46 }
 0x2e5   :  { %v245_v48 = vadd.f32 1e-05, %v243_v47 }
 0x2e6   :  { %v242_v49 = vpop.xlane.xlu1 %241 }
 0x2e7   :  { %351 = vrsqrt.f32 %v245_v48  ;;  %v244_v50 = vmul.f32 0.03125, %v242_v49 }
 0x2e9   :  { %v246_v51 = vadd.f32 1e-05, %v244_v50 }
 0x2eb   :  { %353 = vrsqrt.f32 %v246_v51 }
 0x2f1   :  { %v352_v52 = vpop.eup %351 }
 0x2f2   :  { %v249_v54 = vmul.f32 %v352_v52, %v233_v38 }
 0x2f4   :  { %v257_v56 = vmul.f32 %v279_v53, %v249_v54 }
 0x2f5   :  { %v354_v57 = vpop.eup %353 }
 0x2f6   :  { %v265_v58 = vadd.f32 %v280_v55, %v257_v56  ;;  %v250_v59 = vmul.f32 %v354_v57, %v234_v42 }
 0x2f8   :  { %267 = vst.msk [vmem:[%s470_s7] sm:$0xff] %vm39_vm0, %v265_v58  ;;  %v258_v60 = vmul.f32 %v279_v53, %v250_v59 }
 0x2fa   :  { %v266_v61 = vadd.f32 %v280_v55, %v258_v60 }
 0x2fc   :  { %268 = vst.msk [vmem:[%s470_s7 + $0x8] sm:$0xff] %vm39_vm0, %v266_v61 }

// kernel: time_series_transformer_forward.19
= control target key start
LH: loop header
LB: loop body
LE: loop exit
PB: predicated region body
PF: predicated region fallthrough
CT: control target
= control target key end

     0   :  { %s1916_s17 = smov 0   ;;  %s2090_s0 = inlined_call_operand.vmem [shape: f32[2,8,32], index: 0, kind: input, shape index: {}, may-alias: {0,1}]   ;;  %s2091_s1 = inlined_call_operand.vmem [shape: f32[2,8,32], index: 1, kind: input, shape index: {}, may-alias: {0,1}]   ;;  %s2092_s2 = inlined_call_operand.vmem [shape: f32[32,32], index: 2, kind: input, shape index: {}]   ;;  %s2093_s3 = inlined_call_operand.vmem [shape: f32[1,32], index: 3, kind: input, shape index: {}]   ;;  %s2094_s4 = inlined_call_operand.vmem [shape: f32[32,64], index: 4, kind: input, shape index: {}]   ;;  %s2095_s5 = inlined_call_operand.vmem [shape: f32[1,64], index: 5, kind: input, shape index: {}]   ;;  %s2096_s6 = inlined_call_operand.vmem [shape: f32[32,32], index: 6, kind: input, shape index: {}]   ;;  %s2097_s7 = inlined_call_operand.vmem [shape: f32[1,32], index: 7, kind: input, shape index: {}]   ;;  %s2098_s8 = inlined_call_operand.vmem [shape: f32[1,32], index: 8, kind: input, shape index: {}]   ;;  %s2099_s9 = inlined_call_operand.vmem [shape: f32[1,32], index: 9, kind: input, shape index: {}]   ;;  %s2100_s10 = inlined_call_operand.vmem [shape: f32[8,8], index: 10, kind: input, shape index: {}]   ;;  %s2101_s11 = inlined_call_operand.vmem [shape: f32[2,8,32], index: 11, kind: output, shape index: {}]  }
   0x1 LB: > { %s1641_s18 = sadd.s32 4294967295, %s1844_s17   ;;  %p1645_p0 = scmp.ge.s32.totalorder %s1844_s17, 1  ;;  %s1844_s17 = sphi %s1916_s17, %s21_s17  }
   0x2   : > { %p345_p1 = scmp.lt.s32.totalorder %s1844_s17, 3 }
   0x4   : > { %p346_p2 = pnand %p1645_p0, %p345_p1 }
   0x5   : > { %v405_v0 = vld [vmem:[%s2094_s4] sm:$0xff] (!%p346_p2)  ;;  %v406_v1 = vld [vmem:[%s2094_s4 + $0x8] sm:$0xff] (!%p346_p2)  ;;  %v1846_v3 = vmov (!%p346_p2), 0.0|0.0   ;;  %v407_v6 = vld [vmem:[%s2094_s4 + $0x10] sm:$0xff] (!%p346_p2)  ;;  %p387_p3 = scmp.lt.s32.totalorder (!%p346_p2), %s1641_s18, 1  ;;  %vm1847_vm0 = vmmov (!%p346_p2), 0  }
   0x6   : > { %349 = sbr.rel (%p346_p2) target bundleno = 2904 (0xb58), region = 64  ;;  %v401_v2 = vld [vmem:[%s2092_s2] sm:$0xff] (!%p346_p2)  ;;  %1796 = vmatprep.subr.bf16.mxu1 (!%p346_p2), %v1846_v3  ;;  %v1797_v4 = vpack.c.bf16 (!%p346_p2), %v406_v1, %v405_v0  ;;  %1790 = vmatprep.subr.bf16.mxu0 (!%p346_p2), %v1846_v3  ;;  %v402_v5 = vld [vmem:[%s2092_s2 + $0x8] sm:$0xff] (!%p346_p2)  ;;  %v408_v7 = vld [vmem:[%s2094_s4 + $0x18] sm:$0xff] (!%p346_p2)  ;;  %v1848_v9 = vmov (!%p346_p2), 0.0   ;;  %vm420_vm1 = vcmask (!%p346_p2), 261120  }
   0x7   : > { %v1791_v8 = vpack.c.bf16 (!%p346_p2), %v402_v5, %v401_v2  ;;  %1727 = vmatprep.mubr.msk.f32.mxu1 (!%p346_p2), %vm1847_vm0, %v1848_v9  ;;  %v403_v10 = vld [vmem:[%s2092_s2 + $0x10] sm:$0xff] (!%p346_p2)  ;;  %v404_v11 = vld [vmem:[%s2092_s2 + $0x18] sm:$0xff] (!%p346_p2)  ;;  %1716 = vmatprep.mubr.msk.f32.mxu0 (!%p346_p2), %vm1847_vm0, %v1848_v9  ;;  %v1800_v12 = vpack.c.bf16 (!%p346_p2), %v408_v7, %v407_v6  ;;  %v1651_v16 = vld [vmem:[%s2095_s5] ss:$0 sm:$0xff] (!%p346_p2)  ;;  %vm574_vm2 = vcmask (!%p346_p2), 64512   ;;  %s1849_s28 = smov (!%p346_p2), 120  }
   0x8   : > { %1798 = vmatpush3.bf16.msra.mxu1 (!%p346_p2), %v1797_v4  ;;  %v1794_v13 = vpack.c.bf16 (!%p346_p2), %v404_v11, %v403_v10  ;;  %v1649_v17 = vld [vmem:[%s2093_s3] ss:$0 sm:$0xff] (!%p346_p2)  ;;  %s1850_s12 = smov (!%p346_p2), 96   ;;  %s1851_s13 = smov (!%p346_p2), 88   ;;  %v410_v51 = vld [vmem:[%s2096_s6 + $0x8] sm:$0xff] (!%p346_p2) }
   0x9   : > { %1792 = vmatpush3.bf16.msra.mxu0 (!%p346_p2), %v1791_v8  ;;  %1799 = vmatprep.subr.bf16.mxu1 (!%p346_p2), %v1846_v3  ;;  %v2000_v27 = vld [vmem:[%s2100_s10] sm:$0xff] (!%p346_p2)  ;;  %s1852_s14 = smov (!%p346_p2), 112   ;;  %s1853_s22 = smov (!%p346_p2), 80  }
   0xa   : > { %1793 = vmatprep.subr.bf16.mxu0 (!%p346_p2), %v1846_v3  ;;  %v409_v56 = vld [vmem:[%s2096_s6] sm:$0xff] (!%p346_p2)  ;;  %s1854_s23 = smov (!%p346_p2), 104   ;;  %s1855_s25 = smov (!%p346_p2), 72  }
   0xc   : > { %1801 = vmatpush3.bf16.msra.mxu1 (!%p346_p2), %v1800_v12 }
   0xd   : > { %s2103_s18 = smov (!%p387_p3, %s1641_s18), 1  ;;  %1795 = vmatpush3.bf16.msra.mxu0 %v1794_v13  ;;  %1735 = vmatprep.subr.mxu1 %v1848_v9 }
   0xe   : > { %s1952_s16 = sshll.u32 %s2103_s18, 3  ;;  %1730 = vmatprep.subr.mxu0 %v1848_v9 }
   0xf   : > { %s394_s21 = scalar_lea.vmem %s2091_s1, %s1952_s16  ;;  %s390_s24 = scalar_lea.vmem %s2090_s0, %s1952_s16 }
  0x10   : > { %v400_v14 = vld [vmem:[%s394_s21] sm:$0xff]  ;;  %s398_s20 = scalar_lea.vmem %s2101_s11, %s1952_s16 }
  0x11   : > { %v1962_v15 = vld [vmem:[%s390_s24] sm:$0xff]  ;;  %1728 = vmatmul.mubr.msk.f32.vlgmr.msra.gmra.mrb[0].mxu1 %vm420_vm1, %v400_v14 }
  0x12   : > { %1717 = vmatmul.mubr.msk.f32.vlgmr.msra.gmra.mrb[0].mxu0 %vm420_vm1, %v1962_v15  ;;  %1737 = vmatprep.mubr.msk.f32.mxu1 %vm1847_vm0, %v1848_v9 }
  0x13   : > { %1732 = vmatprep.mubr.msk.f32.mxu0 %vm1847_vm0, %v1848_v9 }
  0xe4   : > { %v570_v18 = vpop.f32.mrb[0].mxu1 }
  0xe5   : > { %v1979_v19 = vadd.f32 %v1651_v16, %v570_v18  ;;  %v1729_v20 = vpop.f32.mrb[1].mxu1  ;;  %v490_v21 = vpop.f32.mrb[0].mxu0 }
  0xe6   : > { %v1981_v22 = vadd.f32 %v1649_v17, %v490_v21  ;;  %v1718_v23 = vpop.f32.mrb[1].mxu0 }
  0xe7   : > { %743 = vrot.lane.b32.xlu0 %v1979_v19, %s1849_s28  ;;  %1731 = vmatpush3.xpose.msk.msra.mxu0 %vm574_vm2, %v1979_v19  ;;  %v411_v23 = vld [vmem:[%s2096_s6 + $0x10] sm:$0xff] }
  0xe8   : > { %1740 = vmatprep.subr.mxu0 %v1848_v9 }
  0xea   : > { %1733 = vmatmul.mubr.msk.f32.vlgmr.msra.gmra.mrb[2].mxu0 %vm574_vm2, %v1981_v22 }
  0xeb   : > { %741 = vrot.lane.b32.xlu0 %v1981_v22, %s1849_s28  ;;  %1742 = vmatprep.mubr.msk.f32.mxu0 %vm1847_vm0, %v1848_v9 }
 0x159   : > { %v744_v24 = vpop.permute.xlu0 %743 }
 0x15a   : > { %1741 = vmatpush3.xpose.msk.msra.mxu0 %vm574_vm2, %v744_v24 }
 0x15b   : > { %1750 = vmatprep.subr.mxu0 %v1848_v9 }
 0x15d   : > { %v742_v25 = vpop.permute.xlu0 %741 }
 0x15e   : > { %1743 = vmatmul.mubr.msk.f32.vlgmr.msra.gmra.mrb[4].mxu0 %vm574_vm2, %v742_v25 }
 0x15f   : > { %1752 = vmatprep.mubr.msk.f32.mxu0 %vm1847_vm0, %v1848_v9  ;;  %1751 = vmatpush3.msra.mxu0 %v410_v51 }
 0x160   : > { %1760 = vmatprep.subr.mxu0 %v1848_v9 }
 0x1bd   : > { %v647_v26 = vpop.f32.mrb[2].mxu0 }
 0x1be   : > { %v651_v28 = vmul.f32 0.35355338, %v647_v26  ;;  %v1734_v29 = vpop.f32.mrb[3].mxu0 }
 0x1c0   : > { %v653_v30 = vadd.f32 %v2000_v27, %v651_v28 }
 0x1c2   : > { %v654_v31 = vsel %vm574_vm2, %v653_v30, -inf }
 0x1c3   : > { %655 = vmax.xlane.f32.xlu1 %v654_v31 }
 0x231   : > { %v815_v32 = vpop.f32.mrb[4].mxu0 }
 0x232   : > { %v819_v33 = vmul.f32 0.35355338, %v815_v32  ;;  %v1744_v34 = vpop.f32.mrb[5].mxu0 }
 0x234   : > { %v820_v35 = vadd.f32 %v819_v33, %v2000_v27 }
 0x236   : > { %v821_v36 = vsel %vm574_vm2, %v820_v35, -inf }
 0x237   : > { %822 = vmax.xlane.f32.xlu1 %v821_v36 }
 0x248   : > { %665 = vrot.lane.b32.xlu1 %v1979_v19, %s1850_s12 }
 0x250   : > { %v656_v37 = vpop.xlane.xlu1 %655 }
 0x251   : > { %v657_v38 = vsub.f32 %v653_v30, %v656_v37 }
 0x253   : > { %v658_v39 = vmul.f32 1.442695, %v657_v38 }
 0x255   : > { %1820 = vpow2.f32 %v658_v39 }
 0x25f   : > { %v1821_v40 = vpop.eup %1820 }
 0x260   : > { %v660_v41 = vsel %vm574_vm2, %v1821_v40, 0.0 }
 0x261   : > { %661 = vadd.xlane.f32.xlu0 %v660_v41 }
 0x2c4   : > { %v823_v42 = vpop.xlane.xlu1 %822 }
 0x2c5   : > { %v824_v43 = vsub.f32 %v820_v35, %v823_v42 }
 0x2c7   : > { %v825_v44 = vmul.f32 1.442695, %v824_v43 }
 0x2c8   : > { %v666_v45 = vpop.permute.xlu1 %665 }
 0x2c9   : > { %1822 = vpow2.f32 %v825_v44  ;;  %1736 = vmatpush3.msra.mxu1 %v666_v45  ;;  %v1669_v45 = vld [vmem:[%s2097_s7] ss:$0 sm:$0xff] }
 0x2ca   : > { %1745 = vmatprep.subr.mxu1 %v1848_v9 }
 0x2d3   : > { %v1823_v46 = vpop.eup %1822 }
 0x2d4   : > { %v827_v47 = vsel %vm574_vm2, %v1823_v46, 0.0 }
 0x2d5   : > { %828 = vadd.xlane.f32.xlu1 %v827_v47 }
 0x2e6   : > { %832 = vrot.lane.b32.xlu1 %v1979_v19, %s1851_s13 }
 0x2ea   : > { %1056 = vrot.lane.b32.xlu1 %v1979_v19, %s1852_s14 }
 0x2ee   : > { %v662_v48 = vpop.xlane.xlu0 %661  ;;  %1054 = vrot.lane.b32.xlu1 %v1981_v22, %s1852_s14 }
 0x2ef   : > { %1824 = vrcp.f32 %v662_v48 }
 0x2f9   : > { %v1825_v49 = vpop.eup %1824 }
 0x2fa   : > { %v664_v50 = vmul.f32 %v1825_v49, %v1821_v40 }
 0x2fc   : > { %1738 = vmatmul.mubr.msk.f32.vlgmr.msra.gmra.mrb[2].mxu1 %vm574_vm2, %v664_v50 }
 0x2fd   : > { %1747 = vmatprep.mubr.msk.f32.mxu1 %vm1847_vm0, %v1848_v9 }
 0x362   : > { %v829_v52 = vpop.xlane.xlu1 %828 }
 0x363   : > { %1826 = vrcp.f32 %v829_v52 }
 0x366   : > { %v833_v53 = vpop.permute.xlu1 %832 }
 0x367   : > { %1746 = vmatpush3.msra.mxu1 %v833_v53 }
 0x368   : > { %1755 = vmatprep.subr.mxu1 %v1848_v9 }
 0x36a   : > { %v1057_v59 = vpop.permute.xlu1 %1056 }
 0x36d   : > { %v1827_v54 = vpop.eup %1826 }
 0x36e   : > { %v831_v55 = vmul.f32 %v1827_v54, %v1823_v46  ;;  %v1055_v62 = vpop.permute.xlu1 %1054 }
 0x370   : > { %1748 = vmatmul.mubr.msk.f32.vlgmr.msra.gmra.mrb[4].mxu1 %vm574_vm2, %v831_v55 }
 0x371   : > { %1756 = vmatpush3.msra.mxu1 %v409_v56  ;;  %1757 = vmatprep.mubr.msk.f32.mxu1 %vm1847_vm0, %v1848_v9 }
 0x372   : > { %1765 = vmatprep.subr.mxu1 %v1848_v9 }
 0x3cf   : > { %v737_v57 = vpop.f32.mrb[2].mxu1 }
 0x3d0   : > { %v1739_v58 = vpop.f32.mrb[3].mxu1  ;;  %1758 = vmatmul.mubr.msk.f32.vlgmr.msra.gmra.mrb[6].mxu1 %vm574_vm2, %v737_v57 }
 0x3d1   : > { %1767 = vmatprep.mubr.msk.f32.mxu1 %vm1847_vm0, %v1848_v9 }
 0x443   : > { %v904_v60 = vpop.f32.mrb[4].mxu1 }
 0x444   : > { %v1749_v61 = vpop.f32.mrb[5].mxu1  ;;  %1753 = vmatmul.mubr.msk.f32.vlgmr.msra.gmra.mrb[6].mxu0 %vm574_vm2, %v904_v60 }
 0x445   : > { %1761 = vmatpush3.xpose.msk.msra.mxu0 %vm574_vm2, %v1057_v59  ;;  %1762 = vmatprep.mubr.msk.f32.mxu0 %vm1847_vm0, %v1848_v9  ;;  %v1671_v61 = vld [vmem:[%s2099_s9] ss:$0 sm:$0xff] }
 0x446   : > { %1770 = vmatprep.subr.mxu0 %v1848_v9 }
 0x448   : > { %1763 = vmatmul.mubr.msk.f32.vlgmr.msra.gmra.mrb[8].mxu0 %vm574_vm2, %v1055_v62 }
 0x449   : > { %1772 = vmatprep.mubr.msk.f32.mxu0 %vm1847_vm0, %v1848_v9  ;;  %1771 = vmatpush3.msra.mxu0 %v411_v23 }
 0x44a   : > { %1780 = vmatprep.subr.mxu0 %v1848_v9 }
 0x4a3   : > { %v1050_v63 = vpop.f32.mrb[6].mxu1 }
 0x4a4   : > { %v1759_v0 = vpop.f32.mrb[7].mxu1 }
 0x517   : > { %v977_v1 = vpop.f32.mrb[6].mxu0 }
 0x518   : > { %v1051_v2 = vadd.f32 %v1050_v63, %v977_v1  ;;  %v1754_v3 = vpop.f32.mrb[7].mxu0 }
 0x51b   : > { %v1128_v4 = vpop.f32.mrb[8].mxu0 }
 0x51c   : > { %v1132_v5 = vmul.f32 0.35355338, %v1128_v4  ;;  %v1764_v6 = vpop.f32.mrb[9].mxu0 }
 0x51e   : > { %v1133_v7 = vadd.f32 %v1132_v5, %v2000_v27 }
 0x520   : > { %v1134_v8 = vsel %vm574_vm2, %v1133_v7, -inf }
 0x521   : > { %1135 = vmax.xlane.f32.xlu0 %v1134_v8 }
 0x537   : > { %1145 = vrot.lane.b32.xlu0 %v1979_v19, %s1853_s22 }
 0x53b   : > { %1297 = vrot.lane.b32.xlu0 %v1979_v19, %s1854_s23 }
 0x53f   : > { %1295 = vrot.lane.b32.xlu0 %v1981_v22, %s1854_s23 }
 0x5ae   : > { %v1136_v10 = vpop.xlane.xlu0 %1135 }
 0x5af   : > { %v1137_v11 = vsub.f32 %v1133_v7, %v1136_v10 }
 0x5b1   : > { %v1138_v12 = vmul.f32 1.442695, %v1137_v11 }
 0x5b2   : > { %v1146_v13 = vpop.permute.xlu0 %1145 }
 0x5b3   : > { %1828 = vpow2.f32 %v1138_v12  ;;  %1766 = vmatpush3.msra.mxu1 %v1146_v13 }
 0x5b4   : > { %1775 = vmatprep.subr.mxu1 %v1848_v9 }
 0x5b6   : > { %v1298_v20 = vpop.permute.xlu0 %1297 }
 0x5ba   : > { %v1296_v22 = vpop.permute.xlu0 %1295 }
 0x5bd   : > { %v1829_v14 = vpop.eup %1828 }
 0x5be   : > { %v1140_v16 = vsel %vm574_vm2, %v1829_v14, 0.0 }
 0x5bf   : > { %1141 = vadd.xlane.f32.xlu1 %v1140_v16 }
 0x64c   : > { %v1142_v17 = vpop.xlane.xlu1 %1141 }
 0x64d   : > { %1830 = vrcp.f32 %v1142_v17 }
 0x657   : > { %v1831_v18 = vpop.eup %1830 }
 0x658   : > { %v1144_v21 = vmul.f32 %v1831_v18, %v1829_v14 }
 0x65a   : > { %1768 = vmatmul.mubr.msk.f32.vlgmr.msra.gmra.mrb[8].mxu1 %vm574_vm2, %v1144_v21 }
 0x65b   : > { %1776 = vmatpush3.xpose.msk.msra.mxu1 %vm574_vm2, %v1298_v20  ;;  %1777 = vmatprep.mubr.msk.f32.mxu1 %vm1847_vm0, %v1848_v9 }
 0x65c   : > { %1785 = vmatprep.subr.mxu1 %v1848_v9 }
 0x65e   : > { %1778 = vmatmul.mubr.msk.f32.vlgmr.msra.gmra.mrb[10].mxu1 %vm574_vm2, %v1296_v22 }
 0x65f   : > { %1787 = vmatprep.mubr.msk.f32.mxu1 %vm1847_vm0, %v1848_v9 }
 0x72d   : > { %v1217_v24 = vpop.f32.mrb[8].mxu1 }
 0x72e   : > { %v1769_v25 = vpop.f32.mrb[9].mxu1  ;;  %1773 = vmatmul.mubr.msk.f32.vlgmr.msra.gmra.mrb[10].mxu0 %vm574_vm2, %v1217_v24 }
 0x72f   : > { %1782 = vmatprep.mubr.msk.f32.mxu0 %vm1847_vm0, %v1848_v9  ;;  %v412_v9 = vld [vmem:[%s2096_s6 + $0x18] sm:$0xff] }
 0x730   : > { %1786 = vmatpush3.msra.mxu1 %v412_v9 }
 0x731   : > { %v1369_v26 = vpop.f32.mrb[10].mxu1 }
 0x732   : > { %v1373_v28 = vmul.f32 0.35355338, %v1369_v26  ;;  %v1779_v29 = vpop.f32.mrb[11].mxu1 }
 0x734   : > { %v1374_v30 = vadd.f32 %v1373_v28, %v2000_v27 }
 0x736   : > { %v1375_v31 = vsel %vm574_vm2, %v1374_v30, -inf }
 0x737   : > { %1376 = vmax.xlane.f32.xlu0 %v1375_v31 }
 0x7c4   : > { %v1377_v32 = vpop.xlane.xlu0 %1376 }
 0x7c5   : > { %v1378_v33 = vsub.f32 %v1374_v30, %v1377_v32 }
 0x7c7   : > { %v1379_v34 = vmul.f32 1.442695, %v1378_v33 }
 0x7c9   : > { %1832 = vpow2.f32 %v1379_v34 }
 0x7d3   : > { %v1833_v35 = vpop.eup %1832 }
 0x7d4   : > { %v1381_v36 = vsel %vm574_vm2, %v1833_v35, 0.0 }
 0x7d5   : > { %1382 = vadd.xlane.f32.xlu1 %v1381_v36 }
 0x7e6   : > { %1386 = vrot.lane.b32.xlu1 %v1979_v19, %s1855_s25 }
 0x801   : > { %v1290_v27 = vpop.f32.mrb[10].mxu0 }
 0x802   : > { %v1294_v37 = vadd.f32 %v1290_v27, %v1051_v2  ;;  %v1774_v38 = vpop.f32.mrb[11].mxu0 }
 0x862   : > { %v1383_v39 = vpop.xlane.xlu1 %1382 }
 0x863   : > { %1834 = vrcp.f32 %v1383_v39 }
 0x866   : > { %v1387_v40 = vpop.permute.xlu1 %1386 }
 0x867   : > { %1781 = vmatpush3.msra.mxu0 %v1387_v40 }
 0x86d   : > { %v1835_v41 = vpop.eup %1834 }
 0x86e   : > { %v1385_v42 = vmul.f32 %v1835_v41, %v1833_v35 }
 0x870   : > { %1783 = vmatmul.mubr.msk.f32.vlgmr.msra.gmra.mrb[12].mxu0 %vm574_vm2, %v1385_v42 }
 0x943   : > { %v1458_v43 = vpop.f32.mrb[12].mxu0 }
 0x944   : > { %v1784_v44 = vpop.f32.mrb[13].mxu0  ;;  %1788 = vmatmul.mubr.msk.f32.vlgmr.msra.gmra.mrb[12].mxu1 %vm574_vm2, %v1458_v43 }
 0xa17   : > { %v1531_v19 = vpop.f32.mrb[12].mxu1 }
 0xa18   : > { %v1535_v46 = vadd.f32 %v1531_v19, %v1294_v37  ;;  %v1789_v47 = vpop.f32.mrb[13].mxu1 }
 0xa1a   : > { %v1543_v48 = vadd.f32 %v1669_v45, %v1535_v46 }
 0xa1c   : > { %v1544_v49 = vadd.f32 %v1543_v48, %v1962_v15  ;;  %v1670_v15 = vld [vmem:[%s2098_s8] ss:$0 sm:$0xff] }
 0xa1e   : > { %v1547_v50 = vsel %vm420_vm1, %v1544_v49, 0.0 }
 0xa1f   : > { %1548 = vadd.xlane.f32.xlu1 %v1547_v50 }
 0xaac   : > { %v1549_v51 = vpop.xlane.xlu1 %1548 }
 0xaad   : > { %v1551_v52 = vmul.f32 0.03125, %v1549_v51 }
 0xaaf   : > { %v1552_v53 = vsub.f32 %v1544_v49, %v1551_v52 }
 0xab1   : > { %v1553_v54 = vmul.f32 %v1552_v53, %v1552_v53 }
 0xab3   : > { %v1554_v55 = vsel %vm420_vm1, %v1553_v54, 0.0 }
 0xab4   : > { %1555 = vadd.xlane.f32.xlu0 %v1554_v55 }
 0xb41   : > { %v1556_v56 = vpop.xlane.xlu0 %1555 }
 0xb42   : > { %v1557_v57 = vmul.f32 0.03125, %v1556_v56 }
 0xb44   : > { %v1558_v58 = vadd.f32 1e-05, %v1557_v57 }
 0xb46   : > { %1836 = vrsqrt.f32 %v1558_v58 }
 0xb50   : > { %v1837_v59 = vpop.eup %1836 }
 0xb51   : > { %v1560_v60 = vmul.f32 %v1837_v59, %v1552_v53 }
 0xb53   : > { %v1567_v62 = vmul.f32 %v1670_v15, %v1560_v60 }
 0xb55   : > { %v1574_v63 = vadd.f32 %v1671_v61, %v1567_v62 }
 0xb57   : > { %1575 = vst.msk [vmem:[%s398_s20] sm:$0xff] %vm420_vm1, %v1574_v63 }
 0xb58 PF: > { %s21_s17 = sadd.s32 1, %s1844_s17  }
 0xb59   : > { %p18_p4 = scmp.ge.s32.totalorder %s21_s17, 4  }
 0xb5b   :  { %20 = sbr.rel (!%p18_p4) target bundleno = 1 (0x1), region = 97 }

// kernel: time_series_transformer_forward.25
= control target key start
LH: loop header
LB: loop body
LE: loop exit
PB: predicated region body
PF: predicated region fallthrough
CT: control target
= control target key end

     0   :  { %s381_s0 = inlined_call_operand.vmem [shape: f32[2,256], index: 0, kind: input, shape index: {}]   ;;  %s382_s1 = inlined_call_operand.vmem [shape: f32[256,8], index: 1, kind: input, shape index: {}]   ;;  %s383_s2 = inlined_call_operand.vmem [shape: f32[1,8], index: 2, kind: input, shape index: {}]   ;;  %s384_s3 = inlined_call_operand.hbm [shape: f32[2,8], index: 3, kind: output, shape index: {}]  }
   0x1   :  { %v32_v0 = vld [vmem:[%s382_s1 + $0x80] sm:$0xff]  ;;  %v33_v1 = vld [vmem:[%s382_s1 + $0x88] sm:$0xff]  ;;  %v34_v5 = vld [vmem:[%s382_s1 + $0x90] sm:$0xff] }
   0x2   :  { %v16_v2 = vld [vmem:[%s382_s1] sm:$0xff]  ;;  %v189_v3 = vpack.c.bf16 %v33_v1, %v32_v0  ;;  %v17_v4 = vld [vmem:[%s382_s1 + $0x8] sm:$0xff]  ;;  %v35_v6 = vld [vmem:[%s382_s1 + $0x98] sm:$0xff] }
   0x3   :  { %v191_v7 = vpack.c.bf16 %v17_v4, %v16_v2  ;;  %v193_v8 = vpack.c.bf16 %v35_v6, %v34_v5  ;;  %v18_v9 = vld [vmem:[%s382_s1 + $0x10] sm:$0xff]  ;;  %v19_v10 = vld [vmem:[%s382_s1 + $0x18] sm:$0xff]  ;;  %v36_v11 = vld [vmem:[%s382_s1 + $0xa0] sm:$0xff] }
   0x4   :  { %190 = vmatprep.subr.bf16.mxu0 %v189_v3  ;;  %v37_v12 = vld [vmem:[%s382_s1 + $0xa8] sm:$0xff]  ;;  %v195_v13 = vpack.c.bf16 %v19_v10, %v18_v9  ;;  %v20_v15 = vld [vmem:[%s382_s1 + $0x20] sm:$0xff]  ;;  %v38_v17 = vld [vmem:[%s382_s1 + $0xb0] sm:$0xff] }
   0x5   :  { %192 = vmatpush3.bf16.msra.mxu0 %v191_v7  ;;  %v197_v14 = vpack.c.bf16 %v37_v12, %v36_v11  ;;  %v21_v16 = vld [vmem:[%s382_s1 + $0x28] sm:$0xff]  ;;  %v39_v18 = vld [vmem:[%s382_s1 + $0xb8] sm:$0xff]  ;;  %v22_v21 = vld [vmem:[%s382_s1 + $0x30] sm:$0xff] }
   0x6   :  { %194 = vmatprep.subr.bf16.mxu0 %v193_v8  ;;  %v199_v19 = vpack.c.bf16 %v21_v16, %v20_v15  ;;  %v201_v20 = vpack.c.bf16 %v39_v18, %v38_v17  ;;  %v23_v22 = vld [vmem:[%s382_s1 + $0x38] sm:$0xff]  ;;  %v40_v23 = vld [vmem:[%s382_s1 + $0xc0] sm:$0xff]  ;;  %v41_v24 = vld [vmem:[%s382_s1 + $0xc8] sm:$0xff] }
   0x7   :  { %v153_v25 = vld.sshfl [vmem:[%s381_s0] sm:$0x33 pattern:$0x76325410] }
   0x8   :  { %v63_v26 = vcombine.high %v153_v25, %v153_v25 }
   0x9   :  { %196 = vmatpush3.bf16.msra.mxu0 %v195_v13 }
   0xa   :  { %198 = vmatprep.subr.bf16.mxu0 %v197_v14 }
   0xb   :  { %8 = vsyncpa [#allocation3], 0  ;;  %v203_v27 = vpack.c.bf16 %v23_v22, %v22_v21  ;;  %v205_v28 = vpack.c.bf16 %v41_v24, %v40_v23  ;;  %v24_v29 = vld [vmem:[%s382_s1 + $0x40] sm:$0xff]  ;;  %v25_v30 = vld [vmem:[%s382_s1 + $0x48] sm:$0xff]  ;;  %130 = vmatprep.mubr.f32.mxu0 %v63_v26  ;;  %s246_s25 = smov [#allocation2]   ;;  %vm136_vm0 = vcmask 58368  }
   0xc   :  { %v42_v31 = vld [vmem:[%s382_s1 + $0xd0] sm:$0xff]  ;;  %v43_v32 = vld [vmem:[%s382_s1 + $0xd8] sm:$0xff]  ;;  %v207_v33 = vpack.c.bf16 %v25_v30, %v24_v29  ;;  %v44_v37 = vld [vmem:[%s382_s1 + $0xe0] sm:$0xff]  ;;  %s144_s26 = sshll.u32 %s246_s25, 4  ;;  %s145_s26 = int_to_ptr.vmem [resolvable:$true] %s144_s26 }
   0xd   :  { %200 = vmatpush3.bf16.msra.mxu0 %v199_v19  ;;  %v209_v34 = vpack.c.bf16 %v43_v32, %v42_v31  ;;  %v26_v35 = vld [vmem:[%s382_s1 + $0x50] sm:$0xff]  ;;  %v27_v36 = vld [vmem:[%s382_s1 + $0x58] sm:$0xff]  ;;  %v45_v38 = vld [vmem:[%s382_s1 + $0xe8] sm:$0xff]  ;;  %s222_s27 = scalar_lea.vmem %s145_s26, 32  ;;  %p227_p1 = scmp.lt.s32.totalorder %s145_s26, %s145_s26 }
   0xe   :  { %202 = vmatprep.subr.bf16.mxu0 %v201_v20  ;;  %v211_v39 = vpack.c.bf16 %v27_v36, %v26_v35  ;;  %v213_v40 = vpack.c.bf16 %v45_v38, %v44_v37  ;;  %v28_v41 = vld [vmem:[%s382_s1 + $0x60] sm:$0xff]  ;;  %v29_v42 = vld [vmem:[%s382_s1 + $0x68] sm:$0xff]  ;;  %v46_v43 = vld [vmem:[%s382_s1 + $0xf0] sm:$0xff]  ;;  %p223_p0 = scmp.ne.s32.totalorder %s145_s26, %s222_s27  ;;  %p228_p2 = scmp.lt.s32.totalorder %s222_s27, %s222_s27 }
   0xf   :  { %v47_v44 = vld [vmem:[%s382_s1 + $0xf8] sm:$0xff]  ;;  %v215_v45 = vpack.c.bf16 %v29_v42, %v28_v41  ;;  %v30_v47 = vld [vmem:[%s382_s1 + $0x70] sm:$0xff]  ;;  %v152_v51 = vld [vmem:[%s383_s2] ss:$0 sm:$0xff] }
  0x10   :  { %v217_v46 = vpack.c.bf16 %v47_v44, %v46_v43  ;;  %v31_v48 = vld [vmem:[%s382_s1 + $0x78] sm:$0xff]  ;;  %p229_p3 = por %p228_p2, %p227_p1 }
  0x11   :  { %204 = vmatpush3.bf16.msra.mxu0 %v203_v27  ;;  %v219_v49 = vpack.c.bf16 %v31_v48, %v30_v47 }
  0x12   :  { %206 = vmatprep.subr.bf16.mxu0 %v205_v28  ;;  %p230_p4 = pnand %p229_p3, %p223_p0 }
  0x15   :  { %208 = vmatpush3.bf16.msra.mxu0 %v207_v33 }
  0x16   :  { %210 = vmatprep.subr.bf16.mxu0 %v209_v34 }
  0x19   :  { %212 = vmatpush3.bf16.msra.mxu0 %v211_v39 }
  0x1a   :  { %214 = vmatprep.subr.bf16.mxu0 %v213_v40 }
  0x1d   :  { %216 = vmatpush3.bf16.msra.mxu0 %v215_v45 }
  0x1e   :  { %218 = vmatprep.subr.bf16.mxu0 %v217_v46 }
  0x21   :  { %220 = vmatpush3.bf16.msra.mxu0 %v219_v49 }
  0x24   :  { %131 = vmatmul.mubr.f32.vlgmr.msra.gmra.mrb[0].mxu0 %v153_v25 }
  0xf7   :  { %v186_v50 = vpop.f32.mrb[0].mxu0 }
  0xf8   :  { %v187_v52 = vpop.f32.mrb[1].mxu0 }
  0xf9   :  { %v188_v53 = vadd.f32 %v187_v52, %v186_v50 }
  0xfb   :  { %v133_v54 = vadd.f32 %v188_v53, %v152_v51 }
  0xfd   :  { %137 = vst.msk [vmem:[#allocation2] sm:$0x3] %vm136_vm0, %v133_v54 }
  0xfe   :  { %233 = shalt.err (!%p230_p4)
}
  0xff   :  { %s234_s0 = scalar_lea.hbm %s384_s3, 32 }
 0x100   :  { %p235_p5 = scmp.ne.s32.totalorder %s384_s3, %s234_s0  ;;  %p238_p6 = scmp.lt.u32.totalorder %s234_s0, %s384_s3 }
 0x102   :  { %p240_p7 = pnand %p238_p6, %p235_p5 }
 0x104   :  { %243 = shalt.err (!%p240_p7)
}
 0x105   :  { %147 = dma.vmem_to_hbm [thread:$0]  %s145_s26, 32, %s384_s3, [#allocation3]  }
 0x106   :  { %244 = dma.done.wait [#allocation3], 32  }
 0x107   :  { %245 = vsyncadd [#allocation3], 4294967264 }
 0x108   :  { %151 = vsyncpa [#allocation3], 1 }

// kernel: time_series_transformer_forward.20
= control target key start
LH: loop header
LB: loop body
LE: loop exit
PB: predicated region body
PF: predicated region fallthrough
CT: control target
= control target key end

     0   :  { %s2053_s17 = smov 0   ;;  %s2237_s0 = inlined_call_operand.vmem [shape: f32[2,8,32], index: 0, kind: input, shape index: {}]   ;;  %s2238_s1 = inlined_call_operand.vmem [shape: f32[2,16,32], index: 1, kind: input, shape index: {}]   ;;  %s2239_s2 = inlined_call_operand.vmem [shape: f32[32,32], index: 2, kind: input, shape index: {}]   ;;  %s2240_s3 = inlined_call_operand.vmem [shape: f32[1,32], index: 3, kind: input, shape index: {}]   ;;  %s2241_s4 = inlined_call_operand.vmem [shape: f32[32,64], index: 4, kind: input, shape index: {}]   ;;  %s2242_s5 = inlined_call_operand.vmem [shape: f32[1,64], index: 5, kind: input, shape index: {}]   ;;  %s2243_s6 = inlined_call_operand.vmem [shape: f32[32,32], index: 6, kind: input, shape index: {}]   ;;  %s2244_s7 = inlined_call_operand.vmem [shape: f32[1,32], index: 7, kind: input, shape index: {}]   ;;  %s2245_s8 = inlined_call_operand.vmem [shape: f32[1,32], index: 8, kind: input, shape index: {}]   ;;  %s2246_s9 = inlined_call_operand.vmem [shape: f32[1,32], index: 9, kind: input, shape index: {}]   ;;  %s2247_s10 = inlined_call_operand.vmem [shape: f32[8,16], index: 10, kind: input, shape index: {}]   ;;  %s2248_s11 = inlined_call_operand.vmem [shape: f32[2,8,32], index: 11, kind: output, shape index: {}]  }
   0x1 LB: > { %s1681_s18 = sadd.s32 4294967295, %s1981_s17   ;;  %p1685_p0 = scmp.ge.s32.totalorder %s1981_s17, 1  ;;  %s1981_s17 = sphi %s2053_s17, %s21_s17  }
   0x2   : > { %p346_p1 = scmp.lt.s32.totalorder %s1981_s17, 3 }
   0x4   : > { %p347_p2 = pnand %p1685_p0, %p346_p1 }
   0x5   : > { %v409_v0 = vld [vmem:[%s2241_s4] sm:$0xff] (!%p347_p2)  ;;  %v410_v1 = vld [vmem:[%s2241_s4 + $0x8] sm:$0xff] (!%p347_p2)  ;;  %v411_v2 = vld [vmem:[%s2241_s4 + $0x10] sm:$0xff] (!%p347_p2)  ;;  %p389_p3 = scmp.lt.s32.totalorder (!%p347_p2), %s1681_s18, 1  ;;  %v1983_v5 = vmov (!%p347_p2), 0.0|0.0   ;;  %vm1984_vm0 = vmmov (!%p347_p2), 0  }
   0x6   : > { %350 = sbr.rel (%p347_p2) target bundleno = 3020 (0xbcc), region = 64  ;;  %v1868_v3 = vpack.c.bf16 (!%p347_p2), %v410_v1, %v409_v0  ;;  %v412_v4 = vld [vmem:[%s2241_s4 + $0x18] sm:$0xff] (!%p347_p2)  ;;  %1862 = vmatprep.subr.bf16.mxu0 (!%p347_p2), %v1983_v5  ;;  %v405_v6 = vld [vmem:[%s2239_s2] sm:$0xff] (!%p347_p2)  ;;  %v406_v7 = vld [vmem:[%s2239_s2 + $0x8] sm:$0xff] (!%p347_p2)  ;;  %v1985_v12 = vmov (!%p347_p2), 0.0   ;;  %vm424_vm1 = vcmask (!%p347_p2), 261120  }
   0x7   : > { %v1872_v8 = vpack.c.bf16 (!%p347_p2), %v412_v4, %v411_v2  ;;  %v1863_v9 = vpack.c.bf16 (!%p347_p2), %v406_v7, %v405_v6  ;;  %v407_v10 = vld [vmem:[%s2239_s2 + $0x10] sm:$0xff] (!%p347_p2)  ;;  %v408_v11 = vld [vmem:[%s2239_s2 + $0x18] sm:$0xff] (!%p347_p2)  ;;  %1772 = vmatprep.mubr.msk.f32.mxu0 (!%p347_p2), %vm1984_vm0, %v1985_v12  ;;  %v1692_v17 = vld [vmem:[%s2242_s5] ss:$0 sm:$0xff] (!%p347_p2)  ;;  %vm586_vm2 = vcmask (!%p347_p2), 64512   ;;  %s1986_s28 = smov (!%p347_p2), 96  }
   0x8   : > { %1869 = vmatprep.subr.bf16.mxu1 (!%p347_p2), %v1868_v3  ;;  %v1866_v13 = vpack.c.bf16 (!%p347_p2), %v408_v11, %v407_v10  ;;  %vm2118_vm3 = vmpackc.low (!%p347_p2), %vm586_vm2, %vm586_vm2  ;;  %v1690_v27 = vld [vmem:[%s2240_s3] ss:$0 sm:$0xff] (!%p347_p2)  ;;  %s1987_s12 = smov (!%p347_p2), 120   ;;  %vm669_vm4 = vcmask (!%p347_p2), 130048   ;;  %s1988_s20 = smov (!%p347_p2), 88   ;;  %v414_v11 = vld [vmem:[%s2243_s6 + $0x8] sm:$0xff] (!%p347_p2) }
   0x9   : > { %1871 = vmatpush3.bf16.msra.mxu1 (!%p347_p2), %v1868_v3  ;;  %1864 = vmatpush3.bf16.msra.mxu0 (!%p347_p2), %v1863_v9  ;;  %v2139_v34 = vld [vmem:[%s2247_s10] sm:$0xff] (!%p347_p2)  ;;  %s1989_s21 = smov (!%p347_p2), 112   ;;  %s1992_s26 = smov (!%p347_p2), 72  }
   0xa   : > { %1873 = vmatprep.subr.bf16.mxu1 (!%p347_p2), %v1872_v8  ;;  %1865 = vmatprep.subr.bf16.mxu0 (!%p347_p2), %v1983_v5  ;;  %v413_v52 = vld [vmem:[%s2243_s6] sm:$0xff] (!%p347_p2) }
   0xd   : > { %s2252_s18 = smov (!%p389_p3, %s1681_s18), 1  ;;  %1875 = vmatpush3.bf16.msra.mxu1 %v1872_v8  ;;  %1867 = vmatpush3.bf16.msra.mxu0 %v1866_v13 }
   0xe   : > { %s1720_s16 = sshll.u32 %s2252_s18, 4  ;;  %s1686_s19 = sshll.u32 %s2252_s18, 3  ;;  %1876 = vmatprep.subr.bf16.mxu0 %v1983_v5  ;;  %1880 = vmatprep.subr.bf16.mxu1 %v1983_v5 }
   0xf   : > { %s397_s22 = scalar_lea.vmem %s2238_s1, %s1720_s16  ;;  %s392_s25 = scalar_lea.vmem %s2237_s0, %s1686_s19 }
  0x10   : > { %v403_v14 = vld [vmem:[%s397_s22] sm:$0xff]  ;;  %v404_v15 = vld [vmem:[%s397_s22 + $0x8] sm:$0xff]  ;;  %s1990_s22 = smov 104   ;;  %s401_s23 = scalar_lea.vmem %s2248_s11, %s1686_s19 }
  0x11   : > { %1783 = vmatprep.mubr.msk.f32.mxu1 %vm424_vm1, %v403_v14  ;;  %v2102_v16 = vld [vmem:[%s392_s25] sm:$0xff]  ;;  %s1991_s25 = smov 80  }
  0x12   : > { %1784 = vmatmul.mubr.msk.f32.vlgmr.msra.gmra.mrb[0].mxu1 %vm424_vm1, %v404_v15  ;;  %1773 = vmatmul.mubr.msk.f32.vlgmr.msra.gmra.mrb[0].mxu0 %vm424_vm1, %v2102_v16 }
  0x13   : > { %1790 = vmatprep.mubr.msk.f32.mxu0 %vm1984_vm0, %v1985_v12  ;;  %1797 = vmatprep.mubr.msk.f32.mxu1 %vm1984_vm0, %v1985_v12 }
  0xe5   : > { %v1785_v18 = vpop.f32.mrb[0].mxu1  ;;  %v494_v19 = vpop.f32.mrb[0].mxu0 }
  0xe6   : > { %v583_v20 = vadd.f32 %v1785_v18, %v1692_v17  ;;  %v577_v21 = vpop.f32.mrb[1].mxu1  ;;  %v1774_v22 = vpop.f32.mrb[1].mxu0  ;;  %v495_v28 = vadd.f32 %v1690_v27, %v494_v19 }
  0xe7   : > { %v578_v23 = vadd.f32 %v1692_v17, %v577_v21 }
  0xe9   : > { %v2122_v25 = vpack.i.bf16 %v583_v20, %v578_v23  ;;  %v1877_v26 = vpack.c.bf16 %v583_v20, %v578_v23 }
  0xeb   : > { %1923 = vrot.lane.b32.xlu1 %v2122_v25, %s1986_s28  ;;  %1879 = vmatpush3.bf16.xpose.msk.msra.mxu0 %vm2118_vm3, %v1877_v26 }
  0xec   : > { %1887 = vmatprep.subr.bf16.mxu0 %v1983_v5 }
  0xef   : > { %1928 = vrot.lane.b32.xlu1 %v2122_v25, %s1987_s12 }
  0xf2   : > { %1791 = vmatmul.mubr.msk.f32.vlgmr.msra.gmra.mrb[2].mxu0 %vm586_vm2, %v495_v28 }
  0xf3   : > { %1811 = vmatprep.mubr.msk.f32.mxu0 %vm1984_vm0, %v1985_v12 }
 0x15d   : > { %v1924_v29 = vpop.permute.xlu1 %1923 }
 0x15e   : > { %v1926_v30 = vunpack.i.h.bf16 %v1924_v29  ;;  %v1925_v31 = vunpack.i.l.bf16 %v1924_v29 }
 0x160   : > { %v1881_v32 = vpack.c.bf16 %v1926_v30, %v1925_v31 }
 0x161   : > { %v1929_v45 = vpop.permute.xlu1 %1928 }
 0x162   : > { %1882 = vmatpush3.bf16.msra.mxu1 %v1881_v32  ;;  %v1931_v46 = vunpack.i.h.bf16 %v1929_v45  ;;  %v1930_v47 = vunpack.i.l.bf16 %v1929_v45 }
 0x163   : > { %1883 = vmatprep.subr.bf16.mxu1 %v1983_v5 }
 0x164   : > { %v1884_v50 = vpack.c.bf16 %v1931_v46, %v1930_v47 }
 0x1c5   : > { %v662_v33 = vpop.f32.mrb[2].mxu0 }
 0x1c6   : > { %v666_v35 = vmul.f32 0.35355338, %v662_v33  ;;  %v1792_v36 = vpop.f32.mrb[3].mxu0 }
 0x1c8   : > { %v668_v37 = vadd.f32 %v2139_v34, %v666_v35 }
 0x1ca   : > { %v670_v38 = vsel %vm669_vm4, %v668_v37, -inf }
 0x1cb   : > { %671 = vmax.xlane.f32.xlu0 %v670_v38 }
 0x258   : > { %v672_v39 = vpop.xlane.xlu0 %671 }
 0x259   : > { %v673_v40 = vsub.f32 %v668_v37, %v672_v39 }
 0x25b   : > { %v674_v41 = vmul.f32 1.442695, %v673_v40 }
 0x25d   : > { %1957 = vpow2.f32 %v674_v41 }
 0x267   : > { %v1958_v42 = vpop.eup %1957 }
 0x268   : > { %v676_v43 = vsel %vm669_vm4, %v1958_v42, 0.0 }
 0x269   : > { %677 = vadd.xlane.f32.xlu0 %v676_v43 }
 0x27f   : > { %760 = vrot.lane.b32.xlu0 %v495_v28, %s1987_s12 }
 0x2f6   : > { %v678_v44 = vpop.xlane.xlu0 %677 }
 0x2f7   : > { %1959 = vrcp.f32 %v678_v44 }
 0x2fa   : > { %v761_v51 = vpop.permute.xlu0 %760 }
 0x301   : > { %v1960_v48 = vpop.eup %1959 }
 0x302   : > { %v680_v49 = vmul.f32 %v1960_v48, %v1958_v42 }
 0x304   : > { %1798 = vmatmul.mubr.msk.f32.vlgmr.msra.gmra.mrb[2].mxu1 %vm669_vm4, %v680_v49 }
 0x305   : > { %1886 = vmatpush3.bf16.xpose.msk.msra.mxu1 %vm2118_vm3, %v1884_v50  ;;  %1804 = vmatprep.mubr.msk.f32.mxu1 %vm1984_vm0, %v1985_v12 }
 0x306   : > { %1819 = vmatprep.subr.mxu1 %v1985_v12 }
 0x30c   : > { %1805 = vmatmul.mubr.msk.f32.vlgmr.msra.gmra.mrb[4].mxu1 %vm586_vm2, %v761_v51 }
 0x30d   : > { %1821 = vmatprep.mubr.msk.f32.mxu1 %vm1984_vm0, %v1985_v12  ;;  %1820 = vmatpush3.msra.mxu1 %v413_v52 }
 0x30e   : > { %1894 = vmatprep.subr.bf16.mxu1 %v1983_v5 }
 0x3d7   : > { %v756_v53 = vpop.f32.mrb[2].mxu1 }
 0x3d8   : > { %v1799_v54 = vpop.f32.mrb[3].mxu1  ;;  %1822 = vmatmul.mubr.msk.f32.vlgmr.msra.gmra.mrb[6].mxu1 %vm586_vm2, %v756_v53 }
 0x3d9   : > { %1835 = vmatprep.mubr.msk.f32.mxu1 %vm1984_vm0, %v1985_v12 }
 0x3df   : > { %v838_v55 = vpop.f32.mrb[4].mxu1 }
 0x3e0   : > { %v842_v56 = vmul.f32 0.35355338, %v838_v55  ;;  %v1806_v57 = vpop.f32.mrb[5].mxu1 }
 0x3e1   : > { %v415_v57 = vld [vmem:[%s2243_s6 + $0x10] sm:$0xff] }
 0x3e2   : > { %v843_v58 = vadd.f32 %v842_v56, %v2139_v34 }
 0x3e4   : > { %v844_v59 = vsel %vm669_vm4, %v843_v58, -inf }
 0x3e5   : > { %845 = vmax.xlane.f32.xlu1 %v844_v59 }
 0x3f6   : > { %1933 = vrot.lane.b32.xlu1 %v2122_v25, %s1988_s20 }
 0x3fa   : > { %1080 = vrot.lane.b32.xlu1 %v495_v28, %s1989_s21 }
 0x3fe   : > { %1943 = vrot.lane.b32.xlu1 %v2122_v25, %s1990_s22 }
 0x402   : > { %1328 = vrot.lane.b32.xlu1 %v495_v28, %s1990_s22 }
 0x472   : > { %v846_v60 = vpop.xlane.xlu1 %845 }
 0x473   : > { %v847_v61 = vsub.f32 %v843_v58, %v846_v60 }
 0x475   : > { %v848_v62 = vmul.f32 1.442695, %v847_v61 }
 0x476   : > { %v1934_v63 = vpop.permute.xlu1 %1933 }
 0x477   : > { %1961 = vpow2.f32 %v848_v62  ;;  %v1936_v0 = vunpack.i.h.bf16 %v1934_v63  ;;  %v1935_v1 = vunpack.i.l.bf16 %v1934_v63 }
 0x479   : > { %v1888_v2 = vpack.c.bf16 %v1936_v0, %v1935_v1 }
 0x47a   : > { %v1081_v14 = vpop.permute.xlu1 %1080 }
 0x47b   : > { %1889 = vmatpush3.bf16.msra.mxu0 %v1888_v2 }
 0x47c   : > { %1814 = vmatprep.subr.mxu0 %v1985_v12 }
 0x47e   : > { %v1944_v20 = vpop.permute.xlu1 %1943 }
 0x47f   : > { %v1946_v22 = vunpack.i.h.bf16 %v1944_v20  ;;  %v1945_v23 = vunpack.i.l.bf16 %v1944_v20 }
 0x481   : > { %v1962_v3 = vpop.eup %1961  ;;  %v1898_v26 = vpack.c.bf16 %v1946_v22, %v1945_v23 }
 0x482   : > { %v850_v4 = vsel %vm669_vm4, %v1962_v3, 0.0  ;;  %v1329_v27 = vpop.permute.xlu1 %1328 }
 0x483   : > { %851 = vadd.xlane.f32.xlu0 %v850_v4 }
 0x499   : > { %1938 = vrot.lane.b32.xlu0 %v2122_v25, %s1989_s21 }
 0x4ab   : > { %v1076_v6 = vpop.f32.mrb[6].mxu1 }
 0x4ac   : > { %v1823_v7 = vpop.f32.mrb[7].mxu1 }
 0x510   : > { %v852_v8 = vpop.xlane.xlu0 %851 }
 0x511   : > { %1963 = vrcp.f32 %v852_v8 }
 0x514   : > { %v1939_v13 = vpop.permute.xlu0 %1938 }
 0x515   : > { %v1941_v15 = vunpack.i.h.bf16 %v1939_v13  ;;  %v1940_v17 = vunpack.i.l.bf16 %v1939_v13 }
 0x517   : > { %v1891_v18 = vpack.c.bf16 %v1941_v15, %v1940_v17 }
 0x51b   : > { %v1964_v9 = vpop.eup %1963 }
 0x51c   : > { %v854_v10 = vmul.f32 %v1964_v9, %v1962_v3  ;;  %v1715_v9 = vld [vmem:[%s2244_s7] ss:$0 sm:$0xff] }
 0x51e   : > { %1812 = vmatmul.mubr.msk.f32.vlgmr.msra.gmra.mrb[4].mxu0 %vm669_vm4, %v854_v10 }
 0x51f   : > { %1815 = vmatpush3.msra.mxu0 %v414_v11  ;;  %1816 = vmatprep.mubr.msk.f32.mxu0 %vm1984_vm0, %v1985_v12 }
 0x520   : > { %1890 = vmatprep.subr.bf16.mxu0 %v1983_v5 }
 0x5f1   : > { %v930_v19 = vpop.f32.mrb[4].mxu0 }
 0x5f2   : > { %v1813_v21 = vpop.f32.mrb[5].mxu0  ;;  %1817 = vmatmul.mubr.msk.f32.vlgmr.msra.gmra.mrb[6].mxu0 %vm586_vm2, %v930_v19 }
 0x5f3   : > { %1893 = vmatpush3.bf16.xpose.msk.msra.mxu0 %vm2118_vm3, %v1891_v18  ;;  %1828 = vmatprep.mubr.msk.f32.mxu0 %vm1984_vm0, %v1985_v12 }
 0x5f4   : > { %1897 = vmatprep.subr.bf16.mxu0 %v1983_v5 }
 0x5fa   : > { %1829 = vmatmul.mubr.msk.f32.vlgmr.msra.gmra.mrb[8].mxu0 %vm586_vm2, %v1081_v14 }
 0x5fb   : > { %1900 = vmatpush3.bf16.xpose.msk.msra.mxu0 %vm2118_vm3, %v1898_v26  ;;  %1847 = vmatprep.mubr.msk.f32.mxu0 %vm1984_vm0, %v1985_v12 }
 0x602   : > { %1848 = vmatmul.mubr.msk.f32.vlgmr.msra.gmra.mrb[10].mxu0 %vm586_vm2, %v1329_v27 }
 0x6c5   : > { %v1003_v28 = vpop.f32.mrb[6].mxu0 }
 0x6c6   : > { %v2186_v29 = vadd.f32 %v1076_v6, %v1003_v28  ;;  %v1818_v30 = vpop.f32.mrb[7].mxu0  ;;  %v1717_v28 = vld [vmem:[%s2246_s9] ss:$0 sm:$0xff] }
 0x6cd   : > { %v1158_v31 = vpop.f32.mrb[8].mxu0 }
 0x6ce   : > { %v1162_v32 = vmul.f32 0.35355338, %v1158_v31  ;;  %v1830_v33 = vpop.f32.mrb[9].mxu0 }
 0x6d0   : > { %v1163_v35 = vadd.f32 %v1162_v32, %v2139_v34 }
 0x6d2   : > { %v1164_v36 = vsel %vm669_vm4, %v1163_v35, -inf }
 0x6d3   : > { %1165 = vmax.xlane.f32.xlu1 %v1164_v36 }
 0x6d5   : > { %v1406_v24 = vpop.f32.mrb[10].mxu0 }
 0x6d6   : > { %v1849_v37 = vpop.f32.mrb[11].mxu0  ;;  %v1410_v45 = vmul.f32 0.35355338, %v1406_v24 }
 0x6d8   : > { %v1411_v48 = vadd.f32 %v1410_v45, %v2139_v34 }
 0x6da   : > { %v1412_v49 = vsel %vm669_vm4, %v1411_v48, -inf }
 0x6e4   : > { %1948 = vrot.lane.b32.xlu1 %v2122_v25, %s1991_s25 }
 0x760   : > { %v1166_v38 = vpop.xlane.xlu1 %1165 }
 0x761   : > { %v1167_v39 = vsub.f32 %v1163_v35, %v1166_v38 }
 0x763   : > { %v1168_v40 = vmul.f32 1.442695, %v1167_v39 }
 0x764   : > { %v1949_v41 = vpop.permute.xlu1 %1948 }
 0x765   : > { %1965 = vpow2.f32 %v1168_v40  ;;  %v1951_v42 = vunpack.i.h.bf16 %v1949_v41  ;;  %v1950_v43 = vunpack.i.l.bf16 %v1949_v41 }
 0x767   : > { %v1895_v44 = vpack.c.bf16 %v1951_v42, %v1950_v43 }
 0x769   : > { %1896 = vmatpush3.bf16.msra.mxu1 %v1895_v44 }
 0x76a   : > { %1838 = vmatprep.subr.mxu1 %v1985_v12 }
 0x76f   : > { %v1966_v46 = vpop.eup %1965 }
 0x770   : > { %v1170_v47 = vsel %vm669_vm4, %v1966_v46, 0.0 }
 0x771   : > { %1171 = vadd.xlane.f32.xlu0 %v1170_v47 }
 0x775   : > { %1413 = vmax.xlane.f32.xlu0 %v1412_v49 }
 0x7fe   : > { %v1172_v50 = vpop.xlane.xlu0 %1171 }
 0x7ff   : > { %1967 = vrcp.f32 %v1172_v50 }
 0x802   : > { %v1414_v51 = vpop.xlane.xlu0 %1413 }
 0x803   : > { %v1415_v52 = vsub.f32 %v1411_v48, %v1414_v51 }
 0x805   : > { %v1416_v53 = vmul.f32 1.442695, %v1415_v52 }
 0x807   : > { %1969 = vpow2.f32 %v1416_v53 }
 0x809   : > { %v1968_v54 = vpop.eup %1967 }
 0x80a   : > { %v1174_v55 = vmul.f32 %v1968_v54, %v1966_v46 }
 0x80c   : > { %1836 = vmatmul.mubr.msk.f32.vlgmr.msra.gmra.mrb[8].mxu1 %vm669_vm4, %v1174_v55 }
 0x80d   : > { %1840 = vmatprep.mubr.msk.f32.mxu1 %vm1984_vm0, %v1985_v12  ;;  %1839 = vmatpush3.msra.mxu1 %v415_v57 }
 0x80e   : > { %1901 = vmatprep.subr.bf16.mxu1 %v1983_v5  ;;  %v416_v5 = vld [vmem:[%s2243_s6 + $0x18] sm:$0xff] }
 0x811   : > { %v1970_v56 = vpop.eup %1969 }
 0x812   : > { %v1418_v34 = vsel %vm669_vm4, %v1970_v56, 0.0 }
 0x813   : > { %1419 = vadd.xlane.f32.xlu0 %v1418_v34 }
 0x829   : > { %1953 = vrot.lane.b32.xlu0 %v2122_v25, %s1992_s26 }
 0x8a0   : > { %v1420_v58 = vpop.xlane.xlu0 %1419 }
 0x8a1   : > { %1971 = vrcp.f32 %v1420_v58 }
 0x8a4   : > { %v1954_v59 = vpop.permute.xlu0 %1953 }
 0x8a5   : > { %v1956_v60 = vunpack.i.h.bf16 %v1954_v59  ;;  %v1955_v61 = vunpack.i.l.bf16 %v1954_v59 }
 0x8a7   : > { %v1902_v63 = vpack.c.bf16 %v1956_v60, %v1955_v61 }
 0x8ab   : > { %v1972_v62 = vpop.eup %1971 }
 0x8ac   : > { %v1422_v25 = vmul.f32 %v1972_v62, %v1970_v56 }
 0x8df   : > { %v1250_v0 = vpop.f32.mrb[8].mxu1 }
 0x8e0   : > { %v1837_v1 = vpop.f32.mrb[9].mxu1  ;;  %1841 = vmatmul.mubr.msk.f32.vlgmr.msra.gmra.mrb[10].mxu1 %vm586_vm2, %v1250_v0 }
 0x8e1   : > { %1903 = vmatpush3.bf16.msra.mxu1 %v1902_v63  ;;  %1854 = vmatprep.mubr.msk.f32.mxu1 %vm1984_vm0, %v1985_v12 }
 0x8e2   : > { %1857 = vmatprep.subr.mxu1 %v1985_v12 }
 0x8e4   : > { %1855 = vmatmul.mubr.msk.f32.vlgmr.msra.gmra.mrb[12].mxu1 %vm669_vm4, %v1422_v25 }
 0x8e5   : > { %1859 = vmatprep.mubr.msk.f32.mxu1 %vm1984_vm0, %v1985_v12  ;;  %1858 = vmatpush3.msra.mxu1 %v416_v5 }
 0x9b3   : > { %v1323_v2 = vpop.f32.mrb[10].mxu1 }
 0x9b4   : > { %v1327_v3 = vadd.f32 %v1323_v2, %v2186_v29  ;;  %v1842_v4 = vpop.f32.mrb[11].mxu1 }
 0x9b7   : > { %v1498_v6 = vpop.f32.mrb[12].mxu1 }
 0x9b8   : > { %v1856_v7 = vpop.f32.mrb[13].mxu1  ;;  %1860 = vmatmul.mubr.msk.f32.vlgmr.msra.gmra.mrb[14].mxu1 %vm586_vm2, %v1498_v6 }
 0xa8b   : > { %v1571_v8 = vpop.f32.mrb[14].mxu1 }
 0xa8c   : > { %v1575_v10 = vadd.f32 %v1571_v8, %v1327_v3  ;;  %v1861_v12 = vpop.f32.mrb[15].mxu1 }
 0xa8e   : > { %v1583_v11 = vadd.f32 %v1715_v9, %v1575_v10 }
 0xa90   : > { %v1584_v13 = vadd.f32 %v1583_v11, %v2102_v16  ;;  %v1716_v16 = vld [vmem:[%s2245_s8] ss:$0 sm:$0xff] }
 0xa92   : > { %v1587_v14 = vsel %vm424_vm1, %v1584_v13, 0.0 }
 0xa93   : > { %1588 = vadd.xlane.f32.xlu1 %v1587_v14 }
 0xb20   : > { %v1589_v15 = vpop.xlane.xlu1 %1588 }
 0xb21   : > { %v1591_v17 = vmul.f32 0.03125, %v1589_v15 }
 0xb23   : > { %v1592_v18 = vsub.f32 %v1584_v13, %v1591_v17 }
 0xb25   : > { %v1593_v19 = vmul.f32 %v1592_v18, %v1592_v18 }
 0xb27   : > { %v1594_v20 = vsel %vm424_vm1, %v1593_v19, 0.0 }
 0xb28   : > { %1595 = vadd.xlane.f32.xlu0 %v1594_v20 }
 0xbb5   : > { %v1596_v21 = vpop.xlane.xlu0 %1595 }
 0xbb6   : > { %v1597_v22 = vmul.f32 0.03125, %v1596_v21 }
 0xbb8   : > { %v1598_v23 = vadd.f32 1e-05, %v1597_v22 }
 0xbba   : > { %1973 = vrsqrt.f32 %v1598_v23 }
 0xbc4   : > { %v1974_v26 = vpop.eup %1973 }
 0xbc5   : > { %v1600_v27 = vmul.f32 %v1974_v26, %v1592_v18 }
 0xbc7   : > { %v1607_v29 = vmul.f32 %v1716_v16, %v1600_v27 }
 0xbc9   : > { %v1614_v30 = vadd.f32 %v1717_v28, %v1607_v29 }
 0xbcb   : > { %1615 = vst.msk [vmem:[%s401_s23] sm:$0xff] %vm424_vm1, %v1614_v30 }
 0xbcc PF: > { %s21_s17 = sadd.s32 1, %s1981_s17  }
 0xbcd   : > { %p18_p4 = scmp.ge.s32.totalorder %s21_s17, 4  }
 0xbcf   :  { %20 = sbr.rel (!%p18_p4) target bundleno = 1 (0x1), region = 97 }

</bundles_post_ra>
